<compile_context>
chip_gen: v7x
topology: tpu7x:2x2x1
jax: 0.10.0
libtpu: 0.0.40
codegen_flags: <defaults>
</compile_context>

<pallas_src>
import functools

import jax
import jax.numpy as jnp
from jax import lax
from jax.experimental import pallas as pl
from jax.experimental.pallas import tpu as pltpu


# ------------------------------ fused kernel ------------------------------ #

def fused_attention_conv_kernel(x_ref, wq_ref, bq_ref, wk_ref, bk_ref,
                                wv_ref, bv_ref, w3_ref, b3_ref, o_ref,
                                *, num_heads, fp_num, width):
    """Attention heads + channel concat + 3x3 conv for a tile of F frames.

    x_ref  : (F, HW, C)            bf16 pixels x channels
    wq_ref : (C, nh*fp)   bq_ref : (1, nh*fp)
    wk_ref : (C, nh*fp)   bk_ref : (1, nh*fp)
    wv_ref : (C, nh*C)    bv_ref : (1, nh*C)
    w3_ref : (3, 3*nh*C, C)        bf16  (one matrix per vertical conv tap)
    b3_ref : (1, C)                f32
    o_ref  : (F, HW, C)            f32   final conv output
    """
    f, hw, c_in = x_ref.shape
    cc = num_heads * c_in
    c_out = o_ref.shape[2]

    # ---- q/k/v projections: flat M = F*HW, one 2-D dot per segment ---------
    x2 = x_ref[...].reshape(f * hw, c_in)                          # bf16
    q_all = jnp.dot(x2, wq_ref[...],
                    preferred_element_type=jnp.float32) + bq_ref[...]
    k_all = jnp.dot(x2, wk_ref[...],
                    preferred_element_type=jnp.float32) + bk_ref[...]
    v_all = jnp.dot(x2, wv_ref[...],
                    preferred_element_type=jnp.float32) + bv_ref[...]
    q3 = q_all.reshape(f, hw, num_heads * fp_num)
    k3 = k_all.reshape(f, hw, num_heads * fp_num)
    v3 = v_all.reshape(f, hw, num_heads * c_in)

    # ---- attention per head (nh is small; see header note) -----------------
    head_outs = []
    for h in range(num_heads):
        q = q3[:, :, h * fp_num:(h + 1) * fp_num].astype(jnp.bfloat16)
        k = k3[:, :, h * fp_num:(h + 1) * fp_num].astype(jnp.bfloat16)
        v = v3[:, :, h * c_in:(h + 1) * c_in].astype(jnp.bfloat16)
        # scores: contract fp directly (no explicit transpose of k)
        e = jnp.einsum("fpd,fqd->fpq", q, k,
                       preferred_element_type=jnp.float32)
        # softmax over spatial positions, f32, approx-reciprocal divide (EUP)
        e = e - jnp.max(e, axis=-1, keepdims=True)
        p = jnp.exp(e)
        inv = pl.reciprocal(jnp.sum(p, axis=-1, keepdims=True), approx=True)
        attn = (p * inv).astype(jnp.bfloat16)
        head_outs.append(jnp.einsum("fpq,fqc->fpc", attn, v,
                                    preferred_element_type=jnp.float32))
    head_cat = jnp.concatenate(head_outs, axis=-1)                 # (F,HW,cc) f32

    # ---- 3x3 / pad=1 conv epilogue, entirely in VMEM -----------------------
    # Horizontal taps: shift +-1 along the flattened pixel axis with zero
    # fill, mask the columns that wrapped across a row boundary, and pack the
    # 3 taps into channels (kw = 0,1,2  <->  j-1, j, j+1).
    col = lax.broadcasted_iota(jnp.int32, (1, hw, 1), 1) % width
    zero_px = jnp.zeros((f, 1, cc), jnp.float32)
    right_t = jnp.concatenate([head_cat[:, 1:, :], zero_px], axis=1)
    right_t = jnp.where(col == width - 1, 0.0, right_t)
    left_t = jnp.concatenate([zero_px, head_cat[:, :hw - 1, :]], axis=1)
    left_t = jnp.where(col == 0, 0.0, left_t)
    packed = jnp.concatenate([left_t, head_cat, right_t], axis=-1)  # (F,HW,3cc)

    # Vertical taps: shift by +-W (aligned when W % 8 == 0) with zero-filled
    # boundary rows, so no extra masks are needed.
    zero_row = jnp.zeros((f, width, 3 * cc), jnp.float32)
    src_up = jnp.concatenate([zero_row, packed[:, :hw - width, :]], axis=1)
    src_dn = jnp.concatenate([packed[:, width:, :], zero_row], axis=1)

    def tap(srcv, kh):
        return jnp.dot(srcv.reshape(f * hw, 3 * cc).astype(jnp.bfloat16),
                       w3_ref[kh], preferred_element_type=jnp.float32)

    acc = tap(src_up, 0)           # kh=0 (row i-1) initialises the accumulator
    acc = acc + tap(packed, 1)     # kh=1 (row i)
    acc = acc + tap(src_dn, 2)     # kh=2 (row i+1)
    acc = acc + b3_ref[...]
    o_ref[...] = acc.reshape(f, hw, c_out).astype(o_ref.dtype)


# ------------------------------ tiling logic ------------------------------ #

def _vmem_capacity_bytes():
    try:
        info = pltpu.get_tpu_info()
        return int(getattr(info, "vmem_capacity_bytes", 64 * 1024 * 1024))
    except Exception:
        return 64 * 1024 * 1024      # conservative fallback (v7x-sized)


def choose_frame_tile(n, hw, c, num_heads, fp_num):
    """Frames per grid step, sized against the actual chip's VMEM capacity."""
    cc = num_heads * c
    d_proj = num_heads * (2 * fp_num + c)
    budget = int(_vmem_capacity_bytes() * 0.40)   # headroom for weights/scratch
    per_frame = (
        2 * 2 * hw * c            # input tile, bf16, double-buffered
        + 2 * 4 * hw * c          # output tile, f32, double-buffered
        + 6 * hw * d_proj         # q/k/v projections (f32 + bf16 copies)
        + 3 * 4 * hw * hw         # per-head score/prob temporaries (f32)
        + 2 * 4 * hw * cc         # concatenated head output + shifted copies
        + 3 * 4 * hw * 3 * cc     # 3-tap packed input + shifted copies
        + 2 * 4 * hw * c          # conv accumulator
    )
    tile = max(1, budget // max(per_frame, 1))
    tile = min(tile, max(1, n))
    # v7x has 2 TensorCores: keep at least 2 "parallel" grid steps when n >= 2.
    if n >= 2:
        tile = min(tile, pl.cdiv(n, 2))
    return int(tile)


# ------------------------------ full forward ------------------------------ #

def self_attention_forward(x, params):
    b, t, c, h, w = x.shape
    num_heads, _, fp_num = params["wq"].shape
    n, hw = b * t, h * w
    cc = num_heads * c

    frame_tile = choose_frame_tile(n, hw, c, num_heads, fp_num)
    n_pad = pl.cdiv(n, frame_tile) * frame_tile

    # (b,T,C,H,W) -> (N, HW, C): channels on lanes
    xf = x.reshape(n, c, h, w).transpose(0, 2, 3, 1).reshape(n, hw, c)
    if n_pad != n:
        xf = jnp.pad(xf, ((0, n_pad - n), (0, 0), (0, 0)))
    xf = xf.astype(jnp.bfloat16)

    # Weight segments: [all-heads-Q], [all-heads-K], [all-heads-V]
    wq_all = params["wq"].transpose(1, 0, 2).reshape(c, num_heads * fp_num)
    wk_all = params["wk"].transpose(1, 0, 2).reshape(c, num_heads * fp_num)
    wv_all = params["wv"].transpose(1, 0, 2).reshape(c, num_heads * c)
    bq_all = params["bq"].transpose(1, 0, 2).reshape(1, num_heads * fp_num)
    bk_all = params["bk"].transpose(1, 0, 2).reshape(1, num_heads * fp_num)
    bv_all = params["bv"].transpose(1, 0, 2).reshape(1, num_heads * c)
    wq_all, wk_all, wv_all = (a.astype(jnp.bfloat16) for a in (wq_all, wk_all, wv_all))
    bq_all, bk_all, bv_all = (a.astype(jnp.float32) for a in (bq_all, bk_all, bv_all))

    # Conv weights (Cout, Cin, 3, 3) -> per vertical tap kh: rows (kw, cin)
    w3 = params["conv_w"].transpose(2, 3, 1, 0).reshape(3, 3 * cc, c)
    w3 = w3.astype(jnp.bfloat16)
    b3 = params["conv_b"].reshape(1, c).astype(jnp.float32)

    kernel = functools.partial(fused_attention_conv_kernel,
                               num_heads=num_heads, fp_num=fp_num, width=w)
    vmem_limit = int(_vmem_capacity_bytes() * 0.7)

    out = pl.pallas_call(
        kernel,
        out_shape=jax.ShapeDtypeStruct((n_pad, hw, c), jnp.float32),
        grid_spec=pltpu.PrefetchScalarGridSpec(
            num_scalar_prefetch=0,
            grid=(n_pad // frame_tile,),
            in_specs=[
                pl.BlockSpec((frame_tile, hw, c), lambda i: (i, 0, 0)),
                pl.BlockSpec((c, num_heads * fp_num), lambda i: (0, 0)),
                pl.BlockSpec((1, num_heads * fp_num), lambda i: (0, 0)),
                pl.BlockSpec((c, num_heads * fp_num), lambda i: (0, 0)),
                pl.BlockSpec((1, num_heads * fp_num), lambda i: (0, 0)),
                pl.BlockSpec((c, num_heads * c), lambda i: (0, 0)),
                pl.BlockSpec((1, num_heads * c), lambda i: (0, 0)),
                pl.BlockSpec((3, 3 * cc, c), lambda i: (0, 0, 0)),
                pl.BlockSpec((1, c), lambda i: (0, 0)),
            ],
            out_specs=pl.BlockSpec((frame_tile, hw, c), lambda i: (i, 0, 0)),
        ),
        compiler_params=pltpu.CompilerParams(
            dimension_semantics=("parallel",),
            vmem_limit_bytes=vmem_limit),
    )(xf, wq_all, bq_all, wk_all, bk_all, wv_all, bv_all, w3, b3)

    out = out[:n].reshape(n, h, w, c).transpose(0, 3, 1, 2)
    return out.reshape(b, t, c, h, w)


# ------------------------------ pure-JAX ref ------------------------------ #

def ref_forward(x, params):
    b, t, c, h, w = x.shape
    num_heads = params["wq"].shape[0]
    n, hw = b * t, h * w
    xf = x.reshape(n, c, h, w).transpose(0, 2, 3, 1).reshape(n, hw, c)
    outs = []
    for hh in range(num_heads):
        q = xf @ params["wq"][hh] + params["bq"][hh]
        k = xf @ params["wk"][hh] + params["bk"][hh]
        v = xf @ params["wv"][hh] + params["bv"][hh]
        e = jnp.einsum("npf,nqf->npq", q, k)
        attn = jax.nn.softmax(e, axis=-1)
        outs.append(jnp.einsum("npq,nqc->npc", attn, v))
    head_out = jnp.stack(outs, axis=1)
    results = head_out.reshape(n, num_heads, h, w, c)
    results = results.transpose(0, 1, 4, 2, 3).reshape(n, num_heads * c, h, w)
    conv_out = jax.lax.conv_general_dilated(
        results, params["conv_w"], window_strides=(1, 1), padding="SAME",
        dimension_numbers=("NCHW", "OIHW", "NCHW"))
    conv_out = conv_out + params["conv_b"][None, :, None, None]
    return conv_out.reshape(b, t, c, h, w)


# ---------------------------------- main ---------------------------------- #

if __name__ == "__main__":
    b, T, C, H, W = 2, 3, 4, 8, 8          # x: (b, T, C, H, W)
    num_heads, fp_num = 2, 8

    key = jax.random.PRNGKey(0)
    ks = jax.random.split(key, 9)
    params = dict(
        wq=0.1 * jax.random.normal(ks[0], (num_heads, C, fp_num), jnp.float32),
        bq=0.1 * jax.random.normal(ks[1], (num_heads, 1, fp_num), jnp.float32),
        wk=0.1 * jax.random.normal(ks[2], (num_heads, C, fp_num), jnp.float32),
        bk=0.1 * jax.random.normal(ks[3], (num_heads, 1, fp_num), jnp.float32),
        wv=0.1 * jax.random.normal(ks[4], (num_heads, C, C), jnp.float32),
        bv=0.1 * jax.random.normal(ks[5], (num_heads, 1, C), jnp.float32),
        conv_w=0.1 * jax.random.normal(ks[6], (C, num_heads * C, 3, 3),
                                       jnp.float32),
        conv_b=0.1 * jax.random.normal(ks[7], (C,), jnp.float32),
    )
    x = jax.random.normal(ks[8], (b, T, C, H, W), jnp.float32)

    out = jax.block_until_ready(self_attention_forward(x, params))
    ref = jax.block_until_ready(ref_forward(x, params))

    assert out.shape == x.shape
    assert jnp.allclose(out, ref, rtol=2e-2, atol=2e-2), "mismatch vs reference"
    print("KERNEL_OK")
</pallas_src>

<mosaic_0001>
module attributes {stable_mosaic.version = 11 : i64} {
  func.func @fused_attention_conv_kernel(%arg0: i32, %arg1: memref<3x64x4xbf16, #tpu.memory_space<vmem>>, %arg2: memref<4x16xbf16, #tpu.memory_space<vmem>>, %arg3: memref<1x16xf32, #tpu.memory_space<vmem>>, %arg4: memref<4x16xbf16, #tpu.memory_space<vmem>>, %arg5: memref<1x16xf32, #tpu.memory_space<vmem>>, %arg6: memref<4x8xbf16, #tpu.memory_space<vmem>>, %arg7: memref<1x8xf32, #tpu.memory_space<vmem>>, %arg8: memref<3x24x4xbf16, #tpu.memory_space<vmem>>, %arg9: memref<1x4xf32, #tpu.memory_space<vmem>>, %arg10: memref<3x64x4xf32, #tpu.memory_space<vmem>>) attributes {dimension_semantics = [#tpu.dimension_semantics<parallel>], iteration_bounds = array<i64: 2>, scalar_prefetch = 0 : i64, scratch_operands = 0 : i64, tpu.core_type = #tpu.core_type<tc>, window_params = [{transform_indices = @transform_0, window_bounds = array<i64: 3, 64, 4>}, {pipeline_mode = #tpu.pipeline_mode<synchronous>, transform_indices = @transform_1, window_bounds = array<i64: 4, 16>}, {pipeline_mode = #tpu.pipeline_mode<synchronous>, transform_indices = @transform_2, window_bounds = array<i64: 1, 16>}, {pipeline_mode = #tpu.pipeline_mode<synchronous>, transform_indices = @transform_3, window_bounds = array<i64: 4, 16>}, {pipeline_mode = #tpu.pipeline_mode<synchronous>, transform_indices = @transform_4, window_bounds = array<i64: 1, 16>}, {pipeline_mode = #tpu.pipeline_mode<synchronous>, transform_indices = @transform_5, window_bounds = array<i64: 4, 8>}, {pipeline_mode = #tpu.pipeline_mode<synchronous>, transform_indices = @transform_6, window_bounds = array<i64: 1, 8>}, {pipeline_mode = #tpu.pipeline_mode<synchronous>, transform_indices = @transform_7, window_bounds = array<i64: 3, 24, 4>}, {pipeline_mode = #tpu.pipeline_mode<synchronous>, transform_indices = @transform_8, window_bounds = array<i64: 1, 4>}, {transform_indices = @transform_9, window_bounds = array<i64: 3, 64, 4>}]} {
    %c0 = arith.constant 0 : index
    %c0_0 = arith.constant 0 : index
    %c0_1 = arith.constant 0 : index
    %0 = vector.load %arg1[%c0, %c0_0, %c0_1] : memref<3x64x4xbf16, #tpu.memory_space<vmem>>, vector<3x64x4xbf16>
    %1 = vector.shape_cast %0 : vector<3x64x4xbf16> to vector<192x4xbf16>
    %c0_2 = arith.constant 0 : index
    %c0_3 = arith.constant 0 : index
    %2 = vector.load %arg2[%c0_2, %c0_3] : memref<4x16xbf16, #tpu.memory_space<vmem>>, vector<4x16xbf16>
    %cst = arith.constant dense<0.000000e+00> : vector<192x16xf32>
    %3 = tpu.matmul %1, %2, %cst {dimension_numbers = #tpu.dot_dimension_numbers<[1], [0], [0], [1], [0, 0, 1, 1], [], []>} : vector<192x4xbf16>, vector<4x16xbf16>, vector<192x16xf32> -> vector<192x16xf32>
    %c0_4 = arith.constant 0 : index
    %c0_5 = arith.constant 0 : index
    %4 = vector.load %arg3[%c0_4, %c0_5] : memref<1x16xf32, #tpu.memory_space<vmem>>, vector<1x16xf32>
    %5 = vector.broadcast %4 : vector<1x16xf32> to vector<192x16xf32>
    %6 = arith.addf %3, %5 : vector<192x16xf32>
    %c0_6 = arith.constant 0 : index
    %c0_7 = arith.constant 0 : index
    %7 = vector.load %arg4[%c0_6, %c0_7] : memref<4x16xbf16, #tpu.memory_space<vmem>>, vector<4x16xbf16>
    %cst_8 = arith.constant dense<0.000000e+00> : vector<192x16xf32>
    %8 = tpu.matmul %1, %7, %cst_8 {dimension_numbers = #tpu.dot_dimension_numbers<[1], [0], [0], [1], [0, 0, 1, 1], [], []>} : vector<192x4xbf16>, vector<4x16xbf16>, vector<192x16xf32> -> vector<192x16xf32>
    %c0_9 = arith.constant 0 : index
    %c0_10 = arith.constant 0 : index
    %9 = vector.load %arg5[%c0_9, %c0_10] : memref<1x16xf32, #tpu.memory_space<vmem>>, vector<1x16xf32>
    %10 = vector.broadcast %9 : vector<1x16xf32> to vector<192x16xf32>
    %11 = arith.addf %8, %10 : vector<192x16xf32>
    %c0_11 = arith.constant 0 : index
    %c0_12 = arith.constant 0 : index
    %12 = vector.load %arg6[%c0_11, %c0_12] : memref<4x8xbf16, #tpu.memory_space<vmem>>, vector<4x8xbf16>
    %cst_13 = arith.constant dense<0.000000e+00> : vector<192x8xf32>
    %13 = tpu.matmul %1, %12, %cst_13 {dimension_numbers = #tpu.dot_dimension_numbers<[1], [0], [0], [1], [0, 0, 1, 1], [], []>} : vector<192x4xbf16>, vector<4x8xbf16>, vector<192x8xf32> -> vector<192x8xf32>
    %c0_14 = arith.constant 0 : index
    %c0_15 = arith.constant 0 : index
    %14 = vector.load %arg7[%c0_14, %c0_15] : memref<1x8xf32, #tpu.memory_space<vmem>>, vector<1x8xf32>
    %15 = vector.broadcast %14 : vector<1x8xf32> to vector<192x8xf32>
    %16 = arith.addf %13, %15 : vector<192x8xf32>
    %17 = vector.shape_cast %6 : vector<192x16xf32> to vector<3x64x16xf32>
    %18 = vector.shape_cast %11 : vector<192x16xf32> to vector<3x64x16xf32>
    %19 = vector.shape_cast %16 : vector<192x8xf32> to vector<3x64x8xf32>
    %20 = vector.extract_strided_slice %17 {offsets = [0, 0, 0], sizes = [3, 64, 8], strides = [1, 1, 1]} : vector<3x64x16xf32> to vector<3x64x8xf32>
    %21 = arith.truncf %20 : vector<3x64x8xf32> to vector<3x64x8xbf16>
    %22 = vector.extract_strided_slice %18 {offsets = [0, 0, 0], sizes = [3, 64, 8], strides = [1, 1, 1]} : vector<3x64x16xf32> to vector<3x64x8xf32>
    %23 = arith.truncf %22 : vector<3x64x8xf32> to vector<3x64x8xbf16>
    %24 = vector.extract_strided_slice %19 {offsets = [0, 0, 0], sizes = [3, 64, 4], strides = [1, 1, 1]} : vector<3x64x8xf32> to vector<3x64x4xf32>
    %25 = arith.truncf %24 : vector<3x64x4xf32> to vector<3x64x4xbf16>
    "tpu.trace_start"() <{level = 10 : i32, message = "fpd,fqd->fpq"}> : () -> ()
    %cst_16 = arith.constant dense<0.000000e+00> : vector<3x64x64xf32>
    %26 = tpu.matmul %21, %23, %cst_16 {dimension_numbers = #tpu.dot_dimension_numbers<[2], [2], [1], [1], [0, 0, 0, 1, 1, 1], [0], [0]>} : vector<3x64x8xbf16>, vector<3x64x8xbf16>, vector<3x64x64xf32> -> vector<3x64x64xf32>
    "tpu.trace_stop"() : () -> ()
    %cst_17 = arith.constant dense<0xFF800000> : vector<3x64xf32>
    %27 = vector.multi_reduction <maximumf>, %26, %cst_17 [2] : vector<3x64x64xf32> to vector<3x64xf32>
    %28 = vector.shape_cast %27 : vector<3x64xf32> to vector<3x64x1xf32>
    %29 = vector.broadcast %28 : vector<3x64x1xf32> to vector<3x64x64xf32>
    %30 = arith.subf %26, %29 : vector<3x64x64xf32>
    %31 = math.exp %30 : vector<3x64x64xf32>
    %cst_18 = arith.constant dense<0.000000e+00> : vector<3x64xf32>
    %32 = vector.multi_reduction <add>, %31, %cst_18 [2] : vector<3x64x64xf32> to vector<3x64xf32>
    %33 = vector.shape_cast %32 : vector<3x64xf32> to vector<3x64x1xf32>
    %34 = tpu.reciprocal %33 {approx = true} : vector<3x64x1xf32> -> vector<3x64x1xf32>
    %35 = vector.broadcast %34 : vector<3x64x1xf32> to vector<3x64x64xf32>
    %36 = arith.mulf %31, %35 : vector<3x64x64xf32>
    %37 = arith.truncf %36 : vector<3x64x64xf32> to vector<3x64x64xbf16>
    "tpu.trace_start"() <{level = 10 : i32, message = "fpq,fqc->fpc"}> : () -> ()
    %cst_19 = arith.constant dense<0.000000e+00> : vector<3x64x4xf32>
    %38 = tpu.matmul %37, %25, %cst_19 {dimension_numbers = #tpu.dot_dimension_numbers<[2], [1], [1], [2], [0, 0, 0, 1, 1, 2], [0], [0]>} : vector<3x64x64xbf16>, vector<3x64x4xbf16>, vector<3x64x4xf32> -> vector<3x64x4xf32>
    "tpu.trace_stop"() : () -> ()
    %39 = vector.extract_strided_slice %17 {offsets = [0, 0, 8], sizes = [3, 64, 8], strides = [1, 1, 1]} : vector<3x64x16xf32> to vector<3x64x8xf32>
    %40 = arith.truncf %39 : vector<3x64x8xf32> to vector<3x64x8xbf16>
    %41 = vector.extract_strided_slice %18 {offsets = [0, 0, 8], sizes = [3, 64, 8], strides = [1, 1, 1]} : vector<3x64x16xf32> to vector<3x64x8xf32>
    %42 = arith.truncf %41 : vector<3x64x8xf32> to vector<3x64x8xbf16>
    %43 = vector.extract_strided_slice %19 {offsets = [0, 0, 4], sizes = [3, 64, 4], strides = [1, 1, 1]} : vector<3x64x8xf32> to vector<3x64x4xf32>
    %44 = arith.truncf %43 : vector<3x64x4xf32> to vector<3x64x4xbf16>
    "tpu.trace_start"() <{level = 10 : i32, message = "fpd,fqd->fpq"}> : () -> ()
    %cst_20 = arith.constant dense<0.000000e+00> : vector<3x64x64xf32>
    %45 = tpu.matmul %40, %42, %cst_20 {dimension_numbers = #tpu.dot_dimension_numbers<[2], [2], [1], [1], [0, 0, 0, 1, 1, 1], [0], [0]>} : vector<3x64x8xbf16>, vector<3x64x8xbf16>, vector<3x64x64xf32> -> vector<3x64x64xf32>
    "tpu.trace_stop"() : () -> ()
    %cst_21 = arith.constant dense<0xFF800000> : vector<3x64xf32>
    %46 = vector.multi_reduction <maximumf>, %45, %cst_21 [2] : vector<3x64x64xf32> to vector<3x64xf32>
    %47 = vector.shape_cast %46 : vector<3x64xf32> to vector<3x64x1xf32>
    %48 = vector.broadcast %47 : vector<3x64x1xf32> to vector<3x64x64xf32>
    %49 = arith.subf %45, %48 : vector<3x64x64xf32>
    %50 = math.exp %49 : vector<3x64x64xf32>
    %cst_22 = arith.constant dense<0.000000e+00> : vector<3x64xf32>
    %51 = vector.multi_reduction <add>, %50, %cst_22 [2] : vector<3x64x64xf32> to vector<3x64xf32>
    %52 = vector.shape_cast %51 : vector<3x64xf32> to vector<3x64x1xf32>
    %53 = tpu.reciprocal %52 {approx = true} : vector<3x64x1xf32> -> vector<3x64x1xf32>
    %54 = vector.broadcast %53 : vector<3x64x1xf32> to vector<3x64x64xf32>
    %55 = arith.mulf %50, %54 : vector<3x64x64xf32>
    %56 = arith.truncf %55 : vector<3x64x64xf32> to vector<3x64x64xbf16>
    "tpu.trace_start"() <{level = 10 : i32, message = "fpq,fqc->fpc"}> : () -> ()
    %cst_23 = arith.constant dense<0.000000e+00> : vector<3x64x4xf32>
    %57 = tpu.matmul %56, %44, %cst_23 {dimension_numbers = #tpu.dot_dimension_numbers<[2], [1], [1], [2], [0, 0, 0, 1, 1, 2], [0], [0]>} : vector<3x64x64xbf16>, vector<3x64x4xbf16>, vector<3x64x4xf32> -> vector<3x64x4xf32>
    "tpu.trace_stop"() : () -> ()
    %58 = tpu.concatenate %38, %57 in 2 : vector<3x64x4xf32>, vector<3x64x4xf32> -> vector<3x64x8xf32>
    %59 = tpu.iota {dimensions = array<i32: 1>} : vector<1x64x1xi32>
    %c8_i32 = arith.constant 8 : i32
    %c0_i32 = arith.constant 0 : i32
    %60 = arith.cmpi eq, %c8_i32, %c0_i32 : i32
    %c1_i32 = arith.constant 1 : i32
    %61 = arith.select %60, %c1_i32, %c8_i32 : i32
    %62 = vector.broadcast %61 : i32 to vector<1x64x1xi32>
    %63 = arith.remsi %59, %62 : vector<1x64x1xi32>
    %c0_i32_24 = arith.constant 0 : i32
    %64 = vector.broadcast %c0_i32_24 : i32 to vector<1x64x1xi32>
    %65 = arith.cmpi ne, %63, %64 : vector<1x64x1xi32>
    %c0_i32_25 = arith.constant 0 : i32
    %66 = vector.broadcast %c0_i32_25 : i32 to vector<1x64x1xi32>
    %67 = arith.cmpi slt, %63, %66 : vector<1x64x1xi32>
    %c0_i32_26 = arith.constant 0 : i32
    %68 = arith.cmpi slt, %61, %c0_i32_26 : i32
    %69 = vector.broadcast %68 : i1 to vector<1x64x1xi1>
    %70 = vector.broadcast %69 : vector<1x64x1xi1> to vector<1x64x1xi1>
    %71 = arith.xori %67, %70 : vector<1x64x1xi1>
    %72 = arith.andi %71, %65 : vector<1x64x1xi1>
    %73 = vector.broadcast %61 : i32 to vector<1x64x1xi32>
    %74 = arith.addi %63, %73 : vector<1x64x1xi32>
    %75 = arith.select %72, %74, %63 : vector<1x64x1xi1>, vector<1x64x1xi32>
    %cst_27 = arith.constant 0.000000e+00 : f32
    %76 = vector.broadcast %cst_27 : f32 to vector<3x1x8xf32>
    %77 = vector.extract_strided_slice %58 {offsets = [0, 1, 0], sizes = [3, 63, 8], strides = [1, 1, 1]} : vector<3x64x8xf32> to vector<3x63x8xf32>
    %78 = tpu.concatenate %77, %76 in 1 : vector<3x63x8xf32>, vector<3x1x8xf32> -> vector<3x64x8xf32>
    %c7_i32 = arith.constant 7 : i32
    %79 = vector.broadcast %c7_i32 : i32 to vector<1x64x1xi32>
    %80 = arith.cmpi eq, %75, %79 : vector<1x64x1xi32>
    %cst_28 = arith.constant 0.000000e+00 : f32
    %81 = vector.shape_cast %80 : vector<1x64x1xi1> to vector<1x64x1xi1>
    %82 = vector.broadcast %81 : vector<1x64x1xi1> to vector<3x64x8xi1>
    %83 = vector.broadcast %cst_28 : f32 to vector<3x64x8xf32>
    %84 = arith.select %82, %83, %78 : vector<3x64x8xi1>, vector<3x64x8xf32>
    %85 = vector.extract_strided_slice %58 {offsets = [0, 0, 0], sizes = [3, 63, 8], strides = [1, 1, 1]} : vector<3x64x8xf32> to vector<3x63x8xf32>
    %86 = tpu.concatenate %76, %85 in 1 : vector<3x1x8xf32>, vector<3x63x8xf32> -> vector<3x64x8xf32>
    %c0_i32_29 = arith.constant 0 : i32
    %87 = vector.broadcast %c0_i32_29 : i32 to vector<1x64x1xi32>
    %88 = arith.cmpi eq, %75, %87 : vector<1x64x1xi32>
    %cst_30 = arith.constant 0.000000e+00 : f32
    %89 = vector.shape_cast %88 : vector<1x64x1xi1> to vector<1x64x1xi1>
    %90 = vector.broadcast %89 : vector<1x64x1xi1> to vector<3x64x8xi1>
    %91 = vector.broadcast %cst_30 : f32 to vector<3x64x8xf32>
    %92 = arith.select %90, %91, %86 : vector<3x64x8xi1>, vector<3x64x8xf32>
    %93 = tpu.concatenate %92, %58, %84 in 2 : vector<3x64x8xf32>, vector<3x64x8xf32>, vector<3x64x8xf32> -> vector<3x64x24xf32>
    %cst_31 = arith.constant 0.000000e+00 : f32
    %94 = vector.broadcast %cst_31 : f32 to vector<3x8x24xf32>
    %95 = vector.extract_strided_slice %93 {offsets = [0, 0, 0], sizes = [3, 56, 24], strides = [1, 1, 1]} : vector<3x64x24xf32> to vector<3x56x24xf32>
    %96 = tpu.concatenate %94, %95 in 1 : vector<3x8x24xf32>, vector<3x56x24xf32> -> vector<3x64x24xf32>
    %97 = vector.extract_strided_slice %93 {offsets = [0, 8, 0], sizes = [3, 56, 24], strides = [1, 1, 1]} : vector<3x64x24xf32> to vector<3x56x24xf32>
    %98 = tpu.concatenate %97, %94 in 1 : vector<3x56x24xf32>, vector<3x8x24xf32> -> vector<3x64x24xf32>
    %99 = vector.shape_cast %96 : vector<3x64x24xf32> to vector<192x24xf32>
    %100 = arith.truncf %99 : vector<192x24xf32> to vector<192x24xbf16>
    %c0_32 = arith.constant 0 : index
    %c0_33 = arith.constant 0 : index
    %c0_34 = arith.constant 0 : index
    %101 = vector.load %arg8[%c0_32, %c0_33, %c0_34] : memref<3x24x4xbf16, #tpu.memory_space<vmem>>, vector<1x24x4xbf16>
    %102 = vector.shape_cast %101 : vector<1x24x4xbf16> to vector<24x4xbf16>
    %cst_35 = arith.constant dense<0.000000e+00> : vector<192x4xf32>
    %103 = tpu.matmul %100, %102, %cst_35 {dimension_numbers = #tpu.dot_dimension_numbers<[1], [0], [0], [1], [0, 0, 1, 1], [], []>} : vector<192x24xbf16>, vector<24x4xbf16>, vector<192x4xf32> -> vector<192x4xf32>
    %104 = vector.shape_cast %93 : vector<3x64x24xf32> to vector<192x24xf32>
    %105 = arith.truncf %104 : vector<192x24xf32> to vector<192x24xbf16>
    %c1 = arith.constant 1 : index
    %c0_36 = arith.constant 0 : index
    %c0_37 = arith.constant 0 : index
    %106 = vector.load %arg8[%c1, %c0_36, %c0_37] : memref<3x24x4xbf16, #tpu.memory_space<vmem>>, vector<1x24x4xbf16>
    %107 = vector.shape_cast %106 : vector<1x24x4xbf16> to vector<24x4xbf16>
    %cst_38 = arith.constant dense<0.000000e+00> : vector<192x4xf32>
    %108 = tpu.matmul %105, %107, %cst_38 {dimension_numbers = #tpu.dot_dimension_numbers<[1], [0], [0], [1], [0, 0, 1, 1], [], []>} : vector<192x24xbf16>, vector<24x4xbf16>, vector<192x4xf32> -> vector<192x4xf32>
    %109 = arith.addf %103, %108 : vector<192x4xf32>
    %110 = vector.shape_cast %98 : vector<3x64x24xf32> to vector<192x24xf32>
    %111 = arith.truncf %110 : vector<192x24xf32> to vector<192x24xbf16>
    %c2 = arith.constant 2 : index
    %c0_39 = arith.constant 0 : index
    %c0_40 = arith.constant 0 : index
    %112 = vector.load %arg8[%c2, %c0_39, %c0_40] : memref<3x24x4xbf16, #tpu.memory_space<vmem>>, vector<1x24x4xbf16>
    %113 = vector.shape_cast %112 : vector<1x24x4xbf16> to vector<24x4xbf16>
    %cst_41 = arith.constant dense<0.000000e+00> : vector<192x4xf32>
    %114 = tpu.matmul %111, %113, %cst_41 {dimension_numbers = #tpu.dot_dimension_numbers<[1], [0], [0], [1], [0, 0, 1, 1], [], []>} : vector<192x24xbf16>, vector<24x4xbf16>, vector<192x4xf32> -> vector<192x4xf32>
    %115 = arith.addf %109, %114 : vector<192x4xf32>
    %c0_42 = arith.constant 0 : index
    %c0_43 = arith.constant 0 : index
    %116 = vector.load %arg9[%c0_42, %c0_43] : memref<1x4xf32, #tpu.memory_space<vmem>>, vector<1x4xf32>
    %117 = vector.broadcast %116 : vector<1x4xf32> to vector<192x4xf32>
    %118 = arith.addf %115, %117 : vector<192x4xf32>
    %119 = vector.shape_cast %118 : vector<192x4xf32> to vector<3x64x4xf32>
    %c0_44 = arith.constant 0 : index
    %c0_45 = arith.constant 0 : index
    %c0_46 = arith.constant 0 : index
    %120 = vector.load %arg10[%c0_44, %c0_45, %c0_46] : memref<3x64x4xf32, #tpu.memory_space<vmem>>, vector<3x64x4xf32>
    tpu.vector_store %arg10[%c0_44, %c0_45, %c0_46], %119 {strides = array<i32>} : memref<3x64x4xf32, #tpu.memory_space<vmem>>, vector<3x64x4xf32>,
    return
  }
  func.func @transform_0(%arg0: i32) -> (i32, i32, i32) {
    %c0_i32 = arith.constant 0 : i32
    %c0_i32_0 = arith.constant 0 : i32
    %c0_i32_1 = arith.constant 0 : i32
    return %arg0, %c0_i32, %c0_i32_0 : i32, i32, i32
  }
  func.func @transform_1(%arg0: i32) -> (i32, i32) {
    %c0_i32 = arith.constant 0 : i32
    %c0_i32_0 = arith.constant 0 : i32
    %c0_i32_1 = arith.constant 0 : i32
    return %c0_i32, %c0_i32_0 : i32, i32
  }
  func.func @transform_2(%arg0: i32) -> (i32, i32) {
    %c0_i32 = arith.constant 0 : i32
    %c0_i32_0 = arith.constant 0 : i32
    %c0_i32_1 = arith.constant 0 : i32
    return %c0_i32, %c0_i32_0 : i32, i32
  }
  func.func @transform_3(%arg0: i32) -> (i32, i32) {
    %c0_i32 = arith.constant 0 : i32
    %c0_i32_0 = arith.constant 0 : i32
    %c0_i32_1 = arith.constant 0 : i32
    return %c0_i32, %c0_i32_0 : i32, i32
  }
  func.func @transform_4(%arg0: i32) -> (i32, i32) {
    %c0_i32 = arith.constant 0 : i32
    %c0_i32_0 = arith.constant 0 : i32
    %c0_i32_1 = arith.constant 0 : i32
    return %c0_i32, %c0_i32_0 : i32, i32
  }
  func.func @transform_5(%arg0: i32) -> (i32, i32) {
    %c0_i32 = arith.constant 0 : i32
    %c0_i32_0 = arith.constant 0 : i32
    %c0_i32_1 = arith.constant 0 : i32
    return %c0_i32, %c0_i32_0 : i32, i32
  }
  func.func @transform_6(%arg0: i32) -> (i32, i32) {
    %c0_i32 = arith.constant 0 : i32
    %c0_i32_0 = arith.constant 0 : i32
    %c0_i32_1 = arith.constant 0 : i32
    return %c0_i32, %c0_i32_0 : i32, i32
  }
  func.func @transform_7(%arg0: i32) -> (i32, i32, i32) {
    %c0_i32 = arith.constant 0 : i32
    %c0_i32_0 = arith.constant 0 : i32
    %c0_i32_1 = arith.constant 0 : i32
    %c0_i32_2 = arith.constant 0 : i32
    return %c0_i32, %c0_i32_0, %c0_i32_1 : i32, i32, i32
  }
  func.func @transform_8(%arg0: i32) -> (i32, i32) {
    %c0_i32 = arith.constant 0 : i32
    %c0_i32_0 = arith.constant 0 : i32
    %c0_i32_1 = arith.constant 0 : i32
    return %c0_i32, %c0_i32_0 : i32, i32
  }
  func.func @transform_9(%arg0: i32) -> (i32, i32, i32) {
    %c0_i32 = arith.constant 0 : i32
    %c0_i32_0 = arith.constant 0 : i32
    %c0_i32_1 = arith.constant 0 : i32
    return %arg0, %c0_i32, %c0_i32_0 : i32, i32, i32
  }
}

</mosaic_0001>

<bundles_post_ra>
// kernel: tpu_custom_call.1
= control target key start
LH: loop header
LB: loop body
LE: loop exit
PB: predicated region body
PF: predicated region fallthrough
CT: control target
= control target key end

     0   :  { %s5200_s30 = smov 0   ;;  %s7172_s0 = inlined_call_operand.vmem [shape: bf16[6,64,4], index: 0, kind: input, shape index: {}]   ;;  %s7173_s1 = inlined_call_operand.vmem [shape: bf16[4,16], index: 1, kind: input, shape index: {}]   ;;  %s7174_s2 = inlined_call_operand.vmem [shape: f32[1,16], index: 2, kind: input, shape index: {}]   ;;  %s7175_s3 = inlined_call_operand.vmem [shape: bf16[4,16], index: 3, kind: input, shape index: {}]   ;;  %s7176_s4 = inlined_call_operand.vmem [shape: f32[1,16], index: 4, kind: input, shape index: {}]   ;;  %s7177_s5 = inlined_call_operand.vmem [shape: bf16[4,8], index: 5, kind: input, shape index: {}]   ;;  %s7178_s6 = inlined_call_operand.vmem [shape: f32[1,8], index: 6, kind: input, shape index: {}]   ;;  %s7179_s7 = inlined_call_operand.vmem [shape: bf16[3,24,4], index: 7, kind: input, shape index: {}]   ;;  %s7180_s8 = inlined_call_operand.vmem [shape: f32[1,4], index: 8, kind: input, shape index: {}]   ;;  %s7181_s9 = inlined_call_operand.vmem [shape: f32[6,64,4], index: 9, kind: output, shape index: {}]  }
   0x1 LB: > { %s3979_s10 = sadd.s32 4294967295, %s5142_s30   ;;  %p3983_p0 = scmp.ge.s32.totalorder %s5142_s30, 1  ;;  %s5142_s30 = sphi %s5200_s30, %s19_s30  }
   0x2   : > { %p289_p1 = scmp.lt.s32.totalorder %s5142_s30, 3 }
   0x4   : > { %p290_p2 = pnand %p3983_p0, %p289_p1 }
   0x6   : > { %293 = sbr.rel (%p290_p2) target bundleno = 2291 (0x8f3), region = 56 }
   0xd   : > { %v366_v0 = vld [vmem:[%s7173_s1] sm:$0x3]  ;;  %vm471_vm0 = vcmask 1041408   ;;  %s327_s15 = smul.u32 3, %s3979_s10  ;;  %vm434_vm1 = vcmask 31744   ;;  %vm7194_vm2 = vcmask 64512  }
   0xe   : > { %v604_v1 = vld [vmem:[%s7175_s3] sm:$0x3]  ;;  %4721 = vmatprep.subr.msk.bf16.mxu0 %vm471_vm0, %v366_v0  ;;  %v473_v2 = vsel %vm471_vm0, %v366_v0, 0  ;;  %vm1188_vm3 = vcmask 523264   ;;  %s5144_s28 = smov 120   ;;  %s5145_s29 = smov 124  }
   0xf   : > { %4723 = vmatprep.subr.msk.bf16.mxu1 %vm471_vm0, %v604_v1  ;;  %v613_v3 = vsel %vm471_vm0, %v604_v1, 0  ;;  %4318 = vmatpush3.bf16.msra.mxu0 %v473_v2  ;;  %p328_p3 = scmp.lt.s32.totalorder %s327_s15, 5  ;;  %v744_v6 = vld [vmem:[%s7177_s5] sm:$0x3]  ;;  %s5146_s10 = smov 4   ;;  %vm2839_vm4 = vcmask 1046528  }
  0x10   : > { %4672 = vmatpush3.bf16.msra.mxu1 %v613_v3  ;;  %4722 = vmatprep.subr.msk.bf16.mxu0 %vm471_vm0, %v604_v1  ;;  %v753_v17 = vsel %vm471_vm0, %v744_v6, 0  ;;  %v5269_v18 = vld [vmem:[%s7174_s2] ss:$0 sm:$0xff]  ;;  %vm7196_vm8 = vcmask 1040384   ;;  %vm7195_vm13 = vcmask 1043456   ;;  %s5148_s21 = smov 16  }
  0x11   : > { %s7350_s15 = smov (!%p328_p3, %s327_s15), 5  ;;  %v5275_v22 = vld [vmem:[%s7176_s4] ss:$0 sm:$0xff] }
  0x12   : > { %s4138_s16 = sshll.u32 %s7350_s15, 5  ;;  %s4139_s26 = sshll.u32 %s7350_s15, 6 }
  0x13   : > { %s332_s19 = scalar_lea.vmem %s7172_s0, %s4138_s16  ;;  %s5147_s16 = smov 8  }
  0x14   : > { %v4926_v4 = vld [vmem:[%s332_s19] sm:$0xff]   ;;  %v4928_v7 = vld [vmem:[%s332_s19 + $0x8] sm:$0xff]   ;;  %v4930_v9 = vld [vmem:[%s332_s19 + $0x10] sm:$0xff]   ;;  %s7095_s11 = scalar_lea.vmem %s7181_s9, %s4139_s26 }
  0x15   : > { %v4927_v5 = vld [vmem:[%s332_s19 + $0x20] sm:$0xff]   ;;  %4319 = vmatprep.mubr.msk.bf16.mxu0 %vm434_vm1, %v4926_v4  ;;  %v4929_v8 = vld [vmem:[%s332_s19 + $0x28] sm:$0xff]   ;;  %v4931_v10 = vld [vmem:[%s332_s19 + $0x30] sm:$0xff]  }
  0x16   : > { %4353 = vmatprep.mubr.msk.bf16.mxu1 %vm434_vm1, %v4927_v5  ;;  %4320 = vmatmul.mubr.msk.bf16.vlgmr.msra.gmra.mrb[0].mxu0 %vm434_vm1, %v4928_v7  ;;  %v4932_v11 = vld [vmem:[%s332_s19 + $0x18] sm:$0xff]   ;;  %v4934_v13 = vld [vmem:[%s332_s19 + $0x40] sm:$0xff]   ;;  %v4935_v14 = vld [vmem:[%s332_s19 + $0x48] sm:$0xff]  }
  0x17   : > { %4344 = vmatpush3.bf16.msra.mxu0 %v613_v3  ;;  %4354 = vmatmul.mubr.msk.bf16.vlgmr.msra.gmra.mrb[0].mxu1 %vm434_vm1, %v4929_v8  ;;  %v4933_v12 = vld [vmem:[%s332_s19 + $0x38] sm:$0xff]   ;;  %v4936_v15 = vld [vmem:[%s332_s19 + $0x50] sm:$0xff]  }
  0x18   : > { %4323 = vmatprep.mubr.msk.bf16.mxu0 %vm434_vm1, %v4930_v9  ;;  %4724 = vmatprep.subr.msk.bf16.mxu0 %vm471_vm0, %v744_v6  ;;  %v4937_v16 = vld [vmem:[%s332_s19 + $0x58] sm:$0xff]  }
  0x19   : > { %4357 = vmatprep.mubr.msk.bf16.mxu1 %vm434_vm1, %v4931_v10 }
  0x1e   : > { %4324 = vmatmul.mubr.msk.bf16.gmra.mrb[4].mxu0 %vm434_vm1, %v4932_v11 }
  0x1f   : > { %4358 = vmatmul.mubr.msk.bf16.gmra.mrb[4].mxu1 %vm434_vm1, %v4933_v12  ;;  %4327 = vmatprep.mubr.msk.bf16.mxu0 %vm434_vm1, %v4927_v5 }
  0x20   : > { %4361 = vmatprep.mubr.msk.bf16.mxu1 %vm434_vm1, %v4934_v13 }
  0x26   : > { %4328 = vmatmul.mubr.msk.bf16.gmra.mrb[8].mxu0 %vm434_vm1, %v4929_v8 }
  0x27   : > { %4362 = vmatmul.mubr.msk.bf16.gmra.mrb[8].mxu1 %vm434_vm1, %v4935_v14  ;;  %4331 = vmatprep.mubr.msk.bf16.mxu0 %vm434_vm1, %v4931_v10 }
  0x28   : > { %4365 = vmatprep.mubr.msk.bf16.mxu1 %vm434_vm1, %v4936_v15 }
  0x2e   : > { %4332 = vmatmul.mubr.msk.bf16.gmra.mrb[12].mxu0 %vm434_vm1, %v4933_v12 }
  0x2f   : > { %4335 = vmatprep.mubr.msk.bf16.mxu0 %vm434_vm1, %v4934_v13  ;;  %4366 = vmatmul.mubr.msk.bf16.gmra.mrb[12].mxu1 %vm434_vm1, %v4937_v16 }
  0x36   : > { %4336 = vmatmul.mubr.msk.bf16.gmra.mrb[16].mxu0 %vm434_vm1, %v4935_v14 }
  0x37   : > { %4339 = vmatprep.mubr.msk.bf16.mxu0 %vm434_vm1, %v4936_v15 }
  0x3e   : > { %4340 = vmatmul.mubr.msk.bf16.gmra.mrb[20].mxu0 %vm434_vm1, %v4937_v16 }
  0x3f   : > { %4345 = vmatprep.mubr.msk.bf16.mxu0 %vm434_vm1, %v4926_v4 }
  0x46   : > { %4346 = vmatmul.mubr.msk.bf16.vlgmr.msra.gmra.mrb[24].mxu0 %vm434_vm1, %v4928_v7 }
  0x47   : > { %4349 = vmatprep.mubr.msk.bf16.mxu0 %vm434_vm1, %v4930_v9  ;;  %4370 = vmatpush3.bf16.msra.mxu0 %v753_v17 }
  0x4e   : > { %4350 = vmatmul.mubr.msk.bf16.gmra.mrb[28].mxu0 %vm434_vm1, %v4932_v11 }
  0x4f   : > { %4371 = vmatprep.mubr.msk.bf16.mxu0 %vm434_vm1, %v4926_v4 }
  0x56   : > { %4372 = vmatmul.mubr.msk.bf16.vlgmr.msra.gmra.mrb[32].mxu0 %vm434_vm1, %v4928_v7 }
  0x57   : > { %4375 = vmatprep.mubr.msk.bf16.mxu0 %vm434_vm1, %v4930_v9 }
  0x5e   : > { %4376 = vmatmul.mubr.msk.bf16.gmra.mrb[36].mxu0 %vm434_vm1, %v4932_v11 }
  0x5f   : > { %4379 = vmatprep.mubr.msk.bf16.mxu0 %vm434_vm1, %v4927_v5 }
  0x66   : > { %4380 = vmatmul.mubr.msk.bf16.gmra.mrb[40].mxu0 %vm434_vm1, %v4929_v8 }
  0x67   : > { %4383 = vmatprep.mubr.msk.bf16.mxu0 %vm434_vm1, %v4931_v10 }
  0x6e   : > { %4384 = vmatmul.mubr.msk.bf16.gmra.mrb[44].mxu0 %vm434_vm1, %v4933_v12 }
  0x6f   : > { %4387 = vmatprep.mubr.msk.bf16.mxu0 %vm434_vm1, %v4934_v13 }
  0x76   : > { %4388 = vmatmul.mubr.msk.bf16.gmra.mrb[48].mxu0 %vm434_vm1, %v4935_v14 }
  0x77   : > { %4391 = vmatprep.mubr.msk.bf16.mxu0 %vm434_vm1, %v4936_v15 }
  0x7e   : > { %4392 = vmatmul.mubr.msk.bf16.gmra.mrb[52].mxu0 %vm434_vm1, %v4937_v16 }
  0xe9   : > { %v4321_v19 = vpop.f32.mrb[0].mxu0 }
  0xea   : > { %v518_v20 = vadd.f32 %v4321_v19, %v5269_v18  ;;  %v509_v21 = vpop.f32.mrb[1].mxu0  ;;  %v4355_v23 = vpop.f32.mrb[0].mxu1 }
  0xeb   : > { %v4322_v24 = vpop.f32.mrb[2].mxu0  ;;  %v690_v25 = vadd.f32 %v4355_v23, %v5275_v22  ;;  %v681_v26 = vpop.f32.mrb[1].mxu1  ;;  %v510_v31 = vadd.f32 %v5269_v18, %v509_v21 }
  0xec   : > { %v521_v27 = vadd.f32 %v4322_v24, %v5269_v18  ;;  %v512_v28 = vpop.f32.mrb[3].mxu0  ;;  %v682_v29 = vadd.f32 %v5275_v22, %v681_v26  ;;  %v4356_v30 = vpop.f32.mrb[2].mxu1 }
  0xed   : > { %v513_v32 = vadd.f32 %v5269_v18, %v512_v28  ;;  %v693_v33 = vadd.f32 %v4356_v30, %v5275_v22  ;;  %v684_v34 = vpop.f32.mrb[3].mxu1 }
  0xee   : > { %v5283_v35 = vpack.c.bf16 %v521_v27, %v518_v20  ;;  %v685_v36 = vadd.f32 %v5275_v22, %v684_v34 }
  0xef   : > { %v5286_v37 = vpack.c.bf16 %v513_v32, %v510_v31  ;;  %v5288_v38 = vpack.c.bf16 %v693_v33, %v690_v25 }
  0xf0   : > { %v5290_v39 = vpack.c.bf16 %v685_v36, %v682_v29 }
  0xf1   : > { %v4325_v40 = vpop.f32.mrb[4].mxu0  ;;  %4403 = vmatprep.mubr.msk.bf16.mxu1 %vm7194_vm2, %v5286_v37 }
  0xf2   : > { %v534_v41 = vadd.f32 %v4325_v40, %v5269_v18  ;;  %v525_v42 = vpop.f32.mrb[5].mxu0  ;;  %v4359_v43 = vpop.f32.mrb[4].mxu1 }
  0xf3   : > { %v526_v44 = vadd.f32 %v5269_v18, %v525_v42  ;;  %v4326_v45 = vpop.f32.mrb[6].mxu0  ;;  %v706_v46 = vadd.f32 %v4359_v43, %v5275_v22  ;;  %v697_v47 = vpop.f32.mrb[5].mxu1 }
  0xf4   : > { %v537_v48 = vadd.f32 %v4326_v45, %v5269_v18  ;;  %v528_v49 = vpop.f32.mrb[7].mxu0  ;;  %v698_v50 = vadd.f32 %v5275_v22, %v697_v47  ;;  %v4360_v51 = vpop.f32.mrb[6].mxu1 }
  0xf5   : > { %v529_v52 = vadd.f32 %v5269_v18, %v528_v49  ;;  %v709_v53 = vadd.f32 %v4360_v51, %v5275_v22  ;;  %v700_v54 = vpop.f32.mrb[7].mxu1 }
  0xf6   : > { %v5301_v55 = vpack.c.bf16 %v537_v48, %v534_v41  ;;  %v701_v56 = vadd.f32 %v5275_v22, %v700_v54 }
  0xf7   : > { %v5304_v57 = vpack.c.bf16 %v529_v52, %v526_v44  ;;  %v5306_v58 = vpack.c.bf16 %v709_v53, %v706_v46 }
  0xf8   : > { %v5308_v59 = vpack.c.bf16 %v701_v56, %v698_v50 }
  0xf9   : > { %v4329_v60 = vpop.f32.mrb[8].mxu0 }
  0xfa   : > { %v550_v61 = vadd.f32 %v4329_v60, %v5269_v18  ;;  %v4363_v62 = vpop.f32.mrb[8].mxu1  ;;  %v541_v63 = vpop.f32.mrb[9].mxu0 }
  0xfb   : > { %v722_v0 = vadd.f32 %v4363_v62, %v5275_v22  ;;  %v542_v1 = vadd.f32 %v5269_v18, %v541_v63  ;;  %v713_v2 = vpop.f32.mrb[9].mxu1  ;;  %v4330_v3 = vpop.f32.mrb[10].mxu0 }
  0xfc   : > { %v714_v4 = vadd.f32 %v5275_v22, %v713_v2  ;;  %v553_v5 = vadd.f32 %v4330_v3, %v5269_v18  ;;  %v4364_v6 = vpop.f32.mrb[10].mxu1  ;;  %v544_v7 = vpop.f32.mrb[11].mxu0 }
  0xfd   : > { %v725_v8 = vadd.f32 %v4364_v6, %v5275_v22  ;;  %v545_v9 = vadd.f32 %v5269_v18, %v544_v7  ;;  %v716_v10 = vpop.f32.mrb[11].mxu1 }
  0xfe   : > { %v5317_v11 = vpack.c.bf16 %v553_v5, %v550_v61  ;;  %v717_v12 = vadd.f32 %v5275_v22, %v716_v10 }
  0xff   : > { %v5320_v13 = vpack.c.bf16 %v725_v8, %v722_v0  ;;  %v5322_v14 = vpack.c.bf16 %v545_v9, %v542_v1 }
 0x100   : > { %v5324_v15 = vpack.c.bf16 %v717_v12, %v714_v4 }
 0x101   : > { %v4333_v16 = vpop.f32.mrb[12].mxu0  ;;  %v1115_v42 = vsel %vm7194_vm2, %v5320_v13, 0 }
 0x102   : > { %v566_v17 = vadd.f32 %v4333_v16, %v5269_v18  ;;  %4733 = vmatprep.subr.msk.bf16.mxu0 %vm7194_vm2, %v5324_v15  ;;  %v557_v19 = vpop.f32.mrb[13].mxu0  ;;  %v1112_v20 = vsel %vm7194_vm2, %v5324_v15, 0  ;;  %v4367_v21 = vpop.f32.mrb[12].mxu1 }
 0x103   : > { %v558_v23 = vadd.f32 %v5269_v18, %v557_v19  ;;  %4428 = vmatpush3.bf16.xpose.msra.mxu0 %v1112_v20  ;;  %v4334_v24 = vpop.f32.mrb[14].mxu0  ;;  %v738_v25 = vadd.f32 %v4367_v21, %v5275_v22  ;;  %v729_v26 = vpop.f32.mrb[13].mxu1 }
 0x104   : > { %v569_v27 = vadd.f32 %v4334_v24, %v5269_v18  ;;  %v560_v28 = vpop.f32.mrb[15].mxu0  ;;  %4734 = vmatprep.subr.msk.bf16.mxu0 %vm7194_vm2, %v5320_v13  ;;  %v730_v29 = vadd.f32 %v5275_v22, %v729_v26  ;;  %v4368_v30 = vpop.f32.mrb[14].mxu1 }
 0x105   : > { %v561_v31 = vadd.f32 %v5269_v18, %v560_v28  ;;  %v741_v32 = vadd.f32 %v4368_v30, %v5275_v22  ;;  %v732_v33 = vpop.f32.mrb[15].mxu1 }
 0x106   : > { %v5339_v34 = vpack.c.bf16 %v569_v27, %v566_v17  ;;  %v733_v36 = vadd.f32 %v5275_v22, %v732_v33 }
 0x107   : > { %v5342_v40 = vpack.c.bf16 %v561_v31, %v558_v23  ;;  %v5344_v41 = vpack.c.bf16 %v741_v32, %v738_v25  ;;  %v5405_v32 = vld [vmem:[%s7178_s6] ss:$0 sm:$0xff] }
 0x108   : > { %v5348_v43 = vpack.c.bf16 %v733_v36, %v730_v29 }
 0x109   : > { %v4337_v44 = vpop.f32.mrb[16].mxu0  ;;  %v1121_v5 = vsel %vm7194_vm2, %v5344_v41, 0 }
 0x10a   : > { %v573_v45 = vpop.f32.mrb[17].mxu0  ;;  %v582_v47 = vadd.f32 %v4337_v44, %v5269_v18  ;;  %v1118_v54 = vsel %vm7194_vm2, %v5348_v43, 0 }
 0x10b   : > { %4430 = vmatpush3.bf16.xpose.msra.mxu0 %v1115_v42  ;;  %v4338_v46 = vpop.f32.mrb[18].mxu0  ;;  %v574_v50 = vadd.f32 %v5269_v18, %v573_v45 }
 0x10c   : > { %v585_v48 = vadd.f32 %v4338_v46, %v5269_v18  ;;  %v576_v49 = vpop.f32.mrb[19].mxu0  ;;  %4735 = vmatprep.subr.msk.bf16.mxu0 %vm7194_vm2, %v5348_v43 }
 0x10d   : > { %v577_v51 = vadd.f32 %v5269_v18, %v576_v49 }
 0x10e   : > { %v5356_v52 = vpack.c.bf16 %v585_v48, %v582_v47 }
 0x10f   : > { %v5358_v53 = vpack.c.bf16 %v577_v51, %v574_v50 }
 0x111   : > { %v4341_v56 = vpop.f32.mrb[20].mxu0  ;;  %4435 = vmatprep.mubr.msk.bf16.mxu0 %vm7194_vm2, %v5358_v53 }
 0x112   : > { %v589_v60 = vpop.f32.mrb[21].mxu0  ;;  %v598_v62 = vadd.f32 %v4341_v56, %v5269_v18 }
 0x113   : > { %4432 = vmatpush3.bf16.xpose.msra.mxu0 %v1118_v54  ;;  %v4342_v61 = vpop.f32.mrb[22].mxu0  ;;  %v590_v1 = vadd.f32 %v5269_v18, %v589_v60 }
 0x114   : > { %v601_v63 = vadd.f32 %v4342_v61, %v5269_v18  ;;  %v592_v0 = vpop.f32.mrb[23].mxu0  ;;  %4736 = vmatprep.subr.msk.bf16.mxu0 %vm7194_vm2, %v5344_v41 }
 0x115   : > { %v593_v2 = vadd.f32 %v5269_v18, %v592_v0 }
 0x116   : > { %v5370_v3 = vpack.c.bf16 %v601_v63, %v598_v62 }
 0x117   : > { %v5372_v4 = vpack.c.bf16 %v593_v2, %v590_v1 }
 0x119   : > { %v4347_v6 = vpop.f32.mrb[24].mxu0 }
 0x11a   : > { %v649_v7 = vpop.f32.mrb[25].mxu0  ;;  %v658_v9 = vadd.f32 %v4347_v6, %v5275_v22 }
 0x11b   : > { %4434 = vmatpush3.bf16.xpose.msra.mxu0 %v1121_v5  ;;  %v4348_v8 = vpop.f32.mrb[26].mxu0  ;;  %v650_v16 = vadd.f32 %v5275_v22, %v649_v7 }
 0x11c   : > { %v661_v10 = vadd.f32 %v4348_v8, %v5275_v22  ;;  %v652_v12 = vpop.f32.mrb[27].mxu0 }
 0x11d   : > { %v653_v18 = vadd.f32 %v5275_v22, %v652_v12 }
 0x11e   : > { %v5380_v17 = vpack.c.bf16 %v661_v10, %v658_v9 }
 0x11f   : > { %v5382_v19 = vpack.c.bf16 %v653_v18, %v650_v16 }
 0x120   : > { %v937_v33 = vsel %vm7194_vm2, %v5380_v17, 0 }
 0x121   : > { %4725 = vmatprep.subr.msk.bf16.mxu1 %vm7194_vm2, %v5382_v19  ;;  %v934_v20 = vsel %vm7194_vm2, %v5382_v19, 0  ;;  %v4351_v21 = vpop.f32.mrb[28].mxu0 }
 0x122   : > { %4436 = vmatmul.mubr.msk.bf16.vlgmr.msra.gmra.mrb[56].mxu0 %vm7194_vm2, %v5356_v52  ;;  %4396 = vmatpush3.bf16.xpose.msra.mxu1 %v934_v20  ;;  %v674_v23 = vadd.f32 %v4351_v21, %v5275_v22  ;;  %v665_v24 = vpop.f32.mrb[29].mxu0 }
 0x123   : > { %4439 = vmatprep.mubr.msk.bf16.mxu0 %vm7194_vm2, %v5372_v4  ;;  %4726 = vmatprep.subr.msk.bf16.mxu1 %vm7194_vm2, %v5380_v17  ;;  %v666_v25 = vadd.f32 %v5275_v22, %v665_v24  ;;  %v4352_v26 = vpop.f32.mrb[30].mxu0  ;;  %v1023_v24 = vsel %vm7194_vm2, %v5290_v39, 0 }
 0x124   : > { %v677_v27 = vadd.f32 %v4352_v26, %v5275_v22  ;;  %v668_v28 = vpop.f32.mrb[31].mxu0 }
 0x125   : > { %v669_v29 = vadd.f32 %v5275_v22, %v668_v28 }
 0x126   : > { %v5398_v30 = vpack.c.bf16 %v677_v27, %v674_v23 }
 0x127   : > { %v5400_v31 = vpack.c.bf16 %v669_v29, %v666_v25 }
 0x128   : > { %v943_v6 = vsel %vm7194_vm2, %v5398_v30, 0 }
 0x129   : > { %v4373_v36 = vpop.f32.mrb[32].mxu0  ;;  %v940_v51 = vsel %vm7194_vm2, %v5400_v31, 0 }
 0x12a   : > { %4440 = vmatmul.mubr.msk.bf16.gmra.mrb[60].mxu0 %vm7194_vm2, %v5370_v3  ;;  %4398 = vmatpush3.bf16.xpose.msra.mxu1 %v937_v33  ;;  %v798_v42 = vadd.f32 %v4373_v36, %v5405_v32  ;;  %v789_v22 = vpop.f32.mrb[33].mxu0 }
 0x12b   : > { %4727 = vmatprep.subr.msk.bf16.mxu1 %vm7194_vm2, %v5400_v31  ;;  %v790_v44 = vadd.f32 %v5405_v32, %v789_v22  ;;  %v4374_v45 = vpop.f32.mrb[34].mxu0 }
 0x12c   : > { %v801_v46 = vadd.f32 %v4374_v45, %v5405_v32  ;;  %v792_v47 = vpop.f32.mrb[35].mxu0  ;;  %v1026_v45 = vsel %vm7194_vm2, %v5288_v38, 0 }
 0x12d   : > { %v793_v48 = vadd.f32 %v5405_v32, %v792_v47 }
 0x12e   : > { %v5417_v49 = vpack.c.bf16 %v801_v46, %v798_v42 }
 0x12f   : > { %v5419_v50 = vpack.c.bf16 %v793_v48, %v790_v44 }
 0x131   : > { %v4377_v54 = vpop.f32.mrb[36].mxu0 }
 0x132   : > { %4400 = vmatpush3.bf16.xpose.msra.mxu1 %v940_v51  ;;  %v814_v56 = vadd.f32 %v4377_v54, %v5405_v32  ;;  %v805_v60 = vpop.f32.mrb[37].mxu0 }
 0x133   : > { %4728 = vmatprep.subr.msk.bf16.mxu1 %vm7194_vm2, %v5398_v30  ;;  %v806_v61 = vadd.f32 %v5405_v32, %v805_v60  ;;  %v4378_v62 = vpop.f32.mrb[38].mxu0 }
 0x134   : > { %v817_v63 = vadd.f32 %v4378_v62, %v5405_v32  ;;  %v808_v0 = vpop.f32.mrb[39].mxu0 }
 0x135   : > { %v809_v1 = vadd.f32 %v5405_v32, %v808_v0  ;;  %v1029_v0 = vsel %vm7194_vm2, %v5308_v59, 0 }
 0x136   : > { %v5429_v2 = vpack.c.bf16 %v817_v63, %v814_v56 }
 0x137   : > { %v5431_v5 = vpack.c.bf16 %v809_v1, %v806_v61 }
 0x139   : > { %v4381_v7 = vpop.f32.mrb[40].mxu0 }
 0x13a   : > { %4402 = vmatpush3.bf16.xpose.msra.mxu1 %v943_v6  ;;  %v830_v8 = vadd.f32 %v4381_v7, %v5405_v32  ;;  %v821_v9 = vpop.f32.mrb[41].mxu0 }
 0x13b   : > { %4729 = vmatprep.subr.msk.bf16.mxu1 %vm7194_vm2, %v5290_v39  ;;  %v822_v10 = vadd.f32 %v5405_v32, %v821_v9  ;;  %v4382_v12 = vpop.f32.mrb[42].mxu0 }
 0x13c   : > { %v833_v16 = vadd.f32 %v4382_v12, %v5405_v32  ;;  %v824_v18 = vpop.f32.mrb[43].mxu0 }
 0x13d   : > { %v825_v20 = vadd.f32 %v5405_v32, %v824_v18 }
 0x13e   : > { %v5441_v21 = vpack.c.bf16 %v833_v16, %v830_v8 }
 0x13f   : > { %v5443_v23 = vpack.c.bf16 %v825_v20, %v822_v10 }
 0x140   : > { %7200 = vst [vmem:[#allocation2_spill] sm:$0xff] %v5441_v21 }
 0x141   : > { %4404 = vmatmul.mubr.msk.bf16.vlgmr.msra.gmra.mrb[16].mxu1 %vm7194_vm2, %v5283_v35  ;;  %v4385_v25 = vpop.f32.mrb[44].mxu0  ;;  %4459 = vmatprep.subr.bf16.mxu0 %v5443_v23 }
 0x142   : > { %4407 = vmatprep.mubr.msk.bf16.mxu1 %vm7194_vm2, %v5304_v57  ;;  %4412 = vmatpush3.bf16.xpose.msra.mxu1 %v1023_v24  ;;  %v846_v26 = vadd.f32 %v4385_v25, %v5405_v32  ;;  %v837_v27 = vpop.f32.mrb[45].mxu0  ;;  %v1032_v24 = vsel %vm7194_vm2, %v5306_v58, 0 }
 0x143   : > { %4730 = vmatprep.subr.msk.bf16.mxu1 %vm7194_vm2, %v5288_v38  ;;  %v838_v28 = vadd.f32 %v5405_v32, %v837_v27  ;;  %v4386_v29 = vpop.f32.mrb[46].mxu0  ;;  %4460 = vmatpush3.bf16.msra.mxu0 %v5443_v23 }
 0x144   : > { %v849_v33 = vadd.f32 %v4386_v29, %v5405_v32  ;;  %v840_v36 = vpop.f32.mrb[47].mxu0  ;;  %4461 = vmatprep.subr.bf16.mxu0 %v5441_v21 }
 0x145   : > { %v841_v42 = vadd.f32 %v5405_v32, %v840_v36 }
 0x146   : > { %v5460_v22 = vpack.c.bf16 %v849_v33, %v846_v26 }
 0x147   : > { %v5462_v44 = vpack.c.bf16 %v841_v42, %v838_v28  ;;  %4462 = vmatpush3.bf16.msra.mxu0 %v5441_v21 }
 0x148   : > { %7201 = vst [vmem:[#allocation3_spill] sm:$0xff] %v5460_v22 }
 0x149   : > { %7202 = vst [vmem:[#allocation4_spill] sm:$0xff] %v5462_v44  ;;  %4408 = vmatmul.mubr.msk.bf16.gmra.mrb[20].mxu1 %vm7194_vm2, %v5301_v55  ;;  %v4389_v46 = vpop.f32.mrb[48].mxu0  ;;  %4463 = vmatprep.subr.bf16.mxu0 %v5462_v44 }
 0x14a   : > { %4414 = vmatpush3.bf16.xpose.msra.mxu1 %v1026_v45  ;;  %4419 = vmatprep.mubr.msk.bf16.mxu1 %vm7194_vm2, %v5322_v14  ;;  %v862_v47 = vadd.f32 %v4389_v46, %v5405_v32  ;;  %v853_v48 = vpop.f32.mrb[49].mxu0 }
 0x14b   : > { %4731 = vmatprep.subr.msk.bf16.mxu1 %vm7194_vm2, %v5308_v59  ;;  %v854_v51 = vadd.f32 %v5405_v32, %v853_v48  ;;  %v4390_v54 = vpop.f32.mrb[50].mxu0  ;;  %4464 = vmatpush3.bf16.msra.mxu0 %v5462_v44 }
 0x14c   : > { %v865_v56 = vadd.f32 %v4390_v54, %v5405_v32  ;;  %v856_v60 = vpop.f32.mrb[51].mxu0  ;;  %4465 = vmatprep.subr.bf16.mxu0 %v5460_v22 }
 0x14d   : > { %v857_v61 = vadd.f32 %v5405_v32, %v856_v60 }
 0x14e   : > { %v5480_v62 = vpack.c.bf16 %v865_v56, %v862_v47 }
 0x14f   : > { %v5482_v63 = vpack.c.bf16 %v857_v61, %v854_v51  ;;  %4466 = vmatpush3.bf16.msra.mxu0 %v5460_v22 }
 0x150   : > { %7203 = vst [vmem:[#allocation5_spill] sm:$0xff] %v5480_v62 }
 0x151   : > { %7204 = vst [vmem:[#allocation6_spill] sm:$0xff] %v5482_v63  ;;  %v4393_v1 = vpop.f32.mrb[52].mxu0 }
 0x152   : > { %4416 = vmatpush3.bf16.xpose.msra.mxu1 %v1029_v0  ;;  %v878_v6 = vadd.f32 %v4393_v1, %v5405_v32  ;;  %v869_v7 = vpop.f32.mrb[53].mxu0 }
 0x153   : > { %4732 = vmatprep.subr.msk.bf16.mxu1 %vm7194_vm2, %v5306_v58  ;;  %v870_v8 = vadd.f32 %v5405_v32, %v869_v7  ;;  %v4394_v9 = vpop.f32.mrb[54].mxu0 }
 0x154   : > { %v881_v10 = vadd.f32 %v4394_v9, %v5405_v32  ;;  %v872_v12 = vpop.f32.mrb[55].mxu0 }
 0x155   : > { %v873_v16 = vadd.f32 %v5405_v32, %v872_v12 }
 0x156   : > { %v5493_v18 = vpack.c.bf16 %v881_v10, %v878_v6 }
 0x157   : > { %v5495_v20 = vpack.c.bf16 %v873_v16, %v870_v8 }
 0x158   : > { %7205 = vst [vmem:[#allocation7_spill] sm:$0xff] %v5493_v18 }
 0x159   : > { %7206 = vst [vmem:[#allocation8_spill] sm:$0xff] %v5495_v20 }
 0x15a   : > { %4418 = vmatpush3.bf16.xpose.msra.mxu1 %v1032_v24 }
 0x15b   : > { %4443 = vmatprep.subr.bf16.mxu1 %v5419_v50 }
 0x161   : > { %4420 = vmatmul.mubr.msk.bf16.vlgmr.msra.gmra.mrb[24].mxu1 %vm7194_vm2, %v5317_v11 }
 0x162   : > { %4423 = vmatprep.mubr.msk.bf16.mxu1 %vm7194_vm2, %v5342_v40  ;;  %4444 = vmatpush3.bf16.msra.mxu1 %v5419_v50 }
 0x163   : > { %4445 = vmatprep.subr.bf16.mxu1 %v5417_v49 }
 0x166   : > { %4446 = vmatpush3.bf16.msra.mxu1 %v5417_v49 }
 0x167   : > { %4447 = vmatprep.subr.bf16.mxu1 %v5431_v5 }
 0x169   : > { %4424 = vmatmul.mubr.msk.bf16.gmra.mrb[28].mxu1 %vm7194_vm2, %v5339_v34 }
 0x16a   : > { %4448 = vmatpush3.bf16.msra.mxu1 %v5431_v5 }
 0x16b   : > { %4449 = vmatprep.subr.bf16.mxu1 %v5429_v2 }
 0x16e   : > { %4450 = vmatpush3.bf16.msra.mxu1 %v5429_v2 }
 0x16f   : > { %4475 = vmatprep.subr.bf16.mxu1 %v5482_v63 }
 0x1f5   : > { %v5514_v32 = vpop.f32.mrb[56].mxu0 }
 0x1f6   : > { %v5516_v25 = vpop.f32.mrb[57].mxu0  ;;  %v1243_v26 = vsel %vm1188_vm3, %v5514_v32, -inf }
 0x1f7   : > { %1244 = vmax.xlane.f32.xlu0 %v1243_v26  ;;  %v5520_v27 = vpop.f32.mrb[58].mxu0  ;;  %v1237_v33 = vsel %vm1188_vm3, %v5516_v25, -inf }
 0x1f8   : > { %v5522_v28 = vpop.f32.mrb[59].mxu0  ;;  %v1246_v29 = vsel %vm1188_vm3, %v5520_v27, -inf }
 0x1f9   : > { %1247 = vmax.xlane.f32.xlu1 %v1246_v29  ;;  %v1240_v36 = vsel %vm1188_vm3, %v5522_v28, -inf }
 0x1fb   : > { %1238 = vmax.xlane.f32.xlu0 %v1237_v33 }
 0x1fd   : > { %1241 = vmax.xlane.f32.xlu1 %v1240_v36  ;;  %v5530_v42 = vpop.f32.mrb[60].mxu0 }
 0x1fe   : > { %v5532_v45 = vpop.f32.mrb[61].mxu0  ;;  %v1255_v46 = vsel %vm1188_vm3, %v5530_v42, -inf }
 0x1ff   : > { %1256 = vmax.xlane.f32.xlu0 %v1255_v46  ;;  %v5536_v47 = vpop.f32.mrb[62].mxu0  ;;  %v1249_v54 = vsel %vm1188_vm3, %v5532_v45, -inf }
 0x200   : > { %v5538_v48 = vpop.f32.mrb[63].mxu0  ;;  %v1258_v51 = vsel %vm1188_vm3, %v5536_v47, -inf }
 0x201   : > { %1259 = vmax.xlane.f32.xlu1 %v1258_v51  ;;  %v1252_v56 = vsel %vm1188_vm3, %v5538_v48, -inf }
 0x203   : > { %1250 = vmax.xlane.f32.xlu0 %v1249_v54 }
 0x205   : > { %1253 = vmax.xlane.f32.xlu1 %v1252_v56 }
 0x214   : > { %v5546_v60 = vpop.f32.mrb[16].mxu1 }
 0x215   : > { %v5548_v61 = vpop.f32.mrb[17].mxu1  ;;  %v1195_v0 = vsel %vm1188_vm3, %v5546_v60, -inf }
 0x216   : > { %1196 = vmax.xlane.f32.xlu1 %v1195_v0  ;;  %v5552_v1 = vpop.f32.mrb[18].mxu1  ;;  %v1189_v6 = vsel %vm1188_vm3, %v5548_v61, -inf }
 0x217   : > { %1190 = vmax.xlane.f32.xlu0 %v1189_v6  ;;  %v5556_v7 = vpop.f32.mrb[19].mxu1  ;;  %v1198_v8 = vsel %vm1188_vm3, %v5552_v1, -inf }
 0x218   : > { %v1192_v9 = vsel %vm1188_vm3, %v5556_v7, -inf }
 0x21a   : > { %1199 = vmax.xlane.f32.xlu1 %v1198_v8 }
 0x21b   : > { %1193 = vmax.xlane.f32.xlu0 %v1192_v9 }
 0x21c   : > { %v5562_v10 = vpop.f32.mrb[20].mxu1 }
 0x21d   : > { %v5564_v12 = vpop.f32.mrb[21].mxu1  ;;  %v1207_v16 = vsel %vm1188_vm3, %v5562_v10, -inf }
 0x21e   : > { %v5568_v24 = vpop.f32.mrb[22].mxu1  ;;  %v1201_v33 = vsel %vm1188_vm3, %v5564_v12, -inf }
 0x21f   : > { %1208 = vmax.xlane.f32.xlu0 %v1207_v16  ;;  %v5570_v26 = vpop.f32.mrb[23].mxu1  ;;  %v1210_v29 = vsel %vm1188_vm3, %v5568_v24, -inf }
 0x220   : > { %1211 = vmax.xlane.f32.xlu1 %v1210_v29  ;;  %v1204_v36 = vsel %vm1188_vm3, %v5570_v26, -inf }
 0x223   : > { %1202 = vmax.xlane.f32.xlu0 %v1201_v33 }
 0x224   : > { %1205 = vmax.xlane.f32.xlu1 %v1204_v36 }
 0x234   : > { %v5578_v46 = vpop.f32.mrb[24].mxu1 }
 0x235   : > { %v5580_v51 = vpop.f32.mrb[25].mxu1  ;;  %v1219_v54 = vsel %vm1188_vm3, %v5578_v46, -inf }
 0x236   : > { %1220 = vmax.xlane.f32.xlu0 %v1219_v54  ;;  %v5584_v56 = vpop.f32.mrb[26].mxu1  ;;  %v1213_v8 = vsel %vm1188_vm3, %v5580_v51, -inf }
 0x237   : > { %v5586_v0 = vpop.f32.mrb[27].mxu1  ;;  %v1222_v6 = vsel %vm1188_vm3, %v5584_v56, -inf }
 0x238   : > { %1223 = vmax.xlane.f32.xlu1 %v1222_v6  ;;  %v1216_v9 = vsel %vm1188_vm3, %v5586_v0, -inf }
 0x23a   : > { %1214 = vmax.xlane.f32.xlu0 %v1213_v8 }
 0x23c   : > { %1217 = vmax.xlane.f32.xlu1 %v1216_v9  ;;  %v5594_v16 = vpop.f32.mrb[28].mxu1 }
 0x23d   : > { %v5596_v29 = vpop.f32.mrb[29].mxu1  ;;  %v1231_v33 = vsel %vm1188_vm3, %v5594_v16, -inf }
 0x23e   : > { %1232 = vmax.xlane.f32.xlu0 %v1231_v33  ;;  %v5600_v36 = vpop.f32.mrb[30].mxu1  ;;  %v1225_v6 = vsel %vm1188_vm3, %v5596_v29, -inf }
 0x23f   : > { %v5602_v54 = vpop.f32.mrb[31].mxu1  ;;  %v1234_v8 = vsel %vm1188_vm3, %v5600_v36, -inf }
 0x240   : > { %v1228_v9 = vsel %vm1188_vm3, %v5602_v54, -inf }
 0x242   : > { %1226 = vmax.xlane.f32.xlu0 %v1225_v6 }
 0x24d   : > { %1714 = vrot.lane.b32.xlu1 %v5380_v17, %s5144_s28 }
 0x258   : > { %1712 = vrot.lane.b32.xlu0 %v5382_v19, %s5144_s28 }
 0x271   : > { %1235 = vmax.xlane.f32.xlu1 %v1234_v8 }
 0x275   : > { %1229 = vmax.xlane.f32.xlu1 %v1228_v9 }
 0x284   : > { %v1245_v33 = vpop.xlane.xlu0 %1244 }
 0x285   : > { %v1279_v44 = vsub.f32 %v5514_v32, %v1245_v33 }
 0x286   : > { %v1248_v22 = vpop.xlane.xlu1 %1247 }
 0x287   : > { %v1321_v6 = vmul.f32 1.442695, %v1279_v44  ;;  %v1280_v18 = vsub.f32 %v5520_v27, %v1248_v22 }
 0x288   : > { %v1239_v20 = vpop.xlane.xlu0 %1238 }
 0x289   : > { %4944 = vpow2.f32 %v1321_v6  ;;  %v1323_v17 = vmul.f32 1.442695, %v1280_v18  ;;  %v1277_v19 = vsub.f32 %v5516_v25, %v1239_v20 }
 0x28a   : > { %v1242_v62 = vpop.xlane.xlu1 %1241 }
 0x28b   : > { %4946 = vpow2.f32 %v1323_v17  ;;  %v1317_v63 = vmul.f32 1.442695, %v1277_v19  ;;  %v1278_v8 = vsub.f32 %v5522_v28, %v1242_v62 }
 0x28c   : > { %v5618_v21 = vpop.xlane.xlu0 %1256 }
 0x28d   : > { %4948 = vpow2.f32 %v1317_v63  ;;  %v1319_v9 = vmul.f32 1.442695, %v1278_v8 }
 0x28e   : > { %v1260_v28 = vpop.xlane.xlu1 %1259 }
 0x28f   : > { %4950 = vpow2.f32 %v1319_v9 }
 0x290   : > { %v1251_v32 = vpop.xlane.xlu0 %1250 }
 0x291   : > { %v1281_v44 = vsub.f32 %v5532_v45, %v1251_v32 }
 0x292   : > { %v5639_v17 = vpop.xlane.xlu1 %1253 }
 0x293   : > { %v5621_v33 = vpop.eup %4944  ;;  %v1325_v22 = vmul.f32 1.442695, %v1281_v44 }
 0x294   : > { %7207 = vst [vmem:[#allocation9_spill] sm:$0xff] %v5621_v33  ;;  %v1387_v18 = vsel %vm1188_vm3, %v5621_v33, 0.0 }
 0x295   : > { %v5625_v20 = vpop.eup %4946  ;;  %4952 = vpow2.f32 %v1325_v22  ;;  %1388 = vadd.xlane.f32.xlu0 %v1387_v18 }
 0x296   : > { %7208 = vst [vmem:[#allocation10_spill] sm:$0xff] %v5625_v20  ;;  %v1390_v62 = vsel %vm1188_vm3, %v5625_v20, 0.0 }
 0x297   : > { %v5629_v25 = vpop.eup %4948  ;;  %1391 = vadd.xlane.f32.xlu1 %v1390_v62 }
 0x298   : > { %7209 = vst [vmem:[#allocation11_spill] sm:$0xff] %v5629_v25  ;;  %v1381_v63 = vsel %vm1188_vm3, %v5629_v25, 0.0 }
 0x299   : > { %v5633_v27 = vpop.eup %4950  ;;  %1382 = vadd.xlane.f32.xlu0 %v1381_v63 }
 0x29a   : > { %v1384_v45 = vsel %vm1188_vm3, %v5633_v27, 0.0 }
 0x29b   : > { %1385 = vadd.xlane.f32.xlu1 %v1384_v45 }
 0x29f   : > { %v5637_v6 = vpop.eup %4952 }
 0x2a0   : > { %7210 = vst [vmem:[#allocation12_spill] sm:$0xff] %v5637_v6  ;;  %v1393_v19 = vsel %vm1188_vm3, %v5637_v6, 0.0 }
 0x2a1   : > { %1394 = vadd.xlane.f32.xlu1 %v1393_v19 }
 0x2a3   : > { %v1197_v8 = vpop.xlane.xlu1 %1196 }
 0x2a4   : > { %v1263_v9 = vsub.f32 %v5546_v60, %v1197_v8  ;;  %v1191_v32 = vpop.xlane.xlu0 %1190 }
 0x2a5   : > { %v1261_v44 = vsub.f32 %v5548_v61, %v1191_v32 }
 0x2a6   : > { %v1289_v22 = vmul.f32 1.442695, %v1263_v9 }
 0x2a7   : > { %v1285_v18 = vmul.f32 1.442695, %v1261_v44  ;;  %v1200_v62 = vpop.xlane.xlu1 %1199 }
 0x2a8   : > { %4954 = vpow2.f32 %v1289_v22  ;;  %v1264_v63 = vsub.f32 %v5552_v1, %v1200_v62  ;;  %v1194_v45 = vpop.xlane.xlu0 %1193 }
 0x2a9   : > { %v1262_v33 = vsub.f32 %v5556_v7, %v1194_v45  ;;  %4956 = vpow2.f32 %v1285_v18  ;;  %v1284_v7 = vsub.f32 %v5536_v47, %v1260_v28 }
 0x2aa   : > { %v1291_v20 = vmul.f32 1.442695, %v1264_v63 }
 0x2ab   : > { %v1287_v25 = vmul.f32 1.442695, %v1262_v33 }
 0x2ac   : > { %4958 = vpow2.f32 %v1291_v20  ;;  %v1209_v19 = vpop.xlane.xlu0 %1208 }
 0x2ad   : > { %v1267_v6 = vsub.f32 %v5562_v10, %v1209_v19  ;;  %v1212_v60 = vpop.xlane.xlu1 %1211  ;;  %4960 = vpow2.f32 %v1287_v25 }
 0x2ae   : > { %v1268_v61 = vsub.f32 %v5568_v24, %v1212_v60 }
 0x2af   : > { %v1297_v8 = vmul.f32 1.442695, %v1267_v6 }
 0x2b0   : > { %v1299_v9 = vmul.f32 1.442695, %v1268_v61  ;;  %v1203_v32 = vpop.xlane.xlu0 %1202 }
 0x2b1   : > { %4962 = vpow2.f32 %v1297_v8  ;;  %v1265_v1 = vsub.f32 %v5564_v12, %v1203_v32  ;;  %v1206_v44 = vpop.xlane.xlu1 %1205  ;;  %v1331_v12 = vmul.f32 1.442695, %v1284_v7  ;;  %v1282_v7 = vsub.f32 %v5538_v48, %v5639_v17 }
 0x2b2   : > { %v5650_v22 = vpop.eup %4954  ;;  %4964 = vpow2.f32 %v1299_v9  ;;  %v1266_v33 = vsub.f32 %v5570_v26, %v1206_v44 }
 0x2b3   : > { %v1293_v20 = vmul.f32 1.442695, %v1265_v1  ;;  %v1339_v10 = vsel %vm1188_vm3, %v5650_v22, 0.0  ;;  %v5656_v25 = vpop.eup %4956 }
 0x2b4   : > { %v1295_v24 = vmul.f32 1.442695, %v1266_v33  ;;  %1340 = vadd.xlane.f32.xlu0 %v1339_v10  ;;  %v1333_v18 = vsel %vm1188_vm3, %v5656_v25, 0.0 }
 0x2b5   : > { %4966 = vpow2.f32 %v1293_v20 }
 0x2b6   : > { %v5658_v6 = vpop.eup %4958  ;;  %4968 = vpow2.f32 %v1295_v24 }
 0x2b7   : > { %v1342_v47 = vsel %vm1188_vm3, %v5658_v6, 0.0  ;;  %v5664_v26 = vpop.eup %4960  ;;  %4970 = vpow2.f32 %v1331_v12 }
 0x2b8   : > { %1334 = vadd.xlane.f32.xlu0 %v1333_v18  ;;  %1343 = vadd.xlane.f32.xlu1 %v1342_v47  ;;  %v1336_v62 = vsel %vm1188_vm3, %v5664_v26, 0.0 }
 0x2bb   : > { %v5666_v28 = vpop.eup %4962 }
 0x2bc   : > { %v5670_v63 = vpop.eup %4964  ;;  %1337 = vadd.xlane.f32.xlu1 %v1336_v62  ;;  %v1351_v45 = vsel %vm1188_vm3, %v5666_v28, 0.0  ;;  %v1327_v62 = vmul.f32 1.442695, %v1282_v7 }
 0x2bd   : > { %1352 = vadd.xlane.f32.xlu0 %v1351_v45  ;;  %v1354_v60 = vsel %vm1188_vm3, %v5670_v63, 0.0 }
 0x2bf   : > { %v5674_v19 = vpop.eup %4966 }
 0x2c0   : > { %v5678_v61 = vpop.eup %4968  ;;  %1355 = vadd.xlane.f32.xlu1 %v1354_v60  ;;  %v1345_v8 = vsel %vm1188_vm3, %v5674_v19, 0.0 }
 0x2c1   : > { %1346 = vadd.xlane.f32.xlu0 %v1345_v8  ;;  %v1348_v32 = vsel %vm1188_vm3, %v5678_v61, 0.0  ;;  %v5684_v1 = vpop.eup %4970 }
 0x2c2   : > { %v1402_v12 = vsel %vm1188_vm3, %v5684_v1, 0.0 }
 0x2c3   : > { %v1221_v9 = vpop.xlane.xlu0 %1220 }
 0x2c4   : > { %v1271_v44 = vsub.f32 %v5578_v46, %v1221_v9  ;;  %1349 = vadd.xlane.f32.xlu1 %v1348_v32  ;;  %v1283_v46 = vsub.f32 %v5530_v42, %v5618_v21 }
 0x2c5   : > { %v1224_v33 = vpop.xlane.xlu1 %1223 }
 0x2c6   : > { %v1305_v20 = vmul.f32 1.442695, %v1271_v44  ;;  %v1272_v10 = vsub.f32 %v5584_v56, %v1224_v33  ;;  %v1329_v8 = vmul.f32 1.442695, %v1283_v46 }
 0x2c7   : > { %v1215_v24 = vpop.xlane.xlu0 %1214 }
 0x2c8   : > { %4972 = vpow2.f32 %v1305_v20  ;;  %v1307_v18 = vmul.f32 1.442695, %v1272_v10  ;;  %v1269_v47 = vsub.f32 %v5580_v51, %v1215_v24  ;;  %1403 = vadd.xlane.f32.xlu1 %v1402_v12 }
 0x2c9   : > { %v1218_v45 = vpop.xlane.xlu1 %1217 }
 0x2ca   : > { %4974 = vpow2.f32 %v1307_v18  ;;  %v1301_v48 = vmul.f32 1.442695, %v1269_v47  ;;  %v1270_v17 = vsub.f32 %v5586_v0, %v1218_v45 }
 0x2cb   : > { %v1233_v60 = vpop.xlane.xlu0 %1232 }
 0x2cc   : > { %4976 = vpow2.f32 %v1301_v48  ;;  %v1303_v56 = vmul.f32 1.442695, %v1270_v17  ;;  %v1275_v9 = vsub.f32 %v5594_v16, %v1233_v60 }
 0x2cd   : > { %4978 = vpow2.f32 %v1327_v62  ;;  %v5740_v60 = vpop.permute.xlu1 %1714 }
 0x2ce   : > { %4980 = vpow2.f32 %v1303_v56  ;;  %v1313_v44 = vmul.f32 1.442695, %v1275_v9 }
 0x2cf   : > { %v1227_v32 = vpop.xlane.xlu0 %1226  ;;  %4982 = vpow2.f32 %v1329_v8 }
 0x2d0   : > { %v1273_v7 = vsub.f32 %v5596_v29, %v1227_v32  ;;  %4984 = vpow2.f32 %v1313_v44 }
 0x2d2   : > { %v5697_v51 = vpop.eup %4972  ;;  %v1309_v20 = vmul.f32 1.442695, %v1273_v7 }
 0x2d3   : > { %v5700_v21 = vpop.permute.xlu0 %1712  ;;  %v1363_v42 = vsel %vm1188_vm3, %v5697_v51, 0.0 }
 0x2d4   : > { %v5704_v0 = vpop.eup %4974  ;;  %1364 = vadd.xlane.f32.xlu0 %v1363_v42  ;;  %4737 = vmatprep.subr.msk.bf16.mxu0 %vm7194_vm2, %v5700_v21  ;;  %4986 = vpow2.f32 %v1309_v20 }
 0x2d5   : > { %v1366_v16 = vsel %vm1188_vm3, %v5704_v0, 0.0 }
 0x2d6   : > { %v5710_v33 = vpop.eup %4976  ;;  %1367 = vadd.xlane.f32.xlu1 %v1366_v16  ;;  %v7211_v16 = vld [vmem:[#allocation2_spill] sm:$0xff] }
 0x2d7   : > { %v5712_v29 = vpop.eup %4978  ;;  %v1357_v10 = vsel %vm1188_vm3, %v5710_v33, 0.0 }
 0x2d8   : > { %v5716_v24 = vpop.eup %4980  ;;  %1358 = vadd.xlane.f32.xlu0 %v1357_v10  ;;  %v1396_v18 = vsel %vm1188_vm3, %v5712_v29, 0.0 }
 0x2d9   : > { %v1360_v12 = vsel %vm1188_vm3, %v5716_v24, 0.0  ;;  %v5722_v47 = vpop.eup %4982 }
 0x2da   : > { %1361 = vadd.xlane.f32.xlu1 %v1360_v12  ;;  %v1399_v62 = vsel %vm1188_vm3, %v5722_v47, 0.0  ;;  %v5726_v45 = vpop.eup %4984 }
 0x2db   : > { %v1375_v46 = vsel %vm1188_vm3, %v5726_v45, 0.0 }
 0x2dc   : > { %1397 = vadd.xlane.f32.xlu0 %v1396_v18 }
 0x2de   : > { %v5730_v48 = vpop.eup %4986 }
 0x2df   : > { %v1369_v17 = vsel %vm1188_vm3, %v5730_v48, 0.0 }
 0x2e0   : > { %1400 = vadd.xlane.f32.xlu0 %v1399_v62 }
 0x2e4   : > { %1376 = vadd.xlane.f32.xlu0 %v1375_v46 }
 0x2e8   : > { %1370 = vadd.xlane.f32.xlu0 %v1369_v17 }
 0x2eb   : > { %1825 = vrot.lane.b32.xlu1 %v5290_v39, %s5144_s28 }
 0x2ef   : > { %1718 = vrot.lane.b32.xlu1 %v5398_v30, %s5144_s28 }
 0x2f3   : > { %1827 = vrot.lane.b32.xlu1 %v5288_v38, %s5144_s28 }
 0x2fe   : > { %1716 = vrot.lane.b32.xlu0 %v5400_v31, %s5144_s28  ;;  %v1236_v56 = vpop.xlane.xlu1 %1235 }
 0x2ff   : > { %v1276_v8 = vsub.f32 %v5600_v36, %v1236_v56 }
 0x301   : > { %v1315_v32 = vmul.f32 1.442695, %v1276_v8  ;;  %v7214_v8 = vld [vmem:[#allocation11_spill] sm:$0xff] }
 0x302   : > { %1700 = vrot.lane.b32.xlu0 %v5286_v37, %s5144_s28  ;;  %v1230_v9 = vpop.xlane.xlu1 %1229 }
 0x303   : > { %v1274_v39 = vsub.f32 %v5602_v54, %v1230_v9  ;;  %4988 = vpow2.f32 %v1315_v32  ;;  %v7215_v32 = vld [vmem:[#allocation8_spill] sm:$0xff] }
 0x305   : > { %v1311_v38 = vmul.f32 1.442695, %v1274_v39 }
 0x306   : > { %1829 = vrot.lane.b32.xlu0 %v5308_v59, %s5144_s28 }
 0x307   : > { %4990 = vpow2.f32 %v1311_v38 }
 0x30a   : > { %1704 = vrot.lane.b32.xlu0 %v5304_v57, %s5144_s28 }
 0x30d   : > { %v5756_v37 = vpop.eup %4988 }
 0x30e   : > { %1831 = vrot.lane.b32.xlu0 %v5306_v58, %s5144_s28  ;;  %v1378_v59 = vsel %vm1188_vm3, %v5756_v37, 0.0 }
 0x311   : > { %v5762_v30 = vpop.eup %4990 }
 0x312   : > { %1813 = vrot.lane.b32.xlu0 %v5322_v14, %s5144_s28  ;;  %v1372_v57 = vsel %vm1188_vm3, %v5762_v30, 0.0 }
 0x316   : > { %1942 = vrot.lane.b32.xlu0 %v5348_v43, %s5144_s28 }
 0x317   : > { %1379 = vadd.xlane.f32.xlu1 %v1378_v59 }
 0x31a   : > { %1819 = vrot.lane.b32.xlu0 %v5339_v34, %s5144_s28 }
 0x31b   : > { %1373 = vadd.xlane.f32.xlu1 %v1372_v57  ;;  %v7217_v57 = vld [vmem:[#allocation7_spill] sm:$0xff] }
 0x31e   : > { %1926 = vrot.lane.b32.xlu0 %v5358_v53, %s5144_s28 }
 0x322   : > { %1930 = vrot.lane.b32.xlu0 %v5372_v4, %s5144_s28  ;;  %v1389_v58 = vpop.xlane.xlu0 %1388 }
 0x324   : > { %v1392_v14 = vpop.xlane.xlu1 %1391 }
 0x326   : > { %2315 = vrot.lane.b32.xlu0 %v5419_v50, %s5145_s29  ;;  %v1383_v34 = vpop.xlane.xlu0 %1382 }
 0x328   : > { %v1386_v43 = vpop.xlane.xlu1 %1385 }
 0x32a   : > { %2319 = vrot.lane.b32.xlu0 %v5431_v5, %s5145_s29 }
 0x32c   : > { %1702 = vrot.lane.b32.xlu1 %v5283_v35, %s5144_s28 }
 0x32e   : > { %2321 = vrot.lane.b32.xlu0 %v5429_v2, %s5145_s29  ;;  %v5790_v35 = vpop.xlane.xlu1 %1394 }
 0x330   : > { %1938 = vrot.lane.b32.xlu1 %v5324_v15, %s5144_s28 }
 0x334   : > { %1706 = vrot.lane.b32.xlu1 %v5301_v55, %s5144_s28 }
 0x338   : > { %1940 = vrot.lane.b32.xlu1 %v5320_v13, %s5144_s28 }
 0x33c   : > { %1815 = vrot.lane.b32.xlu1 %v5317_v11, %s5144_s28 }
 0x340   : > { %1817 = vrot.lane.b32.xlu1 %v5342_v40, %s5144_s28 }
 0x341   : > { %v1341_v53 = vpop.xlane.xlu0 %1340 }
 0x344   : > { %1944 = vrot.lane.b32.xlu1 %v5344_v41, %s5144_s28 }
 0x345   : > { %v1335_v55 = vpop.xlane.xlu0 %1334  ;;  %v1344_v15 = vpop.xlane.xlu1 %1343 }
 0x346   : > { %4992 = vrcp.f32 %v1344_v15 }
 0x347   : > { %4994 = vrcp.f32 %v1335_v55 }
 0x348   : > { %1928 = vrot.lane.b32.xlu1 %v5356_v52, %s5144_s28  ;;  %4996 = vrcp.f32 %v1341_v53 }
 0x349   : > { %v1338_v11 = vpop.xlane.xlu1 %1337 }
 0x34a   : > { %4998 = vrcp.f32 %v1338_v11  ;;  %v1353_v13 = vpop.xlane.xlu0 %1352 }
 0x34b   : > { %5000 = vrcp.f32 %v1383_v34 }
 0x34c   : > { %1932 = vrot.lane.b32.xlu1 %v5370_v3, %s5144_s28  ;;  %5002 = vrcp.f32 %v1386_v43 }
 0x34d   : > { %v1356_v40 = vpop.xlane.xlu1 %1355 }
 0x34e   : > { %v1347_v4 = vpop.xlane.xlu0 %1346  ;;  %5004 = vrcp.f32 %v1356_v40 }
 0x34f   : > { %5006 = vrcp.f32 %v1347_v4 }
 0x350   : > { %2317 = vrot.lane.b32.xlu1 %v5417_v49, %s5145_s29  ;;  %v4993_v41 = vpop.eup %4992  ;;  %5008 = vrcp.f32 %v1353_v13 }
 0x351   : > { %v1350_v31 = vpop.xlane.xlu1 %1349  ;;  %v4995_v52 = vpop.eup %4994  ;;  %v1432_v5 = vmul.f32 %v4993_v41, %v5658_v6 }
 0x352   : > { %5010 = vrcp.f32 %v1350_v31  ;;  %v4997_v50 = vpop.eup %4996  ;;  %v1429_v3 = vmul.f32 %v4995_v52, %v5656_v25  ;;  %v7212_v25 = vld [vmem:[#allocation6_spill] sm:$0xff] }
 0x353   : > { %v1431_v54 = vmul.f32 %v4997_v50, %v5650_v22  ;;  %5012 = vrcp.f32 %v1392_v14  ;;  %v7213_v22 = vld [vmem:[#allocation5_spill] sm:$0xff] }
 0x354   : > { %v4999_v2 = vpop.eup %4998  ;;  %2408 = vrot.lane.b32.xlu1 %v5443_v23, %s5145_s29  ;;  %5014 = vrcp.f32 %v1389_v58  ;;  %v7218_v14 = vld [vmem:[#allocation9_spill] sm:$0xff] }
 0x355   : > { %v1430_v36 = vmul.f32 %v4999_v2, %v5664_v26  ;;  %v5001_v44 = vpop.eup %5000  ;;  %v1454_v42 = vpack.c.bf16 %v1432_v5, %v1431_v54  ;;  %v1404_v17 = vpop.xlane.xlu1 %1403  ;;  %5016 = vrcp.f32 %v5790_v35 }
 0x356   : > { %v5003_v7 = vpop.eup %5002  ;;  %v1445_v9 = vmul.f32 %v5001_v44, %v7214_v8 }
 0x357   : > { %v1453_v49 = vpack.c.bf16 %v1430_v36, %v1429_v3  ;;  %v1446_v62 = vmul.f32 %v5003_v7, %v5633_v27 }
 0x358   : > { %2410 = vrot.lane.b32.xlu1 %v7211_v16, %s5145_s29  ;;  %v5005_v20 = vpop.eup %5004 }
 0x359   : > { %4451 = vmatprep.mubr.msk.bf16.mxu1 %vm1188_vm3, %v1453_v49  ;;  %v5007_v6 = vpop.eup %5006  ;;  %v1436_v10 = vmul.f32 %v5005_v20, %v5670_v63  ;;  %v1461_v63 = vpack.c.bf16 %v1446_v62, %v1445_v9  ;;  %v1736_v62 = vsel %vm7194_vm2, %v5740_v60, 0 }
 0x35a   : > { %4452 = vmatmul.mubr.msk.bf16.vlgmr.msra.gmra.mrb[32].mxu1 %vm1188_vm3, %v1454_v42  ;;  %v5009_v23 = vpop.eup %5008  ;;  %v1433_v12 = vmul.f32 %v5007_v6, %v5674_v19  ;;  %v7219_v42 = vld [vmem:[#allocation12_spill] sm:$0xff] }
 0x35b   : > { %4476 = vmatpush3.bf16.msra.mxu1 %v7212_v25  ;;  %v1435_v46 = vmul.f32 %v5009_v23, %v5666_v28  ;;  %v7216_v28 = vld [vmem:[#allocation10_spill] sm:$0xff] }
 0x35c   : > { %v5011_v26 = vpop.eup %5010  ;;  %4477 = vmatprep.subr.bf16.mxu1 %v7213_v22 }
 0x35d   : > { %v1434_v18 = vmul.f32 %v5011_v26, %v5678_v61  ;;  %v1456_v39 = vpack.c.bf16 %v1436_v10, %v1435_v46  ;;  %v5013_v38 = vpop.eup %5012 }
 0x35e   : > { %v5015_v19 = vpop.eup %5014  ;;  %v1448_v61 = vmul.f32 %v5013_v38, %v7216_v28 }
 0x35f   : > { %4478 = vmatpush3.bf16.msra.mxu1 %v7213_v22  ;;  %v1455_v56 = vpack.c.bf16 %v1434_v18, %v1433_v12  ;;  %v1447_v34 = vmul.f32 %v5015_v19, %v7218_v14  ;;  %v5017_v11 = vpop.eup %5016 }
 0x360   : > { %4479 = vmatprep.subr.bf16.mxu1 %v7215_v32  ;;  %v1449_v16 = vmul.f32 %v5017_v11, %v7219_v42 }
 0x361   : > { %v1365_v59 = vpop.xlane.xlu0 %1364  ;;  %4455 = vmatprep.mubr.msk.bf16.mxu1 %vm1188_vm3, %v1455_v56  ;;  %v1462_v53 = vpack.c.bf16 %v1448_v61, %v1447_v34 }
 0x362   : > { %4456 = vmatmul.mubr.msk.bf16.gmra.mrb[36].mxu1 %vm1188_vm3, %v1456_v39 }
 0x363   : > { %4480 = vmatpush3.bf16.msra.mxu1 %v7215_v32  ;;  %4483 = vmatprep.mubr.msk.bf16.mxu1 %vm1188_vm3, %v1461_v63  ;;  %v1368_v27 = vpop.xlane.xlu1 %1367 }
 0x364   : > { %4481 = vmatprep.subr.bf16.mxu1 %v7217_v57  ;;  %5018 = vrcp.f32 %v1368_v27 }
 0x365   : > { %v1359_v58 = vpop.xlane.xlu0 %1358 }
 0x366   : > { %5020 = vrcp.f32 %v1359_v58 }
 0x367   : > { %5022 = vrcp.f32 %v1365_v59  ;;  %4482 = vmatpush3.bf16.msra.mxu1 %v7217_v57  ;;  %v1362_v43 = vpop.xlane.xlu1 %1361 }
 0x368   : > { %5024 = vrcp.f32 %v1362_v43 }
 0x369   : > { %v1398_v55 = vpop.xlane.xlu0 %1397 }
 0x36a   : > { %5026 = vrcp.f32 %v1398_v55  ;;  %4484 = vmatmul.mubr.msk.bf16.vlgmr.msra.gmra.mrb[40].mxu1 %vm1188_vm3, %v1462_v53 }
 0x36b   : > { %v1826_v15 = vpop.permute.xlu1 %1825  ;;  %5028 = vrcp.f32 %v1404_v17 }
 0x36c   : > { %4741 = vmatprep.subr.msk.bf16.mxu1 %vm7194_vm2, %v1826_v15  ;;  %v1846_v40 = vsel %vm7194_vm2, %v1826_v15, 0 }
 0x36d   : > { %v1401_v35 = vpop.xlane.xlu0 %1400 }
 0x36e   : > { %5030 = vrcp.f32 %v1401_v35  ;;  %v5019_v13 = vpop.eup %5018 }
 0x36f   : > { %v1719_v4 = vpop.permute.xlu1 %1718  ;;  %v1440_v2 = vmul.f32 %v5019_v13, %v5704_v0 }
 0x370   : > { %v5021_v41 = vpop.eup %5020  ;;  %4508 = vmatpush3.bf16.xpose.msra.mxu1 %v1846_v40  ;;  %v1742_v8 = vsel %vm7194_vm2, %v1719_v4, 0 }
 0x371   : > { %v5023_v31 = vpop.eup %5022  ;;  %v1377_v52 = vpop.xlane.xlu0 %1376  ;;  %v1437_v3 = vmul.f32 %v5021_v41, %v5710_v33 }
 0x372   : > { %v5025_v50 = vpop.eup %5024  ;;  %v1439_v44 = vmul.f32 %v5023_v31, %v5697_v51  ;;  %v1733_v51 = vsel %vm7194_vm2, %v5700_v21, 0 }
 0x373   : > { %v1828_v5 = vpop.permute.xlu1 %1827  ;;  %v1438_v36 = vmul.f32 %v5025_v50, %v5716_v24 }
 0x374   : > { %v5027_v54 = vpop.eup %5026  ;;  %4742 = vmatprep.subr.msk.bf16.mxu1 %vm7194_vm2, %v1828_v5  ;;  %v1458_v23 = vpack.c.bf16 %v1440_v2, %v1439_v44  ;;  %v1849_v0 = vsel %vm7194_vm2, %v1828_v5, 0 }
 0x375   : > { %v1371_v49 = vpop.xlane.xlu0 %1370  ;;  %v1457_v7 = vpack.c.bf16 %v1438_v36, %v1437_v3  ;;  %v1450_v20 = vmul.f32 %v5027_v54, %v5712_v29  ;;  %v5029_v6 = vpop.eup %5028 }
 0x376   : > { %v1452_v10 = vmul.f32 %v5029_v6, %v5684_v1 }
 0x377   : > { %4467 = vmatprep.mubr.msk.bf16.mxu0 %vm1188_vm3, %v1457_v7  ;;  %v1463_v33 = vpack.c.bf16 %v1450_v20, %v1449_v16 }
 0x378   : > { %v5031_v26 = vpop.eup %5030  ;;  %4510 = vmatpush3.bf16.xpose.msra.mxu1 %v1849_v0  ;;  %4468 = vmatmul.mubr.msk.bf16.vlgmr.msra.gmra.mrb[64].mxu0 %vm1188_vm3, %v1458_v23 }
 0x379   : > { %4492 = vmatpush3.bf16.xpose.msra.mxu0 %v1733_v51  ;;  %v1717_v24 = vpop.permute.xlu0 %1716  ;;  %4487 = vmatprep.mubr.msk.bf16.mxu1 %vm1188_vm3, %v1463_v33  ;;  %v1451_v29 = vmul.f32 %v5031_v26, %v5722_v47 }
 0x37a   : > { %4738 = vmatprep.subr.msk.bf16.mxu0 %vm7194_vm2, %v5740_v60  ;;  %v1739_v46 = vsel %vm7194_vm2, %v1717_v24, 0 }
 0x37b   : > { %v1464_v12 = vpack.c.bf16 %v1452_v10, %v1451_v29 }
 0x37d   : > { %v1701_v18 = vpop.permute.xlu0 %1700  ;;  %4488 = vmatmul.mubr.msk.bf16.gmra.mrb[44].mxu1 %vm1188_vm3, %v1464_v12 }
 0x381   : > { %4494 = vmatpush3.bf16.xpose.msra.mxu0 %v1736_v62  ;;  %v1830_v21 = vpop.permute.xlu0 %1829 }
 0x382   : > { %4739 = vmatprep.subr.msk.bf16.mxu0 %vm7194_vm2, %v1717_v24  ;;  %4743 = vmatprep.subr.msk.bf16.mxu1 %vm7194_vm2, %v1830_v21  ;;  %v1852_v47 = vsel %vm7194_vm2, %v1830_v21, 0 }
 0x383   : > { %4512 = vmatpush3.bf16.xpose.msra.mxu1 %v1852_v47 }
 0x385   : > { %v1705_v1 = vpop.permute.xlu0 %1704 }
 0x389   : > { %4496 = vmatpush3.bf16.xpose.msra.mxu0 %v1739_v46  ;;  %v1832_v17 = vpop.permute.xlu0 %1831 }
 0x38a   : > { %4740 = vmatprep.subr.msk.bf16.mxu0 %vm7194_vm2, %v1719_v4  ;;  %4744 = vmatprep.subr.msk.bf16.mxu1 %vm7194_vm2, %v1832_v17  ;;  %v1855_v60 = vsel %vm7194_vm2, %v1832_v17, 0 }
 0x38b   : > { %4514 = vmatpush3.bf16.xpose.msra.mxu1 %v1855_v60 }
 0x38d   : > { %v1814_v56 = vpop.permute.xlu0 %1813 }
 0x38e   : > { %4515 = vmatprep.mubr.msk.bf16.mxu1 %vm7194_vm2, %v1814_v56 }
 0x391   : > { %4498 = vmatpush3.bf16.xpose.msra.mxu0 %v1742_v8  ;;  %v1943_v9 = vpop.permute.xlu0 %1942 }
 0x392   : > { %v1965_v5 = vsel %vm7194_vm2, %v1943_v9, 0 }
 0x395   : > { %v1820_v39 = vpop.permute.xlu0 %1819 }
 0x399   : > { %v1927_v38 = vpop.permute.xlu0 %1926 }
 0x39d   : > { %v5861_v59 = vpop.permute.xlu0 %1930 }
 0x3a1   : > { %v2316_v63 = vpop.permute.xlu0 %2315 }
 0x3a2   : > { %4539 = vmatprep.subr.bf16.mxu1 %v2316_v63 }
 0x3a4   : > { %v1380_v19 = vpop.xlane.xlu1 %1379 }
 0x3a5   : > { %5032 = vrcp.f32 %v1380_v19  ;;  %v2320_v50 = vpop.permute.xlu0 %2319 }
 0x3a6   : > { %5034 = vrcp.f32 %v1371_v49 }
 0x3a7   : > { %5036 = vrcp.f32 %v1377_v52 }
 0x3a8   : > { %v1374_v27 = vpop.xlane.xlu1 %1373 }
 0x3a9   : > { %5038 = vrcp.f32 %v1374_v27  ;;  %v2322_v3 = vpop.permute.xlu0 %2321 }
 0x3ac   : > { %v1703_v28 = vpop.permute.xlu1 %1702 }
 0x3af   : > { %v5033_v61 = vpop.eup %5032 }
 0x3b0   : > { %v1939_v58 = vpop.permute.xlu1 %1938  ;;  %v5035_v14 = vpop.eup %5034  ;;  %v1444_v53 = vmul.f32 %v5033_v61, %v5756_v37 }
 0x3b1   : > { %4745 = vmatprep.subr.msk.bf16.mxu0 %vm7194_vm2, %v1939_v58  ;;  %v5037_v34 = vpop.eup %5036  ;;  %v1441_v15 = vmul.f32 %v5035_v14, %v5730_v48 }
 0x3b2   : > { %v1443_v11 = vmul.f32 %v5037_v34, %v5726_v45  ;;  %v1959_v45 = vsel %vm7194_vm2, %v1939_v58, 0 }
 0x3b3   : > { %v5039_v43 = vpop.eup %5038 }
 0x3b4   : > { %v1707_v55 = vpop.permute.xlu1 %1706  ;;  %v1442_v35 = vmul.f32 %v5039_v43, %v5762_v30  ;;  %v1460_v40 = vpack.c.bf16 %v1444_v53, %v1443_v11 }
 0x3b6   : > { %v1459_v13 = vpack.c.bf16 %v1442_v35, %v1441_v15 }
 0x3b8   : > { %4471 = vmatprep.mubr.msk.bf16.mxu0 %vm1188_vm3, %v1459_v13  ;;  %v1941_v4 = vpop.permute.xlu1 %1940 }
 0x3b9   : > { %4472 = vmatmul.mubr.msk.bf16.gmra.mrb[68].mxu0 %vm1188_vm3, %v1460_v40  ;;  %v1962_v31 = vsel %vm7194_vm2, %v1941_v4, 0 }
 0x3ba   : > { %4499 = vmatprep.mubr.msk.bf16.mxu0 %vm7194_vm2, %v1701_v18 }
 0x3bc   : > { %v1816_v41 = vpop.permute.xlu1 %1815 }
 0x3bd   : > { %4516 = vmatmul.mubr.msk.bf16.vlgmr.msra.gmra.mrb[48].mxu1 %vm7194_vm2, %v1816_v41 }
 0x3be   : > { %4540 = vmatpush3.bf16.msra.mxu1 %v2316_v63 }
 0x3c0   : > { %v1818_v37 = vpop.permute.xlu1 %1817 }
 0x3c1   : > { %4500 = vmatmul.mubr.msk.bf16.vlgmr.msra.gmra.mrb[72].mxu0 %vm7194_vm2, %v1703_v28  ;;  %4519 = vmatprep.mubr.msk.bf16.mxu1 %vm7194_vm2, %v1818_v37 }
 0x3c2   : > { %4524 = vmatpush3.bf16.xpose.msra.mxu0 %v1959_v45  ;;  %4503 = vmatprep.mubr.msk.bf16.mxu0 %vm7194_vm2, %v1705_v1 }
 0x3c3   : > { %4746 = vmatprep.subr.msk.bf16.mxu0 %vm7194_vm2, %v1941_v4 }
 0x3c4   : > { %v1945_v48 = vpop.permute.xlu1 %1944 }
 0x3c5   : > { %4520 = vmatmul.mubr.msk.bf16.gmra.mrb[52].mxu1 %vm7194_vm2, %v1820_v39  ;;  %v1968_v36 = vsel %vm7194_vm2, %v1945_v48, 0 }
 0x3c8   : > { %v1929_v30 = vpop.permute.xlu1 %1928 }
 0x3c9   : > { %4504 = vmatmul.mubr.msk.bf16.gmra.mrb[76].mxu0 %vm7194_vm2, %v1707_v55 }
 0x3ca   : > { %4526 = vmatpush3.bf16.xpose.msra.mxu0 %v1962_v31  ;;  %4531 = vmatprep.mubr.msk.bf16.mxu0 %vm7194_vm2, %v1927_v38 }
 0x3cb   : > { %4747 = vmatprep.subr.msk.bf16.mxu0 %vm7194_vm2, %v1943_v9 }
 0x3cc   : > { %v1933_v52 = vpop.permute.xlu1 %1932 }
 0x3d0   : > { %v2318_v2 = vpop.permute.xlu1 %2317 }
 0x3d1   : > { %4541 = vmatprep.subr.bf16.mxu1 %v2318_v2 }
 0x3d2   : > { %4528 = vmatpush3.bf16.xpose.msra.mxu0 %v1965_v5  ;;  %4542 = vmatpush3.bf16.msra.mxu1 %v2318_v2 }
 0x3d3   : > { %4748 = vmatprep.subr.msk.bf16.mxu0 %vm7194_vm2, %v1945_v48  ;;  %4543 = vmatprep.subr.bf16.mxu1 %v2320_v50 }
 0x3d4   : > { %v5885_v54 = vpop.permute.xlu1 %2408 }
 0x3d6   : > { %4544 = vmatpush3.bf16.msra.mxu1 %v2320_v50 }
 0x3d7   : > { %4545 = vmatprep.subr.bf16.mxu1 %v2322_v3 }
 0x3da   : > { %4530 = vmatpush3.bf16.xpose.msra.mxu0 %v1968_v36  ;;  %4546 = vmatpush3.bf16.msra.mxu1 %v2322_v3 }
 0x3db   : > { %4555 = vmatprep.subr.bf16.mxu1 %v5885_v54 }
 0x3e1   : > { %4532 = vmatmul.mubr.msk.bf16.vlgmr.msra.gmra.mrb[80].mxu0 %vm7194_vm2, %v1929_v30 }
 0x3e2   : > { %4535 = vmatprep.mubr.msk.bf16.mxu0 %vm7194_vm2, %v5861_v59 }
 0x3e9   : > { %4536 = vmatmul.mubr.msk.bf16.gmra.mrb[84].mxu0 %vm7194_vm2, %v1933_v52 }
 0x42d   : > { %v5892_v44 = vpop.f32.mrb[32].mxu1 }
 0x42e   : > { %v5894_v49 = vpop.f32.mrb[33].mxu1 }
 0x42f   : > { %v5896_v7 = vpop.f32.mrb[34].mxu1 }
 0x430   : > { %v5898_v42 = vpop.f32.mrb[35].mxu1 }
 0x435   : > { %v5900_v16 = vpop.f32.mrb[36].mxu1 }
 0x436   : > { %v5902_v20 = vpop.f32.mrb[37].mxu1 }
 0x437   : > { %v5904_v6 = vpop.f32.mrb[38].mxu1 }
 0x438   : > { %v5906_v23 = vpop.f32.mrb[39].mxu1 }
 0x43d   : > { %v5908_v0 = vpop.f32.mrb[40].mxu1 }
 0x43e   : > { %7220 = vst [vmem:[#allocation2_spill] sm:$0xff] %v5908_v0  ;;  %v5910_v33 = vpop.f32.mrb[41].mxu1 }
 0x43f   : > { %7221 = vst [vmem:[#allocation6_spill] sm:$0xff] %v5910_v33  ;;  %v5912_v26 = vpop.f32.mrb[42].mxu1 }
 0x440   : > { %7222 = vst [vmem:[#allocation5_spill] sm:$0xff] %v5912_v26  ;;  %v5914_v51 = vpop.f32.mrb[43].mxu1 }
 0x441   : > { %7223 = vst [vmem:[#allocation11_spill] sm:$0xff] %v5914_v51 }
 0x44b   : > { %v5916_v24 = vpop.f32.mrb[64].mxu0 }
 0x44c   : > { %v5918_v29 = vpop.f32.mrb[65].mxu0 }
 0x44d   : > { %v5920_v10 = vpop.f32.mrb[66].mxu0 }
 0x44e   : > { %v5922_v12 = vpop.f32.mrb[67].mxu0 }
 0x450   : > { %v5924_v18 = vpop.f32.mrb[44].mxu1 }
 0x451   : > { %7224 = vst [vmem:[#allocation8_spill] sm:$0xff] %v5924_v18  ;;  %v5926_v62 = vpop.f32.mrb[45].mxu1 }
 0x452   : > { %7225 = vst [vmem:[#allocation10_spill] sm:$0xff] %v5926_v62  ;;  %v5928_v21 = vpop.f32.mrb[46].mxu1 }
 0x453   : > { %7226 = vst [vmem:[#allocation7_spill] sm:$0xff] %v5928_v21  ;;  %v5930_v47 = vpop.f32.mrb[47].mxu1 }
 0x454   : > { %7227 = vst [vmem:[#allocation9_spill] sm:$0xff] %v5930_v47 }
 0x48c   : > { %v5932_v1 = vpop.f32.mrb[68].mxu0 }
 0x48d   : > { %7228 = vst [vmem:[#allocation12_spill] sm:$0xff] %v5932_v1  ;;  %v5934_v46 = vpop.f32.mrb[69].mxu0 }
 0x48e   : > { %7229 = vst [vmem:[#allocation13_spill] sm:$0xff] %v5934_v46  ;;  %v5936_v17 = vpop.f32.mrb[70].mxu0 }
 0x48f   : > { %v5938_v60 = vpop.f32.mrb[71].mxu0 }
 0x490   : > { %7230 = vst [vmem:[#allocation14_spill] sm:$0xff] %v5938_v60  ;;  %v5940_v56 = vpop.f32.mrb[48].mxu1 }
 0x491   : > { %v5942_v8 = vpop.f32.mrb[49].mxu1  ;;  %v2065_v9 = vsel %vm1188_vm3, %v5940_v56, -inf }
 0x492   : > { %2066 = vmax.xlane.f32.xlu0 %v2065_v9  ;;  %v5946_v39 = vpop.f32.mrb[50].mxu1  ;;  %v2059_v27 = vsel %vm1188_vm3, %v5942_v8, -inf }
 0x493   : > { %v5948_v38 = vpop.f32.mrb[51].mxu1  ;;  %v2068_v59 = vsel %vm1188_vm3, %v5946_v39, -inf }
 0x494   : > { %v5952_v63 = vpop.f32.mrb[72].mxu0  ;;  %2069 = vmax.xlane.f32.xlu1 %v2068_v59  ;;  %v2062_v58 = vsel %vm1188_vm3, %v5948_v38, -inf }
 0x495   : > { %v5954_v19 = vpop.f32.mrb[73].mxu0  ;;  %v2041_v37 = vsel %vm1188_vm3, %v5952_v63, -inf }
 0x496   : > { %v5958_v28 = vpop.f32.mrb[74].mxu0  ;;  %2060 = vmax.xlane.f32.xlu0 %v2059_v27  ;;  %v2035_v48 = vsel %vm1188_vm3, %v5954_v19, -inf }
 0x497   : > { %v5960_v61 = vpop.f32.mrb[75].mxu0  ;;  %v2044_v31 = vsel %vm1188_vm3, %v5958_v28, -inf }
 0x498   : > { %2063 = vmax.xlane.f32.xlu1 %v2062_v58  ;;  %v5964_v14 = vpop.f32.mrb[52].mxu1  ;;  %v2038_v45 = vsel %vm1188_vm3, %v5960_v61, -inf }
 0x499   : > { %v5966_v34 = vpop.f32.mrb[53].mxu1  ;;  %v2077_v43 = vsel %vm1188_vm3, %v5964_v14, -inf }
 0x49a   : > { %2078 = vmax.xlane.f32.xlu0 %v2077_v43  ;;  %v5970_v53 = vpop.f32.mrb[54].mxu1  ;;  %v2071_v13 = vsel %vm1188_vm3, %v5966_v34, -inf }
 0x49b   : > { %v5972_v55 = vpop.f32.mrb[55].mxu1  ;;  %v2080_v15 = vsel %vm1188_vm3, %v5970_v53, -inf }
 0x49c   : > { %v5976_v35 = vpop.f32.mrb[76].mxu0  ;;  %2081 = vmax.xlane.f32.xlu1 %v2080_v15  ;;  %v2074_v41 = vsel %vm1188_vm3, %v5972_v55, -inf }
 0x49d   : > { %v5978_v11 = vpop.f32.mrb[77].mxu0  ;;  %v2053_v50 = vsel %vm1188_vm3, %v5976_v35, -inf }
 0x49e   : > { %v5982_v40 = vpop.f32.mrb[78].mxu0  ;;  %2072 = vmax.xlane.f32.xlu0 %v2071_v13  ;;  %v2047_v2 = vsel %vm1188_vm3, %v5978_v11, -inf }
 0x49f   : > { %v5984_v4 = vpop.f32.mrb[79].mxu0  ;;  %v2056_v30 = vsel %vm1188_vm3, %v5982_v40, -inf }
 0x4a0   : > { %2075 = vmax.xlane.f32.xlu1 %v2074_v41  ;;  %v2050_v52 = vsel %vm1188_vm3, %v5984_v4, -inf }
 0x4a2   : > { %2042 = vmax.xlane.f32.xlu0 %v2041_v37 }
 0x4a4   : > { %2039 = vmax.xlane.f32.xlu1 %v2038_v45 }
 0x4a6   : > { %2036 = vmax.xlane.f32.xlu0 %v2035_v48 }
 0x4a8   : > { %2057 = vmax.xlane.f32.xlu1 %v2056_v30 }
 0x4aa   : > { %2045 = vmax.xlane.f32.xlu0 %v2044_v31 }
 0x4ac   : > { %2051 = vmax.xlane.f32.xlu1 %v2050_v52  ;;  %v7231_v52 = vld [vmem:[#allocation3_spill] sm:$0xff] }
 0x4ae   : > { %2054 = vmax.xlane.f32.xlu0 %v2053_v50  ;;  %v7232_v50 = vld [vmem:[#allocation4_spill] sm:$0xff] }
 0x4b2   : > { %2048 = vmax.xlane.f32.xlu0 %v2047_v2  ;;  %v6040_v2 = vpop.permute.xlu1 %2410 }
 0x4b4   : > { %v6004_v5 = vpop.f32.mrb[80].mxu0 }
 0x4b5   : > { %v6006_v3 = vpop.f32.mrb[81].mxu0  ;;  %v2089_v36 = vsel %vm1188_vm3, %v6004_v5, -inf }
 0x4b6   : > { %v6010_v9 = vpop.f32.mrb[82].mxu0  ;;  %2090 = vmax.xlane.f32.xlu0 %v2089_v36  ;;  %v2083_v58 = vsel %vm1188_vm3, %v6006_v3, -inf }
 0x4b7   : > { %v6012_v59 = vpop.f32.mrb[83].mxu0  ;;  %v2092_v27 = vsel %vm1188_vm3, %v6010_v9, -inf }
 0x4b8   : > { %2093 = vmax.xlane.f32.xlu1 %v2092_v27  ;;  %v2086_v43 = vsel %vm1188_vm3, %v6012_v59, -inf }
 0x4ba   : > { %2084 = vmax.xlane.f32.xlu0 %v2083_v58 }
 0x4bc   : > { %2087 = vmax.xlane.f32.xlu1 %v2086_v43  ;;  %v6020_v15 = vpop.f32.mrb[84].mxu0 }
 0x4bd   : > { %v6022_v13 = vpop.f32.mrb[85].mxu0  ;;  %v2101_v41 = vsel %vm1188_vm3, %v6020_v15, -inf }
 0x4be   : > { %v6026_v37 = vpop.f32.mrb[86].mxu0  ;;  %2102 = vmax.xlane.f32.xlu0 %v2101_v41  ;;  %v2095_v30 = vsel %vm1188_vm3, %v6022_v13, -inf }
 0x4bf   : > { %v6028_v45 = vpop.f32.mrb[87].mxu0  ;;  %v2104_v48 = vsel %vm1188_vm3, %v6026_v37, -inf }
 0x4c0   : > { %2105 = vmax.xlane.f32.xlu1 %v2104_v48  ;;  %v2098_v31 = vsel %vm1188_vm3, %v6028_v45, -inf }
 0x4c2   : > { %2096 = vmax.xlane.f32.xlu0 %v2095_v30 }
 0x4c4   : > { %2099 = vmax.xlane.f32.xlu1 %v2098_v31 }
 0x4d5   : > { %2414 = vrot.lane.b32.xlu1 %v7231_v52, %s5145_s29 }
 0x4d8   : > { %2412 = vrot.lane.b32.xlu0 %v7232_v50, %s5145_s29 }
 0x51f   : > { %v2067_v36 = vpop.xlane.xlu0 %2066 }
 0x520   : > { %v2117_v27 = vsub.f32 %v5940_v56, %v2067_v36 }
 0x521   : > { %v2070_v58 = vpop.xlane.xlu1 %2069 }
 0x522   : > { %v2151_v43 = vmul.f32 1.442695, %v2117_v27  ;;  %v2118_v41 = vsub.f32 %v5946_v39, %v2070_v58 }
 0x523   : > { %v2061_v48 = vpop.xlane.xlu0 %2060 }
 0x524   : > { %5040 = vpow2.f32 %v2151_v43  ;;  %v2115_v30 = vsub.f32 %v5942_v8, %v2061_v48  ;;  %v2153_v18 = vmul.f32 1.442695, %v2118_v41 }
 0x525   : > { %v2064_v31 = vpop.xlane.xlu1 %2063 }
 0x526   : > { %v2147_v62 = vmul.f32 1.442695, %v2115_v30  ;;  %v2116_v52 = vsub.f32 %v5948_v38, %v2064_v31 }
 0x527   : > { %v2079_v47 = vpop.xlane.xlu0 %2078 }
 0x528   : > { %5042 = vpow2.f32 %v2147_v62  ;;  %v2121_v50 = vsub.f32 %v5964_v14, %v2079_v47  ;;  %v2149_v56 = vmul.f32 1.442695, %v2116_v52 }
 0x529   : > { %v2082_v21 = vpop.xlane.xlu1 %2081  ;;  %5044 = vpow2.f32 %v2153_v18 }
 0x52a   : > { %v2159_v36 = vmul.f32 1.442695, %v2121_v50  ;;  %v2122_v27 = vsub.f32 %v5970_v53, %v2082_v21 }
 0x52b   : > { %v2073_v39 = vpop.xlane.xlu0 %2072 }
 0x52c   : > { %5046 = vpow2.f32 %v2159_v36  ;;  %v2119_v58 = vsub.f32 %v5966_v34, %v2073_v39  ;;  %v2161_v8 = vmul.f32 1.442695, %v2122_v27 }
 0x52d   : > { %v2076_v43 = vpop.xlane.xlu1 %2075  ;;  %5048 = vpow2.f32 %v2149_v56 }
 0x52e   : > { %v6049_v41 = vpop.eup %5040  ;;  %v2155_v38 = vmul.f32 1.442695, %v2119_v58  ;;  %v2120_v62 = vsub.f32 %v5972_v55, %v2076_v43 }
 0x52f   : > { %v2043_v48 = vpop.xlane.xlu0 %2042  ;;  %v2209_v18 = vsel %vm1188_vm3, %v6049_v41, 0.0 }
 0x530   : > { %5050 = vpow2.f32 %v2155_v38  ;;  %v2157_v47 = vmul.f32 1.442695, %v2120_v62  ;;  %v2109_v21 = vsub.f32 %v5952_v63, %v2043_v48  ;;  %2210 = vadd.xlane.f32.xlu1 %v2209_v18 }
 0x531   : > { %5052 = vpow2.f32 %v2161_v8  ;;  %v2040_v14 = vpop.xlane.xlu1 %2039 }
 0x532   : > { %v6055_v34 = vpop.eup %5042  ;;  %5054 = vpow2.f32 %v2157_v47  ;;  %v2135_v53 = vmul.f32 1.442695, %v2109_v21  ;;  %v2108_v63 = vsub.f32 %v5960_v61, %v2040_v14 }
 0x533   : > { %v2037_v30 = vpop.xlane.xlu0 %2036  ;;  %v2203_v31 = vsel %vm1188_vm3, %v6055_v34, 0.0  ;;  %v6059_v55 = vpop.eup %5044 }
 0x534   : > { %v2107_v52 = vsub.f32 %v5954_v19, %v2037_v30  ;;  %2204 = vadd.xlane.f32.xlu1 %v2203_v31  ;;  %5056 = vpow2.f32 %v2135_v53  ;;  %v2212_v58 = vsel %vm1188_vm3, %v6059_v55, 0.0  ;;  %v2133_v38 = vmul.f32 1.442695, %v2108_v63 }
 0x535   : > { %v2058_v50 = vpop.xlane.xlu1 %2057 }
 0x536   : > { %v6062_v56 = vpop.eup %5046  ;;  %v2131_v36 = vmul.f32 1.442695, %v2107_v52  ;;  %v2114_v61 = vsub.f32 %v5982_v40, %v2058_v50 }
 0x537   : > { %v2046_v27 = vpop.xlane.xlu0 %2045  ;;  %v2221_v39 = vsel %vm1188_vm3, %v6062_v56, 0.0  ;;  %v6069_v8 = vpop.eup %5048 }
 0x538   : > { %v2110_v43 = vsub.f32 %v5958_v28, %v2046_v27  ;;  %2222 = vadd.xlane.f32.xlu0 %v2221_v39  ;;  %2213 = vadd.xlane.f32.xlu1 %v2212_v58  ;;  %5058 = vpow2.f32 %v2131_v36  ;;  %v2206_v14 = vsel %vm1188_vm3, %v6069_v8, 0.0  ;;  %v2145_v40 = vmul.f32 1.442695, %v2114_v61 }
 0x539   : > { %v2052_v18 = vpop.xlane.xlu1 %2051 }
 0x53a   : > { %v6072_v19 = vpop.eup %5050  ;;  %v2137_v62 = vmul.f32 1.442695, %v2110_v43  ;;  %v2112_v30 = vsub.f32 %v5984_v4, %v2052_v18 }
 0x53b   : > { %v6075_v48 = vpop.eup %5052  ;;  %v2055_v47 = vpop.xlane.xlu0 %2054  ;;  %v2215_v21 = vsel %vm1188_vm3, %v6072_v19, 0.0 }
 0x53c   : > { %v6081_v28 = vpop.eup %5054  ;;  %5060 = vpow2.f32 %v2137_v62  ;;  %v2113_v53 = vsub.f32 %v5976_v35, %v2055_v47  ;;  %2216 = vadd.xlane.f32.xlu0 %v2215_v21  ;;  %2207 = vadd.xlane.f32.xlu1 %v2206_v14  ;;  %v2224_v50 = vsel %vm1188_vm3, %v6075_v48, 0.0  ;;  %v2141_v35 = vmul.f32 1.442695, %v2112_v30 }
 0x53d   : > { %5062 = vpow2.f32 %v2133_v38  ;;  %v2218_v63 = vsel %vm1188_vm3, %v6081_v28, 0.0 }
 0x53e   : > { %v2143_v31 = vmul.f32 1.442695, %v2113_v53  ;;  %v6089_v36 = vpop.eup %5056 }
 0x53f   : > { %v2049_v52 = vpop.xlane.xlu0 %2048  ;;  %v2185_v4 = vsel %vm1188_vm3, %v6089_v36, 0.0 }
 0x540   : > { %5064 = vpow2.f32 %v2143_v31  ;;  %v2111_v27 = vsub.f32 %v5978_v11, %v2049_v52  ;;  %2225 = vadd.xlane.f32.xlu0 %v2224_v50  ;;  %2219 = vadd.xlane.f32.xlu1 %v2218_v63 }
 0x541   : > { %5066 = vpow2.f32 %v2145_v40 }
 0x542   : > { %v2139_v39 = vmul.f32 1.442695, %v2111_v27  ;;  %v6094_v43 = vpop.eup %5058 }
 0x543   : > { %v2091_v58 = vpop.xlane.xlu0 %2090  ;;  %v2179_v21 = vsel %vm1188_vm3, %v6094_v43, 0.0 }
 0x544   : > { %5068 = vpow2.f32 %v2139_v39  ;;  %v2125_v38 = vsub.f32 %v6004_v5, %v2091_v58  ;;  %2186 = vadd.xlane.f32.xlu0 %v2185_v4 }
 0x545   : > { %v2094_v61 = vpop.xlane.xlu1 %2093  ;;  %5070 = vpow2.f32 %v2141_v35 }
 0x546   : > { %v6097_v62 = vpop.eup %5060  ;;  %v2167_v11 = vmul.f32 1.442695, %v2125_v38  ;;  %v2126_v18 = vsub.f32 %v6010_v9, %v2094_v61 }
 0x547   : > { %v2085_v47 = vpop.xlane.xlu0 %2084  ;;  %v2188_v14 = vsel %vm1188_vm3, %v6097_v62, 0.0  ;;  %v6104_v53 = vpop.eup %5062 }
 0x548   : > { %5072 = vpow2.f32 %v2167_v11  ;;  %v2169_v40 = vmul.f32 1.442695, %v2126_v18  ;;  %v2123_v5 = vsub.f32 %v6006_v3, %v2085_v47  ;;  %2180 = vadd.xlane.f32.xlu0 %v2179_v21  ;;  %2189 = vadd.xlane.f32.xlu1 %v2188_v14  ;;  %v2182_v27 = vsel %vm1188_vm3, %v6104_v53, 0.0 }
 0x549   : > { %v2088_v30 = vpop.xlane.xlu1 %2087 }
 0x54a   : > { %v6107_v31 = vpop.eup %5064  ;;  %5074 = vpow2.f32 %v2169_v40  ;;  %v2163_v9 = vmul.f32 1.442695, %v2123_v5  ;;  %v2124_v52 = vsub.f32 %v6012_v59, %v2088_v30 }
 0x54b   : > { %v2103_v50 = vpop.xlane.xlu0 %2102  ;;  %v2197_v63 = vsel %vm1188_vm3, %v6107_v31, 0.0  ;;  %v6114_v35 = vpop.eup %5066 }
 0x54c   : > { %5076 = vpow2.f32 %v2163_v9  ;;  %v2165_v3 = vmul.f32 1.442695, %v2124_v52  ;;  %v2129_v39 = vsub.f32 %v6020_v15, %v2103_v50  ;;  %2198 = vadd.xlane.f32.xlu0 %v2197_v63  ;;  %2183 = vadd.xlane.f32.xlu1 %v2182_v27  ;;  %v2200_v18 = vsel %vm1188_vm3, %v6114_v35, 0.0 }
 0x54d   : > { %v2106_v58 = vpop.xlane.xlu1 %2105 }
 0x54e   : > { %v6117_v4 = vpop.eup %5068  ;;  %5078 = vpow2.f32 %v2165_v3  ;;  %v2175_v59 = vmul.f32 1.442695, %v2129_v39  ;;  %v2130_v38 = vsub.f32 %v6026_v37, %v2106_v58 }
 0x54f   : > { %v2097_v61 = vpop.xlane.xlu0 %2096  ;;  %v2191_v11 = vsel %vm1188_vm3, %v6117_v4, 0.0  ;;  %v6124_v47 = vpop.eup %5070 }
 0x550   : > { %5080 = vpow2.f32 %v2175_v59  ;;  %v2177_v15 = vmul.f32 1.442695, %v2130_v38  ;;  %v2127_v21 = vsub.f32 %v6022_v13, %v2097_v61  ;;  %2192 = vadd.xlane.f32.xlu0 %v2191_v11  ;;  %2201 = vadd.xlane.f32.xlu1 %v2200_v18  ;;  %v2194_v9 = vsel %vm1188_vm3, %v6124_v47, 0.0 }
 0x551   : > { %v2100_v14 = vpop.xlane.xlu1 %2099 }
 0x552   : > { %v6127_v40 = vpop.eup %5072  ;;  %5082 = vpow2.f32 %v2177_v15  ;;  %v2171_v37 = vmul.f32 1.442695, %v2127_v21  ;;  %v2128_v5 = vsub.f32 %v6028_v45, %v2100_v14 }
 0x553   : > { %v2233_v30 = vsel %vm1188_vm3, %v6127_v40, 0.0 }
 0x554   : > { %v6134_v52 = vpop.eup %5074  ;;  %5084 = vpow2.f32 %v2171_v37  ;;  %v2173_v50 = vmul.f32 1.442695, %v2128_v5  ;;  %2234 = vadd.xlane.f32.xlu0 %v2233_v30  ;;  %2195 = vadd.xlane.f32.xlu1 %v2194_v9  ;;  %v6172_v37 = vpop.permute.xlu0 %2412 }
 0x555   : > { %v2236_v45 = vsel %vm1188_vm3, %v6134_v52, 0.0  ;;  %v6170_v21 = vpop.permute.xlu1 %2414 }
 0x556   : > { %v6136_v13 = vpop.eup %5076  ;;  %5086 = vpow2.f32 %v2173_v50 }
 0x557   : > { %v2227_v63 = vsel %vm1188_vm3, %v6136_v13, 0.0 }
 0x558   : > { %v6142_v27 = vpop.eup %5078  ;;  %2228 = vadd.xlane.f32.xlu1 %v2227_v63  ;;  %2237 = vadd.xlane.f32.xlu0 %v2236_v45 }
 0x559   : > { %v2230_v58 = vsel %vm1188_vm3, %v6142_v27, 0.0 }
 0x55a   : > { %v6144_v3 = vpop.eup %5080 }
 0x55b   : > { %v2245_v39 = vsel %vm1188_vm3, %v6144_v3, 0.0 }
 0x55c   : > { %v6150_v59 = vpop.eup %5082  ;;  %2246 = vadd.xlane.f32.xlu1 %v2245_v39  ;;  %2231 = vadd.xlane.f32.xlu0 %v2230_v58 }
 0x55d   : > { %v2248_v11 = vsel %vm1188_vm3, %v6150_v59, 0.0 }
 0x55e   : > { %v6152_v38 = vpop.eup %5084 }
 0x55f   : > { %v2239_v61 = vsel %vm1188_vm3, %v6152_v38, 0.0 }
 0x560   : > { %v6158_v18 = vpop.eup %5086  ;;  %2240 = vadd.xlane.f32.xlu1 %v2239_v61  ;;  %2249 = vadd.xlane.f32.xlu0 %v2248_v11 }
 0x561   : > { %v2242_v15 = vsel %vm1188_vm3, %v6158_v18, 0.0 }
 0x564   : > { %2243 = vadd.xlane.f32.xlu0 %v2242_v15 }
 0x571   : > { %2503 = vrot.lane.b32.xlu1 %v7213_v22, %s5145_s29 }
 0x575   : > { %2505 = vrot.lane.b32.xlu1 %v7215_v32, %s5145_s29 }
 0x579   : > { %2507 = vrot.lane.b32.xlu1 %v7217_v57, %s5145_s29 }
 0x57a   : > { %2501 = vrot.lane.b32.xlu0 %v7212_v25, %s5145_s29 }
 0x5bd   : > { %v2211_v14 = vpop.xlane.xlu1 %2210 }
 0x5c1   : > { %v2205_v5 = vpop.xlane.xlu1 %2204 }
 0x5c5   : > { %v6174_v30 = vpop.xlane.xlu0 %2222  ;;  %v2214_v9 = vpop.xlane.xlu1 %2213 }
 0x5c9   : > { %v2217_v50 = vpop.xlane.xlu0 %2216  ;;  %v2208_v22 = vpop.xlane.xlu1 %2207 }
 0x5cd   : > { %v2226_v63 = vpop.xlane.xlu0 %2225  ;;  %v2220_v45 = vpop.xlane.xlu1 %2219 }
 0x5d1   : > { %v2187_v32 = vpop.xlane.xlu0 %2186 }
 0x5d5   : > { %v2181_v39 = vpop.xlane.xlu0 %2180  ;;  %v2190_v58 = vpop.xlane.xlu1 %2189 }
 0x5d6   : > { %5088 = vrcp.f32 %v2190_v58 }
 0x5d7   : > { %5090 = vrcp.f32 %v2181_v39 }
 0x5d8   : > { %5092 = vrcp.f32 %v2187_v32 }
 0x5d9   : > { %v2199_v57 = vpop.xlane.xlu0 %2198  ;;  %v2184_v25 = vpop.xlane.xlu1 %2183 }
 0x5da   : > { %5094 = vrcp.f32 %v2184_v25 }
 0x5db   : > { %5096 = vrcp.f32 %v2205_v5 }
 0x5dc   : > { %5098 = vrcp.f32 %v2208_v22 }
 0x5dd   : > { %v2193_v61 = vpop.xlane.xlu0 %2192  ;;  %v2202_v11 = vpop.xlane.xlu1 %2201 }
 0x5de   : > { %5100 = vrcp.f32 %v2202_v11 }
 0x5df   : > { %5102 = vrcp.f32 %v2193_v61 }
 0x5e0   : > { %v5089_v51 = vpop.eup %5088  ;;  %5104 = vrcp.f32 %v2199_v57 }
 0x5e1   : > { %v6176_v15 = vpop.xlane.xlu0 %2234  ;;  %v2196_v33 = vpop.xlane.xlu1 %2195  ;;  %v2278_v39 = vmul.f32 %v5089_v51, %v6097_v62 }
 0x5e2   : > { %v5091_v0 = vpop.eup %5090  ;;  %5106 = vrcp.f32 %v2196_v33 }
 0x5e3   : > { %v5093_v26 = vpop.eup %5092  ;;  %5108 = vrcp.f32 %v2211_v14  ;;  %v2275_v25 = vmul.f32 %v5091_v0, %v6094_v43 }
 0x5e4   : > { %v5095_v58 = vpop.eup %5094  ;;  %5110 = vrcp.f32 %v2214_v9  ;;  %v2277_v22 = vmul.f32 %v5093_v26, %v6089_v36 }
 0x5e5   : > { %v2238_v46 = vpop.xlane.xlu0 %2237  ;;  %v2229_v32 = vpop.xlane.xlu1 %2228  ;;  %v2276_v5 = vmul.f32 %v5095_v58, %v6104_v53 }
 0x5e6   : > { %v5097_v61 = vpop.eup %5096  ;;  %5112 = vrcp.f32 %v2229_v32  ;;  %v2300_v33 = vpack.c.bf16 %v2278_v39, %v2277_v22 }
 0x5e7   : > { %v2299_v11 = vpack.c.bf16 %v2276_v5, %v2275_v25  ;;  %v5099_v57 = vpop.eup %5098  ;;  %5114 = vrcp.f32 %v2220_v45  ;;  %v2283_v58 = vmul.f32 %v5097_v61, %v6055_v34 }
 0x5e8   : > { %v5101_v51 = vpop.eup %5100  ;;  %v2284_v9 = vmul.f32 %v5099_v57, %v6069_v8 }
 0x5e9   : > { %v2232_v60 = vpop.xlane.xlu0 %2231  ;;  %v6182_v1 = vpop.xlane.xlu1 %2246  ;;  %4547 = vmatprep.mubr.msk.bf16.mxu1 %vm1188_vm3, %v2299_v11  ;;  %v2282_v53 = vmul.f32 %v5101_v51, %v6114_v35 }
 0x5ea   : > { %5116 = vrcp.f32 %v2232_v60  ;;  %v5103_v62 = vpop.eup %5102  ;;  %4548 = vmatmul.mubr.msk.bf16.vlgmr.msra.gmra.mrb[56].mxu1 %vm1188_vm3, %v2300_v33  ;;  %v2303_v8 = vpack.c.bf16 %v2284_v9, %v2283_v58 }
 0x5eb   : > { %5118 = vrcp.f32 %v2217_v50  ;;  %v5105_v0 = vpop.eup %5104  ;;  %4556 = vmatpush3.bf16.msra.mxu1 %v5885_v54  ;;  %v2279_v14 = vmul.f32 %v5103_v62, %v6117_v4 }
 0x5ec   : > { %v5107_v26 = vpop.eup %5106  ;;  %4557 = vmatprep.subr.bf16.mxu1 %v6040_v2  ;;  %v2281_v50 = vmul.f32 %v5105_v0, %v6107_v31  ;;  %5120 = vrcp.f32 %v2226_v63 }
 0x5ed   : > { %v2250_v36 = vpop.xlane.xlu0 %2249  ;;  %v2241_v43 = vpop.xlane.xlu1 %2240  ;;  %v2280_v60 = vmul.f32 %v5107_v26, %v6124_v47  ;;  %5122 = vrcp.f32 %v6174_v30 }
 0x5ee   : > { %v5109_v45 = vpop.eup %5108  ;;  %v2302_v35 = vpack.c.bf16 %v2282_v53, %v2281_v50  ;;  %5124 = vrcp.f32 %v2238_v46 }
 0x5ef   : > { %4558 = vmatpush3.bf16.msra.mxu1 %v6040_v2  ;;  %v2301_v54 = vpack.c.bf16 %v2280_v60, %v2279_v14  ;;  %v5111_v39 = vpop.eup %5110 }
 0x5f0   : > { %4559 = vmatprep.subr.bf16.mxu1 %v6172_v37  ;;  %v5113_v25 = vpop.eup %5112  ;;  %v2286_v47 = vmul.f32 %v5111_v39, %v6059_v55 }
 0x5f1   : > { %v2244_v32 = vpop.xlane.xlu0 %2243  ;;  %4551 = vmatprep.mubr.msk.bf16.mxu1 %vm1188_vm3, %v2301_v54  ;;  %v5115_v4 = vpop.eup %5114  ;;  %v2291_v63 = vmul.f32 %v5113_v25, %v6136_v13 }
 0x5f2   : > { %v2504_v31 = vpop.permute.xlu1 %2503  ;;  %4552 = vmatmul.mubr.msk.bf16.gmra.mrb[60].mxu1 %vm1188_vm3, %v2302_v35  ;;  %5126 = vrcp.f32 %v2244_v32  ;;  %v2288_v5 = vmul.f32 %v5115_v4, %v6081_v28 }
 0x5f3   : > { %4560 = vmatpush3.bf16.msra.mxu1 %v6172_v37  ;;  %4563 = vmatprep.mubr.msk.bf16.mxu1 %vm1188_vm3, %v2303_v8  ;;  %5128 = vrcp.f32 %v6176_v15  ;;  %v2285_v37 = vmul.f32 %v5109_v45, %v6049_v41 }
 0x5f4   : > { %v5117_v2 = vpop.eup %5116  ;;  %4561 = vmatprep.subr.bf16.mxu1 %v6170_v21  ;;  %5130 = vrcp.f32 %v2241_v43 }
 0x5f5   : > { %v5119_v34 = vpop.eup %5118  ;;  %v2502_v30 = vpop.permute.xlu0 %2501  ;;  %v2292_v46 = vmul.f32 %v5117_v2, %v6142_v27  ;;  %v2304_v15 = vpack.c.bf16 %v2286_v47, %v2285_v37  ;;  %5132 = vrcp.f32 %v2250_v36 }
 0x5f6   : > { %4571 = vmatprep.subr.bf16.mxu0 %v2502_v30  ;;  %v2287_v55 = vmul.f32 %v5119_v34, %v6072_v19  ;;  %v2506_v61 = vpop.permute.xlu1 %2505  ;;  %v5121_v13 = vpop.eup %5120  ;;  %5134 = vrcp.f32 %v6182_v1 }
 0x5f7   : > { %4572 = vmatpush3.bf16.msra.mxu0 %v2502_v30  ;;  %v2307_v22 = vpack.c.bf16 %v2292_v46, %v2291_v63  ;;  %4562 = vmatpush3.bf16.msra.mxu1 %v6170_v21  ;;  %v5123_v28 = vpop.eup %5122  ;;  %v2290_v27 = vmul.f32 %v5121_v13, %v6075_v48 }
 0x5f8   : > { %4573 = vmatprep.subr.bf16.mxu0 %v2504_v31  ;;  %v2305_v11 = vpack.c.bf16 %v2288_v5, %v2287_v55  ;;  %v5125_v41 = vpop.eup %5124  ;;  %v2289_v33 = vmul.f32 %v5123_v28, %v6062_v56 }
 0x5f9   : > { %4579 = vmatprep.mubr.msk.bf16.mxu0 %vm1188_vm3, %v2307_v22  ;;  %v2294_v62 = vmul.f32 %v5125_v41, %v6134_v52 }
 0x5fa   : > { %4564 = vmatmul.mubr.msk.bf16.vlgmr.msra.gmra.mrb[64].mxu1 %vm1188_vm3, %v2304_v15  ;;  %v2508_v57 = vpop.permute.xlu1 %2507  ;;  %v2306_v0 = vpack.c.bf16 %v2290_v27, %v2289_v33 }
 0x5fb   : > { %4574 = vmatpush3.bf16.msra.mxu0 %v2504_v31  ;;  %4567 = vmatprep.mubr.msk.bf16.mxu1 %vm1188_vm3, %v2305_v11 }
 0x5fc   : > { %4575 = vmatprep.subr.bf16.mxu0 %v2506_v61  ;;  %v5127_v19 = vpop.eup %5126 }
 0x5fd   : > { %v5129_v21 = vpop.eup %5128  ;;  %v2296_v26 = vmul.f32 %v5127_v19, %v6158_v18 }
 0x5fe   : > { %v5131_v51 = vpop.eup %5130  ;;  %v2293_v36 = vmul.f32 %v5129_v21, %v6127_v40 }
 0x5ff   : > { %4576 = vmatpush3.bf16.msra.mxu0 %v2506_v61  ;;  %v2295_v1 = vmul.f32 %v5131_v51, %v6152_v38  ;;  %v5133_v43 = vpop.eup %5132 }
 0x600   : > { %4577 = vmatprep.subr.bf16.mxu0 %v2508_v57  ;;  %v2308_v48 = vpack.c.bf16 %v2294_v62, %v2293_v36  ;;  %v5135_v56 = vpop.eup %5134  ;;  %v2298_v52 = vmul.f32 %v5133_v43, %v6150_v59 }
 0x601   : > { %v2309_v53 = vpack.c.bf16 %v2296_v26, %v2295_v1  ;;  %v2297_v14 = vmul.f32 %v5135_v56, %v6144_v3 }
 0x602   : > { %4568 = vmatmul.mubr.msk.bf16.gmra.mrb[68].mxu1 %vm1188_vm3, %v2306_v0 }
 0x603   : > { %4578 = vmatpush3.bf16.msra.mxu0 %v2508_v57  ;;  %v2310_v18 = vpack.c.bf16 %v2298_v52, %v2297_v14  ;;  %v2710_v57 = vlaneseq }
 0x605   : > { %v6238_v33 = vshrl.u32 %v2710_v57, 7 }
 0x606   : > { %4580 = vmatmul.mubr.msk.bf16.vlgmr.msra.gmra.mrb[88].mxu0 %vm1188_vm3, %v2308_v48 }
 0x607   : > { %4583 = vmatprep.mubr.msk.bf16.mxu0 %vm1188_vm3, %v2309_v53  ;;  %v2712_v51 = vadd.s32 8, %v6238_v33  ;;  %v2713_v62 = vadd.s32 16, %v6238_v33  ;;  %v2714_v0 = vadd.s32 24, %v6238_v33  ;;  %v2723_v26 = vand.u32 7, %v6238_v33  ;;  %v4938_v53 = vld [vmem:[%s7179_s7] sm:$0xff]  }
 0x608   : > { %v6245_v1 = vadd.s32 48, %v6238_v33  ;;  %v6248_v48 = vadd.s32 32, %v6238_v33  ;;  %v6251_v43 = vadd.s32 40, %v6238_v33  ;;  %4615 = vmatprep.subr.bf16.mxu1 %v4938_v53 }
 0x609   : > { %v2730_v36 = vand.u32 7, %v2712_v51  ;;  %v2737_v56 = vand.u32 7, %v2713_v62  ;;  %v2744_v52 = vand.u32 7, %v2714_v0  ;;  %vm6258_vm5 = vcmp.eq.s32.totalorder %v2723_v26, 7  ;;  %4616 = vmatpush3.bf16.msra.mxu1 %v4938_v53 }
 0x60b   : > { %vm6262_vm6 = vcmp.eq.s32.totalorder %v2730_v36, 7  ;;  %vm6275_vm7 = vcmp.eq.s32.totalorder %v2737_v56, 7  ;;  %vm6279_vm9 = vcmp.eq.s32.totalorder %v2744_v52, 0  ;;  %vm6290_vm10 = vcmp.eq.s32.totalorder %v2737_v56, 0 }
 0x60c   : > { %vm6294_vm11 = vcmp.eq.s32.totalorder %v2744_v52, 7  ;;  %vm6326_vm14 = vcmp.eq.s32.totalorder %v2730_v36, 0 }
 0x60e   : > { %4584 = vmatmul.mubr.msk.bf16.gmra.mrb[92].mxu0 %vm1188_vm3, %v2310_v18  ;;  %vm6375_vm3 = vcmp.eq.s32.totalorder %v2723_v26, 0 }
 0x6bd   : > { %v4549_v40 = vpop.f32.mrb[56].mxu1 }
 0x6be   : > { %v2373_v60 = vpop.f32.mrb[57].mxu1 }
 0x6bf   : > { %v4550_v9 = vpop.f32.mrb[58].mxu1 }
 0x6c0   : > { %v4771_v50 = vpack.i.bf16 %v4550_v9, %v4549_v40  ;;  %v2376_v38 = vpop.f32.mrb[59].mxu1 }
 0x6c1   : > { %v4766_v45 = vpack.i.bf16 %v2376_v38, %v2373_v60  ;;  %v2765_v38 = vand.u32 7, %v6245_v1 }
 0x6c2   : > { %4772 = vrot.lane.b32.xlu1 %v4771_v50, %s5146_s10 }
 0x6c3   : > { %4767 = vrot.lane.b32.xlu0 %v4766_v45, %s5146_s10  ;;  %vm6350_vm15 = vcmp.eq.s32.totalorder %v2765_v38, 7 }
 0x6c5   : > { %v4553_v54 = vpop.f32.mrb[60].mxu1 }
 0x6c6   : > { %v2389_v58 = vpop.f32.mrb[61].mxu1 }
 0x6c7   : > { %v4554_v39 = vpop.f32.mrb[62].mxu1 }
 0x6c8   : > { %v4781_v59 = vpack.i.bf16 %v4554_v39, %v4553_v54  ;;  %v2392_v32 = vpop.f32.mrb[63].mxu1  ;;  %v2758_v39 = vand.u32 7, %v6251_v43 }
 0x6c9   : > { %v4776_v3 = vpack.i.bf16 %v2392_v32, %v2389_v58  ;;  %v2751_v58 = vand.u32 7, %v6248_v48 }
 0x6ca   : > { %4782 = vrot.lane.b32.xlu1 %v4781_v59, %s5146_s10  ;;  %vm6369_vm0 = vcmp.eq.s32.totalorder %v2758_v39, 7 }
 0x6cb   : > { %4777 = vrot.lane.b32.xlu0 %v4776_v3, %s5146_s10  ;;  %vm6300_vm12 = vcmp.eq.s32.totalorder %v2751_v58, 7  ;;  %vm6434_vm2 = vcmp.eq.s32.totalorder %v2751_v58, 0  ;;  %v7266_v58 = vld [vmem:[#allocation6_spill] sm:$0xff] }
 0x6cd   : > { %v4565_v35 = vpop.f32.mrb[64].mxu1 }
 0x6ce   : > { %v2466_v25 = vpop.f32.mrb[65].mxu1 }
 0x6cf   : > { %v4566_v8 = vpop.f32.mrb[66].mxu1 }
 0x6d0   : > { %v4791_v4 = vpack.i.bf16 %v4566_v8, %v4565_v35  ;;  %v2469_v31 = vpop.f32.mrb[67].mxu1 }
 0x6d1   : > { %v4786_v2 = vpack.i.bf16 %v2469_v31, %v2466_v25 }
 0x6d2   : > { %4792 = vrot.lane.b32.xlu1 %v4791_v4, %s5146_s10 }
 0x6d3   : > { %4787 = vrot.lane.b32.xlu0 %v4786_v2, %s5146_s10 }
 0x6d5   : > { %v4569_v34 = vpop.f32.mrb[68].mxu1 }
 0x6d6   : > { %v2482_v47 = vpop.f32.mrb[69].mxu1 }
 0x6d7   : > { %v4570_v30 = vpop.f32.mrb[70].mxu1 }
 0x6d8   : > { %v4801_v63 = vpack.i.bf16 %v4570_v30, %v4569_v34  ;;  %v2485_v46 = vpop.f32.mrb[71].mxu1 }
 0x6d9   : > { %v4581_v5 = vpop.f32.mrb[88].mxu0  ;;  %v4796_v37 = vpack.i.bf16 %v2485_v46, %v2482_v47 }
 0x6da   : > { %v2559_v22 = vpop.f32.mrb[89].mxu0  ;;  %4802 = vrot.lane.b32.xlu1 %v4801_v63, %s5146_s10 }
 0x6db   : > { %v4582_v55 = vpop.f32.mrb[90].mxu0  ;;  %4797 = vrot.lane.b32.xlu0 %v4796_v37, %s5146_s10 }
 0x6dc   : > { %v4811_v15 = vpack.i.bf16 %v4582_v55, %v4581_v5  ;;  %v2562_v61 = vpop.f32.mrb[91].mxu0 }
 0x6dd   : > { %v4806_v13 = vpack.i.bf16 %v2562_v61, %v2559_v22 }
 0x6de   : > { %4812 = vrot.lane.b32.xlu1 %v4811_v15, %s5146_s10  ;;  %v4940_v15 = vld [vmem:[%s7179_s7 + $0xc] sm:$0xff]  }
 0x6df   : > { %4807 = vrot.lane.b32.xlu0 %v4806_v13, %s5146_s10  ;;  %4587 = vmatprep.subr.bf16.mxu0 %v4940_v15 }
 0x6e0   : > { %4588 = vmatpush3.bf16.msra.mxu0 %v4940_v15 }
 0x6e1   : > { %v4585_v11 = vpop.f32.mrb[92].mxu0 }
 0x6e2   : > { %v2575_v28 = vpop.f32.mrb[93].mxu0 }
 0x6e3   : > { %v4586_v41 = vpop.f32.mrb[94].mxu0 }
 0x6e4   : > { %v4821_v27 = vpack.i.bf16 %v4586_v41, %v4585_v11  ;;  %v2578_v19 = vpop.f32.mrb[95].mxu0 }
 0x6e5   : > { %v4816_v21 = vpack.i.bf16 %v2578_v19, %v2575_v28 }
 0x6e6   : > { %4822 = vrot.lane.b32.xlu1 %v4821_v27, %s5146_s10 }
 0x6e7   : > { %4817 = vrot.lane.b32.xlu0 %v4816_v21, %s5146_s10 }
 0x734   : > { %v4773_v14 = vpop.permute.xlu1 %4772 }
 0x735   : > { %v4775_v40 = vunpack.i.h.bf16 %v4773_v14  ;;  %v4774_v60 = vunpack.i.l.bf16 %v4773_v14  ;;  %v4768_v9 = vpop.permute.xlu0 %4767 }
 0x736   : > { %v4770_v45 = vunpack.i.h.bf16 %v4768_v9  ;;  %v4769_v54 = vunpack.i.l.bf16 %v4768_v9 }
 0x737   : > { %v6271_v59 = vsel %vm434_vm1, %v5896_v7, %v4775_v40  ;;  %v2688_v32 = vsel %vm434_vm1, %v5892_v44, %v4774_v60 }
 0x738   : > { %v2845_v25 = vrot.slane %v6271_v59, 1  ;;  %v2966_v8 = vrot.slane %v6271_v59, 7  ;;  %v2843_v4 = vrot.slane %v2688_v32, 1  ;;  %v2964_v31 = vrot.slane %v2688_v32, 7 }
 0x739   : > { %v2687_v7 = vsel %vm434_vm1, %v5898_v42, %v4770_v45  ;;  %v2686_v44 = vsel %vm434_vm1, %v5894_v49, %v4769_v54  ;;  %v4826_v2 = vpack.i.bf16 %v6271_v59, %v2688_v32  ;;  %v6307_v49 = vld [vmem:[%s7179_s7 + $0x8] ss:$0 sps:$4 sm:$0xff]  }
 0x73a   : > { %v2841_v47 = vrot.slane %v2687_v7, 1  ;;  %v2962_v30 = vrot.slane %v2687_v7, 7  ;;  %v2840_v63 = vrot.slane %v2686_v44, 1  ;;  %v2961_v46 = vrot.slane %v2686_v44, 7  ;;  %4750 = vmatprep.subr.msk.bf16.mxu1 %vm7195_vm13, %v6307_v49 }
 0x73b   : > { %4827 = vrot.lane.b32.xlu1 %v4826_v2, %s5147_s16  ;;  %v4831_v37 = vpack.i.bf16 %v2687_v7, %v2686_v44  ;;  %v2846_v22 = vsel %vm2839_vm4, %v2843_v4, %v2845_v25  ;;  %v6316_v55 = vsel %vm7196_vm8, %v2964_v31, %v2966_v8 }
 0x73c   : > { %v4783_v61 = vpop.permute.xlu1 %4782  ;;  %v2842_v13 = vsel %vm2839_vm4, %v2840_v63, %v2841_v47  ;;  %v2844_v11 = vsel %vm2839_vm4, %v2841_v47, %v2843_v4  ;;  %v6324_v28 = vsel %vm7196_vm8, %v2962_v30, %v2964_v31  ;;  %v6358_v60 = vsel %vm7196_vm8, %v2961_v46, %v2962_v30 }
 0x73d   : > { %4832 = vrot.lane.b32.xlu0 %v4831_v37, %s5147_s16  ;;  %v4785_v27 = vunpack.i.h.bf16 %v4783_v61  ;;  %v4784_v19 = vunpack.i.l.bf16 %v4783_v61  ;;  %v4778_v21 = vpop.permute.xlu0 %4777  ;;  %v2936_v57 = vsel %vm6258_vm5, 0.0, %v2842_v13  ;;  %v2937_v51 = vsel %vm6262_vm6, 0.0, %v2844_v11 }
 0x73e   : > { %v4780_v62 = vunpack.i.h.bf16 %v4778_v21  ;;  %v4779_v0 = vunpack.i.l.bf16 %v4778_v21  ;;  %v4836_v36 = vpack.i.bf16 %v2937_v51, %v2936_v57  ;;  %v6387_v31 = vsel %vm7196_vm8, 0.0, %v2961_v46 }
 0x73f   : > { %v6342_v56 = vsel %vm434_vm1, %v5904_v6, %v4785_v27  ;;  %v6346_v52 = vsel %vm434_vm1, %v5900_v16, %v4784_v19  ;;  %v6363_v6 = vld [vmem:[%s7179_s7 + $0x14] ss:$0 sps:$4 sm:$0xff]   ;;  %v2938_v44 = vsel %vm6275_vm7, 0.0, %v2846_v22 }
 0x740   : > { %v7197_v16 = vrot.slane %v6342_v56, 1  ;;  %v2851_v9 = vrot.slane %v6346_v52, 1  ;;  %v6381_v32 = vsel %vm434_vm1, %v5906_v23, %v4780_v62  ;;  %v2690_v4 = vsel %vm434_vm1, %v5902_v20, %v4779_v0  ;;  %4749 = vmatprep.subr.msk.bf16.mxu0 %vm7195_vm13, %v6363_v6 }
 0x741   : > { %4837 = vrot.lane.b32.xlu0 %v4836_v36, %s5148_s21  ;;  %v2849_v7 = vrot.slane %v6381_v32, 1  ;;  %v2847_v23 = vrot.slane %v2690_v4, 1  ;;  %v6398_v20 = vadd.s32 56, %v6238_v33  ;;  %v7199_v2 = vrot.slane %v6381_v32, 7 }
 0x742   : > { %v4841_v47 = vpack.i.bf16 %v6381_v32, %v2690_v4  ;;  %v2854_v30 = vsel %vm2839_vm4, %v2851_v9, %v7197_v16  ;;  %v2968_v46 = vrot.slane %v2690_v4, 7  ;;  %vm6440_vm13 = vcmp.eq.s32.totalorder %v2758_v39, 0  ;;  %v7265_v16 = vld [vmem:[#allocation11_spill] sm:$0xff] }
 0x743   : > { %v2848_v22 = vsel %vm2839_vm4, %v2845_v25, %v2847_v23  ;;  %v2850_v33 = vsel %vm2839_vm4, %v2847_v23, %v2849_v7  ;;  %v2852_v15 = vsel %vm2839_vm4, %v2849_v7, %v2851_v9  ;;  %v2772_v9 = vand.u32 7, %v6398_v20 }
 0x744   : > { %v4793_v37 = vpop.permute.xlu1 %4792  ;;  %v2939_v27 = vsel %vm6294_vm11, 0.0, %v2848_v22  ;;  %v2940_v19 = vsel %vm6300_vm12, 0.0, %v2850_v33  ;;  %v2941_v25 = vsel %vm6369_vm0, 0.0, %v2852_v15  ;;  %v6456_v48 = vsel %vm7196_vm8, %v2966_v8, %v2968_v46 }
 0x745   : > { %4842 = vrot.lane.b32.xlu0 %v4841_v47, %s5147_s16  ;;  %v4795_v61 = vunpack.i.h.bf16 %v4793_v37  ;;  %v4794_v13 = vunpack.i.l.bf16 %v4793_v37  ;;  %v4788_v11 = vpop.permute.xlu0 %4787  ;;  %v4846_v51 = vpack.i.bf16 %v2939_v27, %v2938_v44  ;;  %v4851_v36 = vpack.i.bf16 %v2941_v25, %v2940_v19 }
 0x746   : > { %v4790_v21 = vunpack.i.h.bf16 %v4788_v11  ;;  %v4789_v57 = vunpack.i.l.bf16 %v4788_v11  ;;  %v6461_v43 = vsel %vm7196_vm8, %v2968_v46, %v7199_v2  ;;  %vm7260_vm8 = vcmask 1043456  }
 0x747   : > { %v6422_v62 = vsel %vm434_vm1, %v5920_v10, %v4795_v61  ;;  %v6426_v0 = vsel %vm434_vm1, %v5916_v24, %v4794_v13  ;;  %4847 = vrot.lane.b32.xlu1 %v4846_v51, %s5148_s21 }
 0x748   : > { %v2860_v4 = vrot.slane %v6422_v62, 1  ;;  %v2858_v7 = vrot.slane %v6426_v0, 1  ;;  %v6446_v10 = vsel %vm434_vm1, %v5922_v12, %v4790_v21  ;;  %v6450_v44 = vsel %vm434_vm1, %v5918_v29, %v4789_v57  ;;  %v6494_v21 = vld [vmem:[%s7179_s7 + $0x18] sm:$0xff]  }
 0x749   : > { %4852 = vrot.lane.b32.xlu0 %v4851_v36, %s5148_s21  ;;  %v2856_v12 = vrot.slane %v6446_v10, 1  ;;  %v2855_v39 = vrot.slane %v6450_v44, 1  ;;  %v2942_v29 = vsel %vm6350_vm15, 0.0, %v2854_v30  ;;  %v4856_v59 = vpack.i.bf16 %v6450_v44, %v6346_v52 }
 0x74a   : > { %v4866_v8 = vpack.i.bf16 %v6426_v0, %v6446_v10  ;;  %v2861_v47 = vsel %vm2839_vm4, %v2858_v7, %v2860_v4 }
 0x74b   : > { %v2857_v22 = vsel %vm2839_vm4, %v2855_v39, %v2856_v12  ;;  %v2859_v33 = vsel %vm2839_vm4, %v2856_v12, %v2858_v7  ;;  %v2946_v30 = vsel %vm6275_vm7, 0.0, %v2861_v47  ;;  %4857 = vrot.lane.b32.xlu1 %v4856_v59, %s5147_s16  ;;  %v2972_v7 = vrot.slane %v6346_v52, 7  ;;  %v7259_v39 = vld [vmem:[#allocation12_spill] sm:$0xff] }
 0x74c   : > { %v4803_v37 = vpop.permute.xlu1 %4802  ;;  %v2944_v27 = vsel %vm6258_vm5, 0.0, %v2857_v22  ;;  %v2945_v19 = vsel %vm6262_vm6, 0.0, %v2859_v33 }
 0x74d   : > { %4867 = vrot.lane.b32.xlu0 %v4866_v8, %s5147_s16  ;;  %v4805_v61 = vunpack.i.h.bf16 %v4803_v37  ;;  %v4804_v13 = vunpack.i.l.bf16 %v4803_v37  ;;  %v4798_v11 = vpop.permute.xlu0 %4797  ;;  %v4861_v25 = vpack.i.bf16 %v2944_v27, %v2942_v29  ;;  %v4871_v36 = vpack.i.bf16 %v2946_v30, %v2945_v19  ;;  %v7261_v30 = vld [vmem:[#allocation14_spill] sm:$0xff] }
 0x74e   : > { %v4800_v57 = vunpack.i.h.bf16 %v4798_v11  ;;  %v4799_v51 = vunpack.i.l.bf16 %v4798_v11  ;;  %v3554_v8 = vsel %vm7260_vm8, %v6307_v49, 0  ;;  %vm6572_vm8 = vcmp.eq.s32.totalorder %v2765_v38, 0 }
 0x74f   : > { %v6499_v12 = vsel %vm434_vm1, %v5936_v17, %v4805_v61  ;;  %v6503_v59 = vsel %vm434_vm1, %v7259_v39, %v4804_v13  ;;  %4618 = vmatpush3.bf16.msra.mxu1 %v3554_v8  ;;  %v7262_v61 = vld [vmem:[#allocation13_spill] sm:$0xff]  ;;  %4862 = vrot.lane.b32.xlu1 %v4861_v25, %s5148_s21 }
 0x750   : > { %v4813_v33 = vpop.permute.xlu1 %4812  ;;  %v6513_v17 = vsel %vm434_vm1, %v7261_v30, %v4800_v57  ;;  %v6517_v13 = vsel %vm434_vm1, %v7262_v61, %v4799_v51  ;;  %4643 = vmatprep.subr.bf16.mxu1 %v6494_v21  ;;  %v7198_v19 = vrot.slane %v6499_v12, 1  ;;  %v2866_v39 = vrot.slane %v6503_v59, 1  ;;  %v7263_v30 = vld [vmem:[#allocation5_spill] sm:$0xff]  ;;  %v7264_v51 = vld [vmem:[#allocation2_spill] sm:$0xff] }
 0x751   : > { %v4815_v49 = vunpack.i.h.bf16 %v4813_v33  ;;  %v4814_v11 = vunpack.i.l.bf16 %v4813_v33  ;;  %v4808_v27 = vpop.permute.xlu0 %4807  ;;  %v2864_v8 = vrot.slane %v6513_v17, 1  ;;  %v2862_v57 = vrot.slane %v6517_v13, 1 }
 0x752   : > { %v4810_v33 = vunpack.i.h.bf16 %v4808_v27  ;;  %v4809_v61 = vunpack.i.l.bf16 %v4808_v27  ;;  %v4881_v27 = vpack.i.bf16 %v6503_v59, %v6513_v17 }
 0x753   : > { %v6527_v46 = vsel %vm434_vm1, %v7263_v30, %v4815_v49  ;;  %v6531_v25 = vsel %vm434_vm1, %v7264_v51, %v4814_v11  ;;  %4872 = vrot.lane.b32.xlu1 %v4871_v36, %s5148_s21  ;;  %v4876_v11 = vpack.i.bf16 %v6517_v13, %v6422_v62  ;;  %v2865_v36 = vsel %vm2839_vm4, %v2862_v57, %v2864_v8 }
 0x754   : > { %v2875_v26 = vrot.slane %v6527_v46, 1  ;;  %v6540_v49 = vsel %vm434_vm1, %v7265_v16, %v4810_v33  ;;  %v2873_v51 = vrot.slane %v6531_v25, 1  ;;  %v6552_v40 = vsel %vm434_vm1, %v7266_v58, %v4809_v61 }
 0x755   : > { %4877 = vrot.lane.b32.xlu0 %v4876_v11, %s5147_s16  ;;  %v2863_v16 = vsel %vm2839_vm4, %v2860_v4, %v2862_v57  ;;  %v2867_v53 = vsel %vm2839_vm4, %v2864_v8, %v2866_v39  ;;  %v2869_v30 = vsel %vm2839_vm4, %v2866_v39, %v7198_v19  ;;  %v2871_v15 = vrot.slane %v6540_v49, 1 }
 0x756   : > { %v2947_v58 = vsel %vm6294_vm11, 0.0, %v2863_v16  ;;  %v2948_v61 = vsel %vm6300_vm12, 0.0, %v2865_v36  ;;  %v2870_v4 = vrot.slane %v6552_v40, 1  ;;  %v2949_v16 = vsel %vm6369_vm0, 0.0, %v2867_v53  ;;  %v7271_v53 = vld [vmem:[#allocation10_spill] sm:$0xff] }
 0x757   : > { %4882 = vrot.lane.b32.xlu1 %v4881_v27, %s5147_s16  ;;  %v4886_v57 = vpack.i.bf16 %v2948_v61, %v2947_v58  ;;  %v2950_v36 = vsel %vm6350_vm15, 0.0, %v2869_v30  ;;  %v4901_v19 = vpack.i.bf16 %v6540_v49, %v6552_v40  ;;  %v4896_v27 = vpack.i.bf16 %v6527_v46, %v6531_v25  ;;  %v7270_v58 = vld [vmem:[#allocation9_spill] sm:$0xff] }
 0x758   : > { %v4823_v33 = vpop.permute.xlu1 %4822  ;;  %v2992_v37 = vrot.slane %v6540_v49, 7  ;;  %v2991_v29 = vrot.slane %v6552_v40, 7  ;;  %v4891_v2 = vpack.i.bf16 %v2950_v36, %v2949_v16 }
 0x759   : > { %v4825_v11 = vunpack.i.h.bf16 %v4823_v33  ;;  %v4818_v63 = vpop.permute.xlu0 %4817  ;;  %4887 = vrot.lane.b32.xlu0 %v4886_v57, %s5148_s21  ;;  %v4824_v38 = vunpack.i.l.bf16 %v4823_v33  ;;  %v2874_v33 = vsel %vm2839_vm4, %v2871_v15, %v2873_v51 }
 0x75a   : > { %v4820_v8 = vunpack.i.h.bf16 %v4818_v63  ;;  %v4819_v47 = vunpack.i.l.bf16 %v4818_v63  ;;  %v7269_v63 = vld [vmem:[#allocation7_spill] sm:$0xff]  ;;  %v2953_v49 = vsel %vm6262_vm6, 0.0, %v2874_v33  ;;  %vm6630_vm6 = vcmp.eq.s32.totalorder %v2772_v9, 0 }
 0x75b   : > { %v6587_v1 = vsel %vm434_vm1, %v7269_v63, %v4825_v11  ;;  %v2872_v11 = vsel %vm2839_vm4, %v2870_v4, %v2871_v15  ;;  %4892 = vrot.lane.b32.xlu1 %v4891_v2, %s5148_s21  ;;  %v7272_v4 = vld [vmem:[#allocation8_spill] sm:$0xff]  ;;  %v7278_v33 = vrot.slane %v6450_v44, 7 }
 0x75c   : > { %v6591_v61 = vsel %vm434_vm1, %v7270_v58, %v4820_v8  ;;  %v6595_v30 = vsel %vm434_vm1, %v7271_v53, %v4819_v47  ;;  %v2876_v8 = vsel %vm2839_vm4, %v2873_v51, %v2875_v26  ;;  %v2883_v63 = vrot.slane %v6587_v1, 1 }
 0x75d   : > { %v2879_v22 = vrot.slane %v6591_v61, 1  ;;  %v2877_v57 = vrot.slane %v6595_v30, 1  ;;  %v2952_v47 = vsel %vm6258_vm5, 0.0, %v2872_v11  ;;  %v4911_v40 = vpack.i.bf16 %v6591_v61, %v6595_v30  ;;  %4902 = vrot.lane.b32.xlu0 %v4901_v19, %s5147_s16 }
 0x75e   : > { %v3004_v58 = vrot.slane %v6587_v1, 7  ;;  %v4906_v15 = vpack.i.bf16 %v2953_v49, %v2952_v47  ;;  %v2708_v51 = vsel %vm434_vm1, %v7272_v4, %v4824_v38  ;;  %v3000_v18 = vrot.slane %v6591_v61, 7 }
 0x75f   : > { %v2878_v16 = vsel %vm2839_vm4, %v2875_v26, %v2877_v57  ;;  %v2881_v36 = vrot.slane %v2708_v51, 1  ;;  %v2880_v50 = vsel %vm2839_vm4, %v2877_v57, %v2879_v22  ;;  %v2998_v11 = vrot.slane %v6595_v30, 7  ;;  %4897 = vrot.lane.b32.xlu1 %v4896_v27, %s5147_s16 }
 0x760   : > { %v2955_v53 = vsel %vm6294_vm11, 0.0, %v2878_v16  ;;  %v2954_v2 = vsel %vm6275_vm7, 0.0, %v2876_v8  ;;  %v2956_v19 = vsel %vm6300_vm12, 0.0, %v2880_v50  ;;  %vm7273_vm5 = vcmask 1043456  }
 0x761   : > { %v3377_v38 = vsel %vm7273_vm5, %v6363_v6, 0  ;;  %v3002_v61 = vrot.slane %v2708_v51, 7  ;;  %v4916_v5 = vpack.i.bf16 %v2956_v19, %v2955_v53  ;;  %v2882_v57 = vsel %vm2839_vm4, %v2879_v22, %v2881_v36  ;;  %4907 = vrot.lane.b32.xlu0 %v4906_v15, %s5148_s21 }
 0x762   : > { %v2884_v3 = vsel %vm2839_vm4, %v2881_v36, %v2883_v63  ;;  %4590 = vmatpush3.bf16.msra.mxu0 %v3377_v38  ;;  %v2957_v42 = vsel %vm6369_vm0, 0.0, %v2882_v57  ;;  %v7276_v30 = vrot.slane %v6381_v32, 7  ;;  %vm7277_vm7 = vcmask 1040384  }
 0x763   : > { %v2958_v6 = vsel %vm6350_vm15, 0.0, %v2884_v3  ;;  %vm7279_vm11 = vmmov %vm7277_vm7  ;;  %v7280_v47 = vrot.slane %v6446_v10, 7  ;;  %v7281_v32 = vmov %v7278_v33  ;;  %v7283_v15 = vrot.slane %v6426_v0, 7  ;;  %3213 = vrot.lane.b32.xlu1 %v2954_v2, %s5148_s21 }
 0x764   : > { %v6649_v22 = vsel %vm7277_vm7, %v7276_v30, %v2972_v7  ;;  %v6654_v8 = vsel %vm7279_vm11, 0.0, %v7278_v33  ;;  %v4921_v27 = vpack.i.bf16 %v2958_v6, %v2957_v42  ;;  %vm7282_vm12 = vmmov %vm7277_vm7  ;;  %v7286_v50 = vrot.slane %v6422_v62, 7 }
 0x765   : > { %v3063_v45 = vsel %vm6572_vm8, 0.0, %v6649_v22  ;;  %v3065_v14 = vsel %vm6375_vm3, 0.0, %v6654_v8  ;;  %v6667_v49 = vsel %vm7282_vm12, %v7281_v32, %v7280_v47  ;;  %v7284_v4 = vmov %v7280_v47  ;;  %vm7285_vm15 = vmmov %vm7277_vm7  ;;  %4912 = vrot.lane.b32.xlu0 %v4911_v40, %s5147_s16 }
 0x766   : > { %v6674_v16 = vsel %vm7285_vm15, %v7284_v4, %v7283_v15  ;;  %v3066_v36 = vsel %vm6326_vm14, 0.0, %v6667_v49  ;;  %v7287_v53 = vmov %v7283_v15  ;;  %vm7288_vm0 = vmmov %vm7277_vm7  ;;  %v7289_v19 = vrot.slane %v6517_v13, 7 }
 0x767   : > { %v6684_v44 = vsel %vm7288_vm0, %v7287_v53, %v7286_v50  ;;  %v7290_v38 = vmov %v7286_v50  ;;  %vm7291_vm5 = vmmov %vm7288_vm0  ;;  %v3067_v57 = vsel %vm6290_vm10, 0.0, %v6674_v16  ;;  %v7292_v42 = vrot.slane %v6513_v17, 7  ;;  %3125 = vrot.lane.b32.xlu1 %v2708_v51, %s5147_s16 }
 0x768   : > { %v6691_v10 = vsel %vm7291_vm5, %v7290_v38, %v7289_v19  ;;  %v3068_v3 = vsel %vm6279_vm9, 0.0, %v6684_v44  ;;  %v7293_v6 = vmov %v7289_v19  ;;  %vm7294_vm7 = vmmov %vm7288_vm0  ;;  %v7295_v30 = vrot.slane %v6503_v59, 7 }
 0x769   : > { %v3069_v0 = vsel %vm6434_vm2, 0.0, %v6691_v10  ;;  %v6707_v62 = vsel %vm7294_vm7, %v7293_v6, %v7292_v42  ;;  %v7296_v33 = vmov %v7292_v42  ;;  %vm7297_vm11 = vmmov %vm7288_vm0  ;;  %v7299_v15 = vrot.slane %v6527_v46, 7  ;;  %4917 = vrot.lane.b32.xlu0 %v4916_v5, %s5148_s21 }
 0x76a   : > { %v6716_v47 = vsel %vm7297_vm11, %v7296_v33, %v7295_v30  ;;  %v3070_v32 = vsel %vm6440_vm13, 0.0, %v6707_v62  ;;  %vm7298_vm12 = vmmov %vm7288_vm0  ;;  %v7300_v2 = vrot.slane %v6531_v25, 7  ;;  %v6741_v53 = vsel %vm7288_vm0, %v2991_v29, %v2992_v37 }
 0x76b   : > { %v6722_v13 = vsel %vm7298_vm12, 0.0, %v2991_v29  ;;  %vm7301_vm15 = vmmov %vm7288_vm0  ;;  %v3071_v17 = vsel %vm6572_vm8, 0.0, %v6716_v47  ;;  %v3074_v42 = vsel %vm6326_vm14, 0.0, %v6741_v53  ;;  %v7304_v6 = vmov %v7299_v15  ;;  %4922 = vrot.lane.b32.xlu1 %v4921_v27, %s5148_s21 }
 0x76c   : > { %v6729_v40 = vsel %vm7301_vm15, %v7300_v2, %v7299_v15  ;;  %v3073_v4 = vsel %vm6375_vm3, 0.0, %v6722_v13  ;;  %v7302_v19 = vmov %v7300_v2  ;;  %vm7303_vm5 = vmmov %vm7288_vm0  ;;  %v7310_v2 = vrot.slane %v6499_v12, 7 }
 0x76d   : > { %v3076_v50 = vsel %vm6279_vm9, 0.0, %v6729_v40  ;;  %v6746_v38 = vsel %vm7303_vm5, %v2992_v37, %v7302_v19  ;;  %vm7305_vm7 = vmmov %vm7288_vm0  ;;  %v7311_v19 = vrot.slane %v6503_v59, 7  ;;  %3095 = vrot.lane.b32.xlu0 %v6342_v56, %s5147_s16  ;;  %v7313_v5 = vrot.slane %v6342_v56, 1 }
 0x76e   : > { %v6754_v30 = vsel %vm7305_vm7, %v7304_v6, %v2998_v11  ;;  %vm7306_vm11 = vmmov %vm7288_vm0  ;;  %v3075_v29 = vsel %vm6290_vm10, 0.0, %v6746_v38  ;;  %vm2919_vm7 = vcmp.eq.s32.totalorder %v2772_v9, 7 }
 0x76f   : > { %v6757_v33 = vsel %vm7306_vm11, %v2998_v11, %v3000_v18  ;;  %v3077_v37 = vsel %vm6434_vm2, 0.0, %v6754_v30  ;;  %vm7307_vm12 = vmmov %vm7288_vm0  ;;  %v7308_v11 = vrot.slane %v6342_v56, 7  ;;  %v6785_v6 = vsel %vm7288_vm0, %v7311_v19, %v7310_v2 }
 0x770   : > { %v3078_v25 = vsel %vm6440_vm13, 0.0, %v6757_v33  ;;  %v6771_v46 = vsel %vm7307_vm12, %v3000_v18, %v3002_v61  ;;  %vm7309_vm15 = vmmov %vm7288_vm0  ;;  %v2911_v56 = vsel %vm2839_vm4, %v2883_v63, 0.0  ;;  %vm3273_vm11 = vcmask 130048  }
 0x771   : > { %v6778_v15 = vsel %vm7309_vm15, %v2972_v7, %v7308_v11  ;;  %vm7312_vm5 = vmmov %vm7288_vm0  ;;  %v2909_v11 = vsel %vm2839_vm4, %v7313_v5, 0.0  ;;  %3111 = vrot.lane.b32.xlu0 %v6499_v12, %s5147_s16  ;;  %v2959_v20 = vsel %vm2919_vm7, 0.0, %v2911_v56  ;;  %vm7316_vm12 = vcmask 64512  }
 0x772   : > { %v6799_v7 = vsel %vm7312_vm5, %v3002_v61, %v3004_v58  ;;  %v2943_v2 = vsel %vm2919_vm7, 0.0, %v2909_v11  ;;  %v7314_v58 = vrot.slane %v6499_v12, 1  ;;  %vm3338_vm15 = vcmask 195584  }
 0x773   : > { %3191 = vrot.lane.b32.xlu1 %v2943_v2, %s5148_s21  ;;  %v7343_v24 = vsel %vm6630_vm6, 0.0, %v6778_v15 }
 0x774   : > { %v2910_v61 = vsel %vm2839_vm4, %v7314_v58, 0.0  ;;  %vm7318_vm4 = vmmov %vm7316_vm12 }
 0x775   : > { %v2951_v27 = vsel %vm2919_vm7, 0.0, %v2910_v61  ;;  %3127 = vrot.lane.b32.xlu0 %v6587_v1, %s5147_s16  ;;  %v7315_v61 = vsel %vm6326_vm14, 0.0, %v6358_v60  ;;  %v7317_v1 = vsel %vm6375_vm3, 0.0, %v6387_v31  ;;  %vm7320_vm0 = vmmov %vm7318_vm4 }
 0x776   : > { %vm7322_vm5 = vmmov %vm7320_vm0 }
 0x777   : > { %3207 = vrot.lane.b32.xlu1 %v2951_v27, %s5148_s21  ;;  %vm7324_vm7 = vmmov %vm7320_vm0 }
 0x77b   : > { %3223 = vrot.lane.b32.xlu1 %v2959_v20, %s5148_s21 }
 0x7ad   : > { %v4828_v58 = vpop.permute.xlu1 %4827 }
 0x7ae   : > { %v4830_v18 = vunpack.i.h.bf16 %v4828_v58  ;;  %v4829_v60 = vunpack.i.l.bf16 %v4828_v58  ;;  %v7321_v58 = vsel %vm6279_vm9, 0.0, %v6316_v55 }
 0x7af   : > { %v4833_v9 = vpop.permute.xlu0 %4832 }
 0x7b0   : > { %v4835_v19 = vunpack.i.h.bf16 %v4833_v9  ;;  %v4834_v5 = vunpack.i.l.bf16 %v4833_v9  ;;  %v5149_v9 = vmov 0.0  }
 0x7b2   : > { %v3250_v27 = vsel %vm7316_vm12, %v7315_v61, %v4835_v19  ;;  %v3249_v63 = vsel %vm7318_vm4, %v7317_v1, %v4834_v5  ;;  %vm7326_vm12 = vmmov %vm7320_vm0  ;;  %vm7327_vm4 = vcmask 1043456  }
 0x7b3   : > { %v4838_v12 = vpop.permute.xlu0 %4837 }
 0x7b4   : > { %v4840_v11 = vunpack.i.h.bf16 %v4838_v12  ;;  %v4839_v2 = vunpack.i.l.bf16 %v4838_v12 }
 0x7b6   : > { %v3275_v56 = vsel %vm3273_vm11, %v3250_v27, %v4840_v11  ;;  %v3274_v20 = vsel %vm3273_vm11, %v3249_v63, %v4839_v2  ;;  %v7319_v2 = vsel %vm6290_vm10, 0.0, %v6324_v28  ;;  %v7323_v63 = vsel %vm6440_vm13, 0.0, %v6461_v43  ;;  %v4943_v43 = vld [vmem:[%s7179_s7 + $0x20] ss:$0 sps:$4 sm:$0xff]  }
 0x7b7   : > { %v3298_v12 = vpack.c.bf16 %v3274_v20, %v5149_v9  ;;  %v3313_v59 = vpack.c.bf16 %v3275_v56, %v3274_v20  ;;  %v4843_v52 = vpop.permute.xlu0 %4842  ;;  %v3251_v27 = vsel %vm7320_vm0, %v7319_v2, %v4829_v60  ;;  %v7325_v28 = vsel %vm6434_vm2, 0.0, %v6456_v48  ;;  %vm7328_vm0 = vmmov %vm7327_vm4 }
 0x7b8   : > { %v4845_v51 = vunpack.i.h.bf16 %v4843_v52  ;;  %v4844_v19 = vunpack.i.l.bf16 %v4843_v52  ;;  %v3252_v52 = vsel %vm7322_vm5, %v7321_v58, %v4830_v18 }
 0x7b9   : > { %4591 = vmatprep.mubr.msk.bf16.mxu0 %vm3338_vm15, %v3313_v59  ;;  %4619 = vmatprep.mubr.msk.bf16.mxu1 %vm3338_vm15, %v3298_v12  ;;  %v4848_v31 = vpop.permute.xlu1 %4847 }
 0x7ba   : > { %v4850_v5 = vunpack.i.h.bf16 %v4848_v31  ;;  %v4849_v61 = vunpack.i.l.bf16 %v4848_v31  ;;  %v3254_v20 = vsel %vm7324_vm7, %v7323_v63, %v4845_v51  ;;  %v3253_v12 = vsel %vm7326_vm12, %v7325_v28, %v4844_v19  ;;  %vm7329_vm7 = vmmov %vm7322_vm5 }
 0x7bb   : > { %v4853_v11 = vpop.permute.xlu0 %4852  ;;  %vm7330_vm12 = vmmov %vm7322_vm5 }
 0x7bc   : > { %v4855_v1 = vunpack.i.h.bf16 %v4853_v11  ;;  %v4854_v59 = vunpack.i.l.bf16 %v4853_v11  ;;  %v3277_v60 = vsel %vm3273_vm11, %v3252_v52, %v4850_v5  ;;  %v3276_v55 = vsel %vm3273_vm11, %v3251_v27, %v4849_v61 }
 0x7bd   : > { %v6862_v31 = vpack.c.bf16 %v3276_v55, %v3275_v56  ;;  %v3314_v18 = vpack.c.bf16 %v3277_v60, %v3276_v55  ;;  %v4858_v58 = vpop.permute.xlu1 %4857  ;;  %v3711_v61 = vsel %vm7327_vm4, %v4943_v43, 0  ;;  %vm7331_vm4 = vmmov %vm7322_vm5 }
 0x7be   : > { %v3278_v11 = vsel %vm3273_vm11, %v3253_v12, %v4854_v59  ;;  %v3279_v2 = vsel %vm3273_vm11, %v3254_v20, %v4855_v1  ;;  %v4860_v56 = vunpack.i.h.bf16 %v4858_v58  ;;  %v4859_v19 = vunpack.i.l.bf16 %v4858_v58 }
 0x7bf   : > { %v6869_v51 = vpack.c.bf16 %v3278_v11, %v3277_v60  ;;  %v3315_v48 = vpack.c.bf16 %v3279_v2, %v3278_v11  ;;  %4592 = vmatmul.mubr.msk.bf16.vlgmr.msra.gmra.mrb[96].mxu0 %vm3338_vm15, %v3314_v18  ;;  %4620 = vmatmul.mubr.msk.bf16.vlgmr.msra.gmra.mrb[72].mxu1 %vm3338_vm15, %v6862_v31  ;;  %v4868_v5 = vpop.permute.xlu0 %4867 }
 0x7c0   : > { %4644 = vmatpush3.bf16.msra.mxu1 %v6494_v21  ;;  %v3257_v59 = vsel %vm7322_vm5, %v3065_v14, %v4860_v56  ;;  %v3255_v21 = vsel %vm7329_vm7, %v3063_v45, %v4859_v19  ;;  %v4870_v63 = vunpack.i.h.bf16 %v4868_v5  ;;  %v4869_v20 = vunpack.i.l.bf16 %v4868_v5 }
 0x7c1   : > { %4595 = vmatprep.mubr.msk.bf16.mxu0 %vm3338_vm15, %v3315_v48  ;;  %4623 = vmatprep.mubr.msk.bf16.mxu1 %vm3338_vm15, %v6869_v51  ;;  %v4863_v27 = vpop.permute.xlu1 %4862 }
 0x7c2   : > { %4751 = vmatprep.subr.msk.bf16.mxu1 %vm7328_vm0, %v4943_v43  ;;  %v4865_v52 = vunpack.i.h.bf16 %v4863_v27  ;;  %v4864_v1 = vunpack.i.l.bf16 %v4863_v27  ;;  %v3259_v45 = vsel %vm7330_vm12, %v3067_v57, %v4870_v63  ;;  %v3258_v18 = vsel %vm7331_vm4, %v3066_v36, %v4869_v20  ;;  %vm7332_vm0 = vmmov %vm7331_vm4 }
 0x7c3   : > { %vm7333_vm5 = vmmov %vm7332_vm0 }
 0x7c4   : > { %4646 = vmatpush3.bf16.msra.mxu1 %v3711_v61  ;;  %v6891_v28 = vsel %vm3273_vm11, %v3255_v21, %v4864_v1  ;;  %v6894_v12 = vsel %vm3273_vm11, %v3257_v59, %v4865_v52  ;;  %vm7334_vm7 = vmmov %vm7332_vm0 }
 0x7c5   : > { %v6897_v60 = vpack.c.bf16 %v6891_v28, %v3279_v2  ;;  %v3302_v8 = vpack.c.bf16 %v6894_v12, %v5149_v9  ;;  %v4873_v14 = vpop.permute.xlu1 %4872  ;;  %vm7335_vm12 = vmmov %vm7332_vm0 }
 0x7c6   : > { %v4875_v55 = vunpack.i.h.bf16 %v4873_v14  ;;  %v4874_v22 = vunpack.i.l.bf16 %v4873_v14  ;;  %vm7336_vm4 = vmmov %vm7332_vm0 }
 0x7c7   : > { %v4878_v11 = vpop.permute.xlu0 %4877  ;;  %4624 = vmatmul.mubr.msk.bf16.gmra.mrb[76].mxu1 %vm3338_vm15, %v6897_v60  ;;  %vm7338_vm10 = vmmov %vm7332_vm0 }
 0x7c8   : > { %v6914_v2 = vsel %vm3273_vm11, %v3258_v18, %v4874_v22  ;;  %v6917_v43 = vsel %vm3273_vm11, %v3259_v45, %v4875_v55  ;;  %4627 = vmatprep.mubr.msk.bf16.mxu1 %vm3338_vm15, %v3302_v8  ;;  %v4880_v36 = vunpack.i.h.bf16 %v4878_v11  ;;  %v4879_v57 = vunpack.i.l.bf16 %v4878_v11  ;;  %vm7339_vm14 = vmmov %vm7332_vm0 }
 0x7c9   : > { %v6922_v16 = vpack.c.bf16 %v6917_v43, %v6914_v2  ;;  %v3317_v49 = vpack.c.bf16 %v6914_v2, %v6894_v12  ;;  %v4883_v48 = vpop.permute.xlu1 %4882  ;;  %vm7340_vm9 = vmmov %vm7332_vm0 }
 0x7ca   : > { %v3261_v5 = vsel %vm7332_vm0, %v3069_v0, %v4880_v36  ;;  %v3260_v61 = vsel %vm7333_vm5, %v3068_v3, %v4879_v57  ;;  %v4885_v27 = vunpack.i.h.bf16 %v4883_v48  ;;  %v4884_v52 = vunpack.i.l.bf16 %v4883_v48  ;;  %vm7337_vm5 = vmmov %vm7332_vm0 }
 0x7cb   : > { %v4888_v58 = vpop.permute.xlu0 %4887  ;;  %vm7342_vm2 = vmmov %vm7332_vm0 }
 0x7cc   : > { %v4890_v56 = vunpack.i.h.bf16 %v4888_v58  ;;  %v4889_v19 = vunpack.i.l.bf16 %v4888_v58  ;;  %v3263_v20 = vsel %vm7334_vm7, %v3071_v17, %v4885_v27  ;;  %v3262_v8 = vsel %vm7335_vm12, %v3070_v32, %v4884_v52  ;;  %vm7344_vm13 = vmmov %vm7332_vm0 }
 0x7cd   : > { %v4893_v0 = vpop.permute.xlu1 %4892  ;;  %vm7346_vm3 = vmmov %vm7332_vm0 }
 0x7ce   : > { %v6937_v1 = vsel %vm3273_vm11, %v3260_v61, %v4889_v19  ;;  %v6940_v59 = vsel %vm3273_vm11, %v3261_v5, %v4890_v56  ;;  %v4895_v44 = vunpack.i.h.bf16 %v4893_v0  ;;  %v4894_v3 = vunpack.i.l.bf16 %v4893_v0 }
 0x7cf   : > { %v6944_v21 = vpack.c.bf16 %v6940_v59, %v6937_v1  ;;  %v3318_v10 = vpack.c.bf16 %v6937_v1, %v6917_v43  ;;  %v4903_v63 = vpop.permute.xlu0 %4902  ;;  %4628 = vmatmul.mubr.msk.bf16.gmra.mrb[80].mxu1 %vm3338_vm15, %v6922_v16  ;;  %v7090_v1 = vld [vmem:[%s7180_s8] ss:$0 sm:$0xff] }
 0x7d0   : > { %v4905_v14 = vunpack.i.h.bf16 %v4903_v63  ;;  %v4904_v55 = vunpack.i.l.bf16 %v4903_v63  ;;  %v6963_v22 = vsel %vm3273_vm11, %v3262_v8, %v4894_v3  ;;  %v6966_v45 = vsel %vm3273_vm11, %v3263_v20, %v4895_v44 }
 0x7d1   : > { %4631 = vmatprep.mubr.msk.bf16.mxu1 %vm3338_vm15, %v6944_v21  ;;  %v6970_v47 = vpack.c.bf16 %v6966_v45, %v6963_v22  ;;  %v3319_v62 = vpack.c.bf16 %v6963_v22, %v6940_v59  ;;  %v4898_v17 = vpop.permute.xlu1 %4897 }
 0x7d2   : > { %v4899_v18 = vunpack.i.l.bf16 %v4898_v17  ;;  %v3265_v57 = vsel %vm7336_vm4, %v3073_v4, %v4904_v55  ;;  %v3266_v48 = vsel %vm7332_vm0, %v3074_v42, %v4905_v14  ;;  %v4900_v38 = vunpack.i.h.bf16 %v4898_v17 }
 0x7d3   : > { %v4908_v32 = vpop.permute.xlu0 %4907 }
 0x7d4   : > { %v4910_v11 = vunpack.i.h.bf16 %v4908_v32  ;;  %v4909_v36 = vunpack.i.l.bf16 %v4908_v32  ;;  %v3267_v58 = vsel %vm7337_vm5, %v3075_v29, %v4899_v18  ;;  %v3268_v52 = vsel %vm7338_vm10, %v3076_v50, %v4900_v38 }
 0x7d5   : > { %v3214_v13 = vpop.permute.xlu1 %3213  ;;  %v7341_v50 = vsel %vm6572_vm8, 0.0, %v6771_v46  ;;  %vm7348_vm8 = vmmov %vm7332_vm0 }
 0x7d6   : > { %v6990_v56 = vsel %vm3273_vm11, %v3265_v57, %v4909_v36  ;;  %v3291_v54 = vsel %vm3273_vm11, %v3266_v48, %v4910_v11  ;;  %v3292_v34 = vsel %vm3273_vm11, %v3267_v58, %v3214_v13  ;;  %v7345_v57 = vsel %vm6630_vm6, 0.0, %v6785_v6 }
 0x7d7   : > { %v3306_v4 = vpack.c.bf16 %v6990_v56, %v5149_v9  ;;  %v3321_v41 = vpack.c.bf16 %v3291_v54, %v6990_v56  ;;  %v4913_v53 = vpop.permute.xlu0 %4912  ;;  %4632 = vmatmul.mubr.msk.bf16.gmra.mrb[84].mxu1 %vm3338_vm15, %v6970_v47  ;;  %v3307_v42 = vpack.c.bf16 %v3292_v34, %v3291_v54  ;;  %v7347_v54 = vsel %vm6630_vm6, 0.0, %v6799_v7 }
 0x7d8   : > { %v4914_v29 = vunpack.i.l.bf16 %v4913_v53  ;;  %v4915_v0 = vunpack.i.h.bf16 %v4913_v53 }
 0x7d9   : > { %4635 = vmatprep.mubr.msk.bf16.mxu1 %vm3338_vm15, %v3306_v4  ;;  %v3126_v19 = vpop.permute.xlu1 %3125 }
 0x7da   : > { %v3269_v63 = vsel %vm7339_vm14, %v3077_v37, %v4914_v29  ;;  %v3270_v23 = vsel %vm7340_vm9, %v3078_v25, %v4915_v0  ;;  %v3271_v30 = vsel %vm7342_vm2, %v7341_v50, %v3126_v19 }
 0x7db   : > { %v4918_v5 = vpop.permute.xlu0 %4917 }
 0x7dc   : > { %v4920_v61 = vunpack.i.h.bf16 %v4918_v5  ;;  %v4919_v27 = vunpack.i.l.bf16 %v4918_v5 }
 0x7dd   : > { %v4923_v14 = vpop.permute.xlu1 %4922 }
 0x7de   : > { %v3293_v44 = vsel %vm3273_vm11, %v3268_v52, %v4919_v27  ;;  %v3294_v3 = vsel %vm3273_vm11, %v3269_v63, %v4920_v61  ;;  %v4925_v35 = vunpack.i.h.bf16 %v4923_v14  ;;  %v4924_v40 = vunpack.i.l.bf16 %v4923_v14 }
 0x7df   : > { %v3308_v20 = vpack.c.bf16 %v3294_v3, %v3293_v44  ;;  %v3322_v8 = vpack.c.bf16 %v3293_v44, %v3292_v34  ;;  %v3096_v55 = vpop.permute.xlu0 %3095  ;;  %4636 = vmatmul.mubr.msk.bf16.gmra.mrb[88].mxu1 %vm3338_vm15, %v3307_v42 }
 0x7e0   : > { %v3296_v37 = vsel %vm3273_vm11, %v3271_v30, %v4925_v35  ;;  %v3295_v17 = vsel %vm3273_vm11, %v3270_v23, %v4924_v40  ;;  %v3256_v33 = vsel %vm7344_vm13, %v7343_v24, %v3096_v55 }
 0x7e1   : > { %4639 = vmatprep.mubr.msk.bf16.mxu1 %vm3338_vm15, %v3308_v20  ;;  %v3309_v32 = vpack.c.bf16 %v3296_v37, %v3295_v17  ;;  %v3323_v18 = vpack.c.bf16 %v3295_v17, %v3294_v3 }
 0x7e3   : > { %v3112_v39 = vpop.permute.xlu0 %3111 }
 0x7e4   : > { %v3264_v48 = vsel %vm7346_vm3, %v7345_v57, %v3112_v39 }
 0x7e5   : > { %v3192_v25 = vpop.permute.xlu1 %3191 }
 0x7e6   : > { %v3281_v46 = vsel %vm3273_vm11, %v3256_v33, %v3192_v25 }
 0x7e7   : > { %v3316_v11 = vpack.c.bf16 %v3281_v46, %v6891_v28  ;;  %v3685_v36 = vpack.c.bf16 %v5149_v9, %v3281_v46  ;;  %4640 = vmatmul.mubr.msk.bf16.gmra.mrb[92].mxu1 %vm3338_vm15, %v3309_v32  ;;  %v3128_v56 = vpop.permute.xlu0 %3127 }
 0x7e8   : > { %4647 = vmatprep.mubr.msk.bf16.mxu1 %vm3338_vm15, %v6862_v31  ;;  %v3272_v13 = vsel %vm7348_vm8, %v7347_v54, %v3128_v56 }
 0x7e9   : > { %v3208_v58 = vpop.permute.xlu1 %3207  ;;  %4596 = vmatmul.mubr.msk.bf16.gmra.mrb[100].mxu0 %vm3338_vm15, %v3316_v11 }
 0x7ea   : > { %v3289_v15 = vsel %vm3273_vm11, %v3264_v48, %v3208_v58  ;;  %4599 = vmatprep.mubr.msk.bf16.mxu0 %vm3338_vm15, %v3317_v49 }
 0x7eb   : > { %v3320_v6 = vpack.c.bf16 %v3289_v15, %v6966_v45  ;;  %v3686_v28 = vpack.c.bf16 %v5149_v9, %v3289_v15 }
 0x7ed   : > { %v3224_v4 = vpop.permute.xlu1 %3223 }
 0x7ee   : > { %v3297_v53 = vsel %vm3273_vm11, %v3272_v13, %v3224_v4 }
 0x7ef   : > { %v3324_v34 = vpack.c.bf16 %v3297_v53, %v3296_v37  ;;  %v3687_v12 = vpack.c.bf16 %v5149_v9, %v3297_v53  ;;  %4648 = vmatmul.mubr.msk.bf16.vlgmr.msra.gmra.mrb[72].mxu1 %vm3338_vm15, %v6869_v51 }
 0x7f0   : > { %4651 = vmatprep.mubr.msk.bf16.mxu1 %vm3338_vm15, %v6897_v60 }
 0x7f1   : > { %4600 = vmatmul.mubr.msk.bf16.gmra.mrb[104].mxu0 %vm3338_vm15, %v3318_v10 }
 0x7f2   : > { %4603 = vmatprep.mubr.msk.bf16.mxu0 %vm3338_vm15, %v3319_v62 }
 0x7f7   : > { %4652 = vmatmul.mubr.msk.bf16.gmra.mrb[76].mxu1 %vm3338_vm15, %v3685_v36 }
 0x7f8   : > { %4655 = vmatprep.mubr.msk.bf16.mxu1 %vm3338_vm15, %v6922_v16 }
 0x7f9   : > { %4604 = vmatmul.mubr.msk.bf16.gmra.mrb[108].mxu0 %vm3338_vm15, %v3320_v6 }
 0x7fa   : > { %4607 = vmatprep.mubr.msk.bf16.mxu0 %vm3338_vm15, %v3321_v41 }
 0x7ff   : > { %4656 = vmatmul.mubr.msk.bf16.gmra.mrb[80].mxu1 %vm3338_vm15, %v6944_v21 }
 0x800   : > { %4659 = vmatprep.mubr.msk.bf16.mxu1 %vm3338_vm15, %v6970_v47 }
 0x801   : > { %4608 = vmatmul.mubr.msk.bf16.gmra.mrb[112].mxu0 %vm3338_vm15, %v3322_v8 }
 0x802   : > { %4611 = vmatprep.mubr.msk.bf16.mxu0 %vm3338_vm15, %v3323_v18 }
 0x807   : > { %4660 = vmatmul.mubr.msk.bf16.gmra.mrb[84].mxu1 %vm3338_vm15, %v3686_v28 }
 0x808   : > { %4663 = vmatprep.mubr.msk.bf16.mxu1 %vm3338_vm15, %v3307_v42 }
 0x809   : > { %4612 = vmatmul.mubr.msk.bf16.gmra.mrb[116].mxu0 %vm3338_vm15, %v3324_v34 }
 0x80f   : > { %4664 = vmatmul.mubr.msk.bf16.gmra.mrb[88].mxu1 %vm3338_vm15, %v3308_v20 }
 0x810   : > { %4667 = vmatprep.mubr.msk.bf16.mxu1 %vm3338_vm15, %v3309_v32 }
 0x817   : > { %4668 = vmatmul.mubr.msk.bf16.gmra.mrb[92].mxu1 %vm3338_vm15, %v3687_v12 }
 0x892   : > { %v4593_v26 = vpop.f32.mrb[96].mxu0 }
 0x893   : > { %v3413_v7 = vpop.f32.mrb[97].mxu0 }
 0x894   : > { %v4594_v9 = vpop.f32.mrb[98].mxu0 }
 0x895   : > { %v3416_v31 = vpop.f32.mrb[99].mxu0 }
 0x8bc   : > { %v4597_v51 = vpop.f32.mrb[100].mxu0 }
 0x8bd   : > { %v3429_v60 = vpop.f32.mrb[101].mxu0 }
 0x8be   : > { %v4598_v2 = vpop.f32.mrb[102].mxu0 }
 0x8bf   : > { %v3432_v43 = vpop.f32.mrb[103].mxu0 }
 0x8c2   : > { %v4649_v49 = vpop.f32.mrb[72].mxu1 }
 0x8c3   : > { %v4673_v21 = vadd.f32 %v4649_v49, %v4593_v26  ;;  %v3747_v10 = vpop.f32.mrb[73].mxu1 }
 0x8c4   : > { %v4601_v16 = vpop.f32.mrb[104].mxu0  ;;  %v4674_v45 = vadd.f32 %v3747_v10, %v3413_v7  ;;  %v4650_v47 = vpop.f32.mrb[74].mxu1 }
 0x8c5   : > { %v3445_v59 = vpop.f32.mrb[105].mxu0  ;;  %v3875_v62 = vadd.f32 %v4673_v21, %v7090_v1  ;;  %v4675_v38 = vadd.f32 %v4650_v47, %v4594_v9  ;;  %v3750_v42 = vpop.f32.mrb[75].mxu1 }
 0x8c6   : > { %v4602_v22 = vpop.f32.mrb[106].mxu0  ;;  %v3873_v29 = vadd.f32 %v4674_v45, %v7090_v1  ;;  %v4676_v19 = vadd.f32 %v3750_v42, %v3416_v31 }
 0x8c7   : > { %v3448_v41 = vpop.f32.mrb[107].mxu0  ;;  %3899 = vst.msk [vmem:[%s7095_s11 + $0x10] sm:$0xff] %vm434_vm1, %v3875_v62  ;;  %v3876_v5 = vadd.f32 %v4675_v38, %v7090_v1 }
 0x8c8   : > { %3897 = vst.msk [vmem:[%s7095_s11] sm:$0xff] %vm434_vm1, %v3873_v29  ;;  %v3874_v61 = vadd.f32 %v4676_v19, %v7090_v1 }
 0x8c9   : > { %3900 = vst.msk [vmem:[%s7095_s11 + $0x18] sm:$0xff] %vm434_vm1, %v3876_v5 }
 0x8ca   : > { %3898 = vst.msk [vmem:[%s7095_s11 + $0x8] sm:$0xff] %vm434_vm1, %v3874_v61  ;;  %v4653_v52 = vpop.f32.mrb[76].mxu1 }
 0x8cb   : > { %v4677_v63 = vadd.f32 %v4653_v52, %v4597_v51  ;;  %v3763_v44 = vpop.f32.mrb[77].mxu1 }
 0x8cc   : > { %v4605_v27 = vpop.f32.mrb[108].mxu0  ;;  %v4678_v20 = vadd.f32 %v3763_v44, %v3429_v60  ;;  %v4654_v8 = vpop.f32.mrb[78].mxu1 }
 0x8cd   : > { %v3461_v0 = vpop.f32.mrb[109].mxu0  ;;  %v3879_v14 = vadd.f32 %v4677_v63, %v7090_v1  ;;  %v4679_v35 = vadd.f32 %v4654_v8, %v4598_v2  ;;  %v3766_v40 = vpop.f32.mrb[79].mxu1 }
 0x8ce   : > { %v4606_v3 = vpop.f32.mrb[110].mxu0  ;;  %v3877_v23 = vadd.f32 %v4678_v20, %v7090_v1  ;;  %v4680_v50 = vadd.f32 %v3766_v40, %v3432_v43 }
 0x8cf   : > { %v3464_v55 = vpop.f32.mrb[111].mxu0  ;;  %3903 = vst.msk [vmem:[%s7095_s11 + $0x30] sm:$0xff] %vm434_vm1, %v3879_v14  ;;  %v3880_v30 = vadd.f32 %v4679_v35, %v7090_v1 }
 0x8d0   : > { %3901 = vst.msk [vmem:[%s7095_s11 + $0x20] sm:$0xff] %vm434_vm1, %v3877_v23  ;;  %v3878_v37 = vadd.f32 %v4680_v50, %v7090_v1 }
 0x8d1   : > { %3904 = vst.msk [vmem:[%s7095_s11 + $0x38] sm:$0xff] %vm434_vm1, %v3880_v30 }
 0x8d2   : > { %3902 = vst.msk [vmem:[%s7095_s11 + $0x28] sm:$0xff] %vm434_vm1, %v3878_v37  ;;  %v4657_v32 = vpop.f32.mrb[80].mxu1 }
 0x8d3   : > { %v4681_v24 = vadd.f32 %v4657_v32, %v4601_v16  ;;  %v3779_v33 = vpop.f32.mrb[81].mxu1 }
 0x8d4   : > { %v4609_v17 = vpop.f32.mrb[112].mxu0  ;;  %v4682_v39 = vadd.f32 %v3779_v33, %v3445_v59  ;;  %v4658_v46 = vpop.f32.mrb[82].mxu1 }
 0x8d5   : > { %v3477_v18 = vpop.f32.mrb[113].mxu0  ;;  %v3883_v11 = vadd.f32 %v4681_v24, %v7090_v1  ;;  %v4683_v57 = vadd.f32 %v4658_v46, %v4602_v22  ;;  %v3782_v48 = vpop.f32.mrb[83].mxu1 }
 0x8d6   : > { %v4610_v25 = vpop.f32.mrb[114].mxu0  ;;  %v3881_v58 = vadd.f32 %v4682_v39, %v7090_v1  ;;  %v4684_v15 = vadd.f32 %v3782_v48, %v3448_v41 }
 0x8d7   : > { %v3480_v36 = vpop.f32.mrb[115].mxu0  ;;  %3907 = vst.msk [vmem:[%s7095_s11 + $0x50] sm:$0xff] %vm434_vm1, %v3883_v11  ;;  %v3884_v56 = vadd.f32 %v4683_v57, %v7090_v1 }
 0x8d8   : > { %3905 = vst.msk [vmem:[%s7095_s11 + $0x40] sm:$0xff] %vm434_vm1, %v3881_v58  ;;  %v3882_v6 = vadd.f32 %v4684_v15, %v7090_v1 }
 0x8d9   : > { %3908 = vst.msk [vmem:[%s7095_s11 + $0x58] sm:$0xff] %vm434_vm1, %v3884_v56 }
 0x8da   : > { %3906 = vst.msk [vmem:[%s7095_s11 + $0x48] sm:$0xff] %vm434_vm1, %v3882_v6  ;;  %v4661_v54 = vpop.f32.mrb[84].mxu1 }
 0x8db   : > { %v4685_v4 = vadd.f32 %v4661_v54, %v4605_v27  ;;  %v3795_v53 = vpop.f32.mrb[85].mxu1 }
 0x8dc   : > { %v4613_v28 = vpop.f32.mrb[116].mxu0  ;;  %v4686_v12 = vadd.f32 %v3795_v53, %v3461_v0  ;;  %v4662_v26 = vpop.f32.mrb[86].mxu1 }
 0x8dd   : > { %v3493_v13 = vpop.f32.mrb[117].mxu0  ;;  %v3887_v7 = vadd.f32 %v4685_v4, %v7090_v1  ;;  %v4687_v31 = vadd.f32 %v4662_v26, %v4606_v3  ;;  %v3798_v51 = vpop.f32.mrb[87].mxu1 }
 0x8de   : > { %v4614_v34 = vpop.f32.mrb[118].mxu0  ;;  %v3885_v60 = vadd.f32 %v4686_v12, %v7090_v1  ;;  %v4688_v2 = vadd.f32 %v3798_v51, %v3464_v55 }
 0x8df   : > { %v3496_v9 = vpop.f32.mrb[119].mxu0  ;;  %3911 = vst.msk [vmem:[%s7095_s11 + $0x70] sm:$0xff] %vm434_vm1, %v3887_v7  ;;  %v3888_v43 = vadd.f32 %v4687_v31, %v7090_v1 }
 0x8e0   : > { %3909 = vst.msk [vmem:[%s7095_s11 + $0x60] sm:$0xff] %vm434_vm1, %v3885_v60  ;;  %v3886_v16 = vadd.f32 %v4688_v2, %v7090_v1 }
 0x8e1   : > { %3912 = vst.msk [vmem:[%s7095_s11 + $0x78] sm:$0xff] %vm434_vm1, %v3888_v43 }
 0x8e2   : > { %3910 = vst.msk [vmem:[%s7095_s11 + $0x68] sm:$0xff] %vm434_vm1, %v3886_v16  ;;  %v4665_v49 = vpop.f32.mrb[88].mxu1 }
 0x8e3   : > { %v4689_v59 = vadd.f32 %v4665_v49, %v4609_v17  ;;  %v3811_v21 = vpop.f32.mrb[89].mxu1 }
 0x8e4   : > { %v4690_v10 = vadd.f32 %v3811_v21, %v3477_v18  ;;  %v4666_v22 = vpop.f32.mrb[90].mxu1 }
 0x8e5   : > { %v3891_v45 = vadd.f32 %v4689_v59, %v7090_v1  ;;  %v4691_v47 = vadd.f32 %v4666_v22, %v4610_v25  ;;  %v3814_v62 = vpop.f32.mrb[91].mxu1 }
 0x8e6   : > { %v3889_v41 = vadd.f32 %v4690_v10, %v7090_v1  ;;  %v4692_v38 = vadd.f32 %v3814_v62, %v3480_v36 }
 0x8e7   : > { %3915 = vst.msk [vmem:[%s7095_s11 + $0x90] sm:$0xff] %vm434_vm1, %v3891_v45  ;;  %v3892_v42 = vadd.f32 %v4691_v47, %v7090_v1 }
 0x8e8   : > { %3913 = vst.msk [vmem:[%s7095_s11 + $0x80] sm:$0xff] %vm434_vm1, %v3889_v41  ;;  %v3890_v29 = vadd.f32 %v4692_v38, %v7090_v1 }
 0x8e9   : > { %3916 = vst.msk [vmem:[%s7095_s11 + $0x98] sm:$0xff] %vm434_vm1, %v3892_v42 }
 0x8ea   : > { %3914 = vst.msk [vmem:[%s7095_s11 + $0x88] sm:$0xff] %vm434_vm1, %v3890_v29  ;;  %v4669_v19 = vpop.f32.mrb[92].mxu1 }
 0x8eb   : > { %v4693_v5 = vadd.f32 %v4669_v19, %v4613_v28  ;;  %v3827_v61 = vpop.f32.mrb[93].mxu1 }
 0x8ec   : > { %v4694_v27 = vadd.f32 %v3827_v61, %v3493_v13  ;;  %v4670_v52 = vpop.f32.mrb[94].mxu1 }
 0x8ed   : > { %v3895_v0 = vadd.f32 %v4693_v5, %v7090_v1  ;;  %v4695_v63 = vadd.f32 %v4670_v52, %v4614_v34  ;;  %v3830_v44 = vpop.f32.mrb[95].mxu1 }
 0x8ee   : > { %v3893_v3 = vadd.f32 %v4694_v27, %v7090_v1  ;;  %v4696_v20 = vadd.f32 %v3830_v44, %v3496_v9 }
 0x8ef   : > { %3919 = vst.msk [vmem:[%s7095_s11 + $0xb0] sm:$0xff] %vm434_vm1, %v3895_v0  ;;  %v3896_v8 = vadd.f32 %v4695_v63, %v7090_v1 }
 0x8f0   : > { %3917 = vst.msk [vmem:[%s7095_s11 + $0xa0] sm:$0xff] %vm434_vm1, %v3893_v3  ;;  %v3894_v14 = vadd.f32 %v4696_v20, %v7090_v1 }
 0x8f1   : > { %3920 = vst.msk [vmem:[%s7095_s11 + $0xb8] sm:$0xff] %vm434_vm1, %v3896_v8 }
 0x8f2   : > { %3918 = vst.msk [vmem:[%s7095_s11 + $0xa8] sm:$0xff] %vm434_vm1, %v3894_v14 }
 0x8f3 PF: > { %s19_s30 = sadd.s32 1, %s5142_s30  }
 0x8f4   : > { %p16_p4 = scmp.ge.s32.totalorder %s19_s30, 4  }
 0x8f6   :  { %18 = sbr.rel (!%p16_p4) target bundleno = 1 (0x1), region = 88 }

</bundles_post_ra>
